<compile_context>
chip_gen: v5e
topology: v5e:2x2
jax: 0.10.0
libtpu: 0.0.40
codegen_flags: <defaults>
</compile_context>

<pallas_src>
import jax
import jax.numpy as jnp
from jax.experimental import pallas as pl
from jax.experimental.pallas import tpu as pltpu

# ----------------------------- Model constants -----------------------------

Z_DIM = 32
EPS = 1e-5
KSIZE = 3

# Scaled-down version of the PyTorch channel plan
# (256/256/256/384/384/512/512/1024/1024/1024, hidden 1024).
CONV_CHANNELS = [(16, 16), (16, 16), (16, 16), (16, 24), (24, 24),
                 (24, 32), (32, 32), (32, 64), (64, 64), (64, 64)]
NUM_CONV = len(CONV_CHANNELS)
HIDDEN = 64

C_IN = CONV_CHANNELS[0][0]          # 16
L_IN = 32
L_FINAL = L_IN - 2 * NUM_CONV       # each valid conv(k=3) drops 2 -> 12
C_FINAL = CONV_CHANNELS[-1][1]      # 64
FLAT_LOGICAL = C_FINAL * L_FINAL    # PyTorch infer_flat_size equivalent

# Layout constants.
B_TILE = 8                          # batch rows per tile (sublane-aligned shifts)
C_PAD = 128                         # lane width of activations / conv outputs
CIN_PACK = 64                       # packed contraction width for weights (>= max cin)
H_PAD = 128
Z_PAD = 128

assert all(max(cin, cout) <= CIN_PACK for cin, cout in CONV_CHANNELS)
assert C_FINAL <= CIN_PACK and CIN_PACK % 16 == 0

BATCH = 12                          # real samples (padded to 16 -> 2 batch tiles)


# ----------------------------- Fused Pallas kernel -----------------------------

def q_net_kernel(x_ref, wc_ref, bc_ref, w1_ref, bfc_ref, w2_ref, o_ref):
    """Entire Q_net forward for one batch tile of B_TILE samples, fully fused.

    x_ref:   (L_IN*B_TILE, C_PAD)  f32   activations, row = l*B_TILE + b
    wc_ref:  (NUM_CONV, KSIZE, CIN_PACK, C_PAD) bf16  per-tap BN-folded conv weights
    bc_ref:  (NUM_CONV, C_PAD)     f32   per-layer folded biases
    w1_ref:  (L_FINAL, CIN_PACK, H_PAD) bf16  FC1 weight, flatten permutation folded in
    bfc_ref: (2, H_PAD)            f32   row 0 = folded FC1 bias, row 1 = FC2 bias
    w2_ref:  (H_PAD, Z_PAD)        bf16
    o_ref:   (B_TILE, Z_PAD)       f32   output (first Z_DIM lanes are real)
    """
    a = x_ref[...]                                   # (L*8, 128) f32
    L = L_IN
    for i in range(NUM_CONV):                        # static unroll: 10 fused layers
        L_out = L - (KSIZE - 1)
        m = L_out * B_TILE
        # Lanes >= CIN_PACK of `a` are identically zero -> packed-K LHS is exact.
        a_lane = a[:, :CIN_PACK]                     # f32, lane slice once per layer
        y = None
        for k in range(KSIZE):
            # Tap k = rows shifted by k*B_TILE: (8,128)-tile-aligned free view.
            lhs = a_lane[k * B_TILE: k * B_TILE + m, :].astype(jnp.bfloat16)
            t = jnp.dot(lhs, wc_ref[i, k], preferred_element_type=jnp.float32)
            y = t if y is None else y + t            # sum-of-3 taps (no im2col buffer)
        a = jnp.maximum(y + bc_ref[i:i + 1, :], 0.0)  # f32 bias + ReLU (BN folded)
        L = L_out

    # FC1 head as a single batched contraction.  a is (L_FINAL*8, C_PAD) with rows
    # for position l being the contiguous (8,128) block a[l*8:(l+1)*8].
    a3 = a[:, :CIN_PACK].astype(jnp.bfloat16).reshape(L_FINAL, B_TILE, CIN_PACK)
    h3 = jnp.einsum("lbc,lch->lbh", a3, w1_ref[...],
                    preferred_element_type=jnp.float32)      # (L_FINAL, 8, H_PAD)
    h = jnp.maximum(jnp.sum(h3, axis=0) + bfc_ref[0:1, :], 0.0)   # f32 epilogue
    out = jnp.dot(h.astype(jnp.bfloat16), w2_ref[...],
                  preferred_element_type=jnp.float32) + bfc_ref[1:2, :]
    o_ref[...] = out.astype(o_ref.dtype)


def q_net_forward(kp, x_ncl):
    """x_ncl: (B, C, L) like PyTorch.  Returns (B, Z_DIM)."""
    Bsz, Cin, Lin = x_ncl.shape
    assert Cin == C_IN and Lin == L_IN
    NT = pl.cdiv(Bsz, B_TILE)
    Bp = NT * B_TILE

    # NCL -> (L, B, C), pad batch to a multiple of B_TILE and channels to 128 lanes,
    # then lay out rows tile-major / l-major / b-minor:  row = t*(L*8) + l*8 + b.
    x = jnp.transpose(x_ncl, (2, 0, 1))
    x = jnp.pad(x, ((0, 0), (0, Bp - Bsz), (0, C_PAD - Cin)))
    x = (x.reshape(Lin, NT, B_TILE, C_PAD)
           .transpose(1, 0, 2, 3)
           .reshape(NT * Lin * B_TILE, C_PAD))

    # Advisory cost estimate (per call, all tiles).
    flops = 0
    L = L_IN
    for _ in range(NUM_CONV):
        L_out = L - (KSIZE - 1)
        flops += 2 * (L_out * B_TILE) * (KSIZE * CIN_PACK) * C_PAD
        L = L_out
    flops += 2 * B_TILE * (L_FINAL * CIN_PACK) * H_PAD
    flops += 2 * B_TILE * H_PAD * Z_PAD
    flops *= NT
    weight_bytes = sum(int(v.size) * v.dtype.itemsize
                       for v in (kp["wc"], kp["bc"], kp["w1"], kp["bfc"], kp["w2"]))
    bytes_accessed = weight_bytes + int(x.size) * 4 + NT * B_TILE * Z_PAD * 4

    out = pl.pallas_call(
        q_net_kernel,
        out_shape=jax.ShapeDtypeStruct((NT * B_TILE, Z_PAD), jnp.float32),
        grid=(NT,),
        in_specs=[
            # Activation tile follows the batch grid axis (pipelined).
            pl.BlockSpec((Lin * B_TILE, C_PAD), lambda i: (i, 0)),
            # Weights: constant index_map -> DMA'd once, resident across all tiles.
            # TODO(synk): at real (unscaled) channel widths move wc/w1 to
            # memory_space=pl.ANY and stream per-layer slabs with make_async_copy.
            pl.BlockSpec((NUM_CONV, KSIZE, CIN_PACK, C_PAD), lambda i: (0, 0, 0, 0)),
            pl.BlockSpec((NUM_CONV, C_PAD), lambda i: (0, 0)),
            pl.BlockSpec((L_FINAL, CIN_PACK, H_PAD), lambda i: (0, 0, 0)),
            pl.BlockSpec((2, H_PAD), lambda i: (0, 0)),
            pl.BlockSpec((H_PAD, Z_PAD), lambda i: (0, 0)),
        ],
        out_specs=pl.BlockSpec((B_TILE, Z_PAD), lambda i: (i, 0)),
        compiler_params=pltpu.CompilerParams(
            dimension_semantics=("parallel",),        # 2 TCs split batch tiles on v7x
            vmem_limit_bytes=32 * 1024 * 1024),
        cost_estimate=pl.CostEstimate(flops=flops, transcendentals=0,
                                      bytes_accessed=bytes_accessed),
    )(x, kp["wc"], kp["bc"], kp["w1"], kp["bfc"], kp["w2"])
    return out[:Bsz, :Z_DIM]


# ----------------------------- Parameters -----------------------------

def init_logical_params(key):
    """PyTorch-shaped ('logical') parameters: conv w/b + BN stats, FC w/b + BN."""
    convs = []
    for (cin, cout) in CONV_CHANNELS:
        key, kw, kb, kg, kbe, km, kv = jax.random.split(key, 7)
        w = jax.random.normal(kw, (KSIZE, cin, cout), jnp.float32) / jnp.sqrt(3.0 * cin)
        b = 0.05 * jax.random.normal(kb, (cout,), jnp.float32)
        gamma = 1.0 + 0.05 * jax.random.normal(kg, (cout,), jnp.float32)
        beta = 0.05 * jax.random.normal(kbe, (cout,), jnp.float32)
        mean = 0.05 * jax.random.normal(km, (cout,), jnp.float32)
        var = 1.0 + 0.1 * jnp.abs(jax.random.normal(kv, (cout,), jnp.float32))
        convs.append((w, b, gamma, beta, mean, var))

    key, k1, kb1, kg1, kbe1, km1, kv1, k2, kb2 = jax.random.split(key, 9)
    # PyTorch flatten is channel-major: FC1 row index = c * L_FINAL + l.
    w1 = jax.random.normal(k1, (FLAT_LOGICAL, HIDDEN), jnp.float32) / jnp.sqrt(float(FLAT_LOGICAL))
    b1 = 0.05 * jax.random.normal(kb1, (HIDDEN,), jnp.float32)
    g1 = 1.0 + 0.05 * jax.random.normal(kg1, (HIDDEN,), jnp.float32)
    be1 = 0.05 * jax.random.normal(kbe1, (HIDDEN,), jnp.float32)
    m1 = 0.05 * jax.random.normal(km1, (HIDDEN,), jnp.float32)
    v1 = 1.0 + 0.1 * jnp.abs(jax.random.normal(kv1, (HIDDEN,), jnp.float32))
    w2 = jax.random.normal(k2, (HIDDEN, Z_DIM), jnp.float32) / jnp.sqrt(float(HIDDEN))
    b2 = 0.05 * jax.random.normal(kb2, (Z_DIM,), jnp.float32)
    return {"convs": convs, "fc": (w1, b1, g1, be1, m1, v1, w2, b2)}


def prepare_kernel_params(lp):
    """One-time preprocessing: fold BN into weights, pack the contraction dim to
    CIN_PACK sublanes, pad outputs to 128 lanes, permute FC1 to match the
    channels-last conv layout, and cast all matmul weights to bf16."""
    wc_list, bc_list = [], []
    for (w, b, gamma, beta, mean, var), (cin, cout) in zip(lp["convs"], CONV_CHANNELS):
        scale = gamma / jnp.sqrt(var + EPS)
        w_f = w * scale[None, None, :]                        # BN scale folded in
        b_f = (b - mean) * scale + beta
        w_pad = jnp.zeros((KSIZE, CIN_PACK, C_PAD), jnp.float32)
        w_pad = w_pad.at[:, :cin, :cout].set(w_f)
        wc_list.append(w_pad)
        bc_list.append(jnp.zeros((C_PAD,), jnp.float32).at[:cout].set(b_f))
    wc = jnp.stack(wc_list).astype(jnp.bfloat16)              # (10, 3, 64, 128)
    bc = jnp.stack(bc_list)                                   # (10, 128) f32

    w1, b1, g1, be1, m1, v1, w2, b2 = lp["fc"]
    s1 = g1 / jnp.sqrt(v1 + EPS)
    w1_f = w1 * s1[None, :]
    b1_f = (b1 - m1) * s1 + be1
    # Channel-major (c*L + l) PyTorch rows -> (l, c, h) order used by the kernel.
    w1_lch = w1_f.reshape(C_FINAL, L_FINAL, HIDDEN).transpose(1, 0, 2)
    w1_pad = (jnp.zeros((L_FINAL, CIN_PACK, H_PAD), jnp.float32)
              .at[:, :C_FINAL, :HIDDEN].set(w1_lch))
    w2_pad = jnp.zeros((H_PAD, Z_PAD), jnp.float32).at[:HIDDEN, :Z_DIM].set(w2)
    bfc = (jnp.zeros((2, H_PAD), jnp.float32)
           .at[0, :HIDDEN].set(b1_f)
           .at[1, :Z_DIM].set(b2))
    return {"wc": wc, "bc": bc,
            "w1": w1_pad.astype(jnp.bfloat16),
            "w2": w2_pad.astype(jnp.bfloat16),
            "bfc": bfc}


# ----------------------------- Plain-JAX reference -----------------------------

def q_net_reference(lp, x_ncl):
    """PyTorch-faithful f32 math on the logical (unfolded, unpadded) parameters."""
    x = jnp.transpose(x_ncl, (0, 2, 1))                       # (B, L, C)
    for (w, b, gamma, beta, mean, var) in lp["convs"]:
        L_out = x.shape[1] - (KSIZE - 1)
        acc = sum(jnp.einsum("blc,cd->bld", x[:, k:k + L_out, :], w[k])
                  for k in range(KSIZE)) + b
        scale = gamma / jnp.sqrt(var + EPS)
        x = jnp.maximum((acc - mean) * scale + beta, 0.0)
    # PyTorch Flatten(start_dim=1) on (B, C, L): channel-major flatten.
    flat = jnp.transpose(x, (0, 2, 1)).reshape(x.shape[0], -1)
    w1, b1, g1, be1, m1, v1, w2, b2 = lp["fc"]
    h = flat @ w1 + b1
    s1 = g1 / jnp.sqrt(v1 + EPS)
    h = jnp.maximum((h - m1) * s1 + be1, 0.0)
    return h @ w2 + b2


# ----------------------------- Main -----------------------------

if __name__ == "__main__":
    key = jax.random.PRNGKey(0)
    key, kx = jax.random.split(key)
    x = jax.random.normal(kx, (BATCH, C_IN, L_IN), jnp.float32)

    logical = init_logical_params(key)
    kparams = prepare_kernel_params(logical)

    out = jax.block_until_ready(q_net_forward(kparams, x))
    assert out.shape == (BATCH, Z_DIM), out.shape

    # bf16 matmul operands -> compare against the f32 reference with a
    # quantization-aware (relative-to-scale) tolerance.
    ref = q_net_reference(logical, x)
    err = float(jnp.max(jnp.abs(out - ref)))
    tol = 5e-2 * float(jnp.max(jnp.abs(ref))) + 1e-3
    assert err <= tol, (err, tol)

    print("KERNEL_OK")
</pallas_src>

<mosaic_0001>
module attributes {stable_mosaic.version = 11 : i64} {
  func.func @q_net_kernel(%arg0: i32, %arg1: memref<256x128xf32, #tpu.memory_space<vmem>>, %arg2: memref<10x3x64x128xbf16, #tpu.memory_space<vmem>>, %arg3: memref<10x128xf32, #tpu.memory_space<vmem>>, %arg4: memref<12x64x128xbf16, #tpu.memory_space<vmem>>, %arg5: memref<2x128xf32, #tpu.memory_space<vmem>>, %arg6: memref<128x128xbf16, #tpu.memory_space<vmem>>, %arg7: memref<8x128xf32, #tpu.memory_space<vmem>>) attributes {dimension_semantics = [#tpu.dimension_semantics<parallel>], iteration_bounds = array<i64: 2>, scalar_prefetch = 0 : i64, scratch_operands = 0 : i64, tpu.core_type = #tpu.core_type<tc>, window_params = [{transform_indices = @transform_0, window_bounds = array<i64: 256, 128>}, {pipeline_mode = #tpu.pipeline_mode<synchronous>, transform_indices = @transform_1, window_bounds = array<i64: 10, 3, 64, 128>}, {pipeline_mode = #tpu.pipeline_mode<synchronous>, transform_indices = @transform_2, window_bounds = array<i64: 10, 128>}, {pipeline_mode = #tpu.pipeline_mode<synchronous>, transform_indices = @transform_3, window_bounds = array<i64: 12, 64, 128>}, {pipeline_mode = #tpu.pipeline_mode<synchronous>, transform_indices = @transform_4, window_bounds = array<i64: 2, 128>}, {pipeline_mode = #tpu.pipeline_mode<synchronous>, transform_indices = @transform_5, window_bounds = array<i64: 128, 128>}, {transform_indices = @transform_6, window_bounds = array<i64: 8, 128>}]} {
    %c0 = arith.constant 0 : index
    %c0_0 = arith.constant 0 : index
    %0 = vector.load %arg1[%c0, %c0_0] : memref<256x128xf32, #tpu.memory_space<vmem>>, vector<256x128xf32>
    %1 = vector.extract_strided_slice %0 {offsets = [0, 0], sizes = [256, 64], strides = [1, 1]} : vector<256x128xf32> to vector<256x64xf32>
    %2 = vector.extract_strided_slice %1 {offsets = [0, 0], sizes = [240, 64], strides = [1, 1]} : vector<256x64xf32> to vector<240x64xf32>
    %3 = arith.truncf %2 : vector<240x64xf32> to vector<240x64xbf16>
    %c0_1 = arith.constant 0 : index
    %c0_2 = arith.constant 0 : index
    %c0_3 = arith.constant 0 : index
    %c0_4 = arith.constant 0 : index
    %4 = vector.load %arg2[%c0_1, %c0_2, %c0_3, %c0_4] : memref<10x3x64x128xbf16, #tpu.memory_space<vmem>>, vector<1x1x64x128xbf16>
    %5 = vector.shape_cast %4 : vector<1x1x64x128xbf16> to vector<64x128xbf16>
    %cst = arith.constant dense<0.000000e+00> : vector<240x128xf32>
    %6 = tpu.matmul %3, %5, %cst {dimension_numbers = #tpu.dot_dimension_numbers<[1], [0], [0], [1], [0, 0, 1, 1], [], []>} : vector<240x64xbf16>, vector<64x128xbf16>, vector<240x128xf32> -> vector<240x128xf32>
    %7 = vector.extract_strided_slice %1 {offsets = [8, 0], sizes = [240, 64], strides = [1, 1]} : vector<256x64xf32> to vector<240x64xf32>
    %8 = arith.truncf %7 : vector<240x64xf32> to vector<240x64xbf16>
    %c0_5 = arith.constant 0 : index
    %c1 = arith.constant 1 : index
    %c0_6 = arith.constant 0 : index
    %c0_7 = arith.constant 0 : index
    %9 = vector.load %arg2[%c0_5, %c1, %c0_6, %c0_7] : memref<10x3x64x128xbf16, #tpu.memory_space<vmem>>, vector<1x1x64x128xbf16>
    %10 = vector.shape_cast %9 : vector<1x1x64x128xbf16> to vector<64x128xbf16>
    %cst_8 = arith.constant dense<0.000000e+00> : vector<240x128xf32>
    %11 = tpu.matmul %8, %10, %cst_8 {dimension_numbers = #tpu.dot_dimension_numbers<[1], [0], [0], [1], [0, 0, 1, 1], [], []>} : vector<240x64xbf16>, vector<64x128xbf16>, vector<240x128xf32> -> vector<240x128xf32>
    %12 = arith.addf %6, %11 : vector<240x128xf32>
    %13 = vector.extract_strided_slice %1 {offsets = [16, 0], sizes = [240, 64], strides = [1, 1]} : vector<256x64xf32> to vector<240x64xf32>
    %14 = arith.truncf %13 : vector<240x64xf32> to vector<240x64xbf16>
    %c0_9 = arith.constant 0 : index
    %c2 = arith.constant 2 : index
    %c0_10 = arith.constant 0 : index
    %c0_11 = arith.constant 0 : index
    %15 = vector.load %arg2[%c0_9, %c2, %c0_10, %c0_11] : memref<10x3x64x128xbf16, #tpu.memory_space<vmem>>, vector<1x1x64x128xbf16>
    %16 = vector.shape_cast %15 : vector<1x1x64x128xbf16> to vector<64x128xbf16>
    %cst_12 = arith.constant dense<0.000000e+00> : vector<240x128xf32>
    %17 = tpu.matmul %14, %16, %cst_12 {dimension_numbers = #tpu.dot_dimension_numbers<[1], [0], [0], [1], [0, 0, 1, 1], [], []>} : vector<240x64xbf16>, vector<64x128xbf16>, vector<240x128xf32> -> vector<240x128xf32>
    %18 = arith.addf %12, %17 : vector<240x128xf32>
    %c0_13 = arith.constant 0 : index
    %c0_14 = arith.constant 0 : index
    %19 = vector.load %arg3[%c0_13, %c0_14] : memref<10x128xf32, #tpu.memory_space<vmem>>, vector<1x128xf32>
    %20 = vector.broadcast %19 : vector<1x128xf32> to vector<240x128xf32>
    %21 = arith.addf %18, %20 : vector<240x128xf32>
    %cst_15 = arith.constant 0.000000e+00 : f32
    %22 = vector.broadcast %cst_15 : f32 to vector<240x128xf32>
    %23 = arith.maximumf %21, %22 : vector<240x128xf32>
    %24 = vector.extract_strided_slice %23 {offsets = [0, 0], sizes = [240, 64], strides = [1, 1]} : vector<240x128xf32> to vector<240x64xf32>
    %25 = vector.extract_strided_slice %24 {offsets = [0, 0], sizes = [224, 64], strides = [1, 1]} : vector<240x64xf32> to vector<224x64xf32>
    %26 = arith.truncf %25 : vector<224x64xf32> to vector<224x64xbf16>
    %c1_16 = arith.constant 1 : index
    %c0_17 = arith.constant 0 : index
    %c0_18 = arith.constant 0 : index
    %c0_19 = arith.constant 0 : index
    %27 = vector.load %arg2[%c1_16, %c0_17, %c0_18, %c0_19] : memref<10x3x64x128xbf16, #tpu.memory_space<vmem>>, vector<1x1x64x128xbf16>
    %28 = vector.shape_cast %27 : vector<1x1x64x128xbf16> to vector<64x128xbf16>
    %cst_20 = arith.constant dense<0.000000e+00> : vector<224x128xf32>
    %29 = tpu.matmul %26, %28, %cst_20 {dimension_numbers = #tpu.dot_dimension_numbers<[1], [0], [0], [1], [0, 0, 1, 1], [], []>} : vector<224x64xbf16>, vector<64x128xbf16>, vector<224x128xf32> -> vector<224x128xf32>
    %30 = vector.extract_strided_slice %24 {offsets = [8, 0], sizes = [224, 64], strides = [1, 1]} : vector<240x64xf32> to vector<224x64xf32>
    %31 = arith.truncf %30 : vector<224x64xf32> to vector<224x64xbf16>
    %c1_21 = arith.constant 1 : index
    %c1_22 = arith.constant 1 : index
    %c0_23 = arith.constant 0 : index
    %c0_24 = arith.constant 0 : index
    %32 = vector.load %arg2[%c1_21, %c1_22, %c0_23, %c0_24] : memref<10x3x64x128xbf16, #tpu.memory_space<vmem>>, vector<1x1x64x128xbf16>
    %33 = vector.shape_cast %32 : vector<1x1x64x128xbf16> to vector<64x128xbf16>
    %cst_25 = arith.constant dense<0.000000e+00> : vector<224x128xf32>
    %34 = tpu.matmul %31, %33, %cst_25 {dimension_numbers = #tpu.dot_dimension_numbers<[1], [0], [0], [1], [0, 0, 1, 1], [], []>} : vector<224x64xbf16>, vector<64x128xbf16>, vector<224x128xf32> -> vector<224x128xf32>
    %35 = arith.addf %29, %34 : vector<224x128xf32>
    %36 = vector.extract_strided_slice %24 {offsets = [16, 0], sizes = [224, 64], strides = [1, 1]} : vector<240x64xf32> to vector<224x64xf32>
    %37 = arith.truncf %36 : vector<224x64xf32> to vector<224x64xbf16>
    %c1_26 = arith.constant 1 : index
    %c2_27 = arith.constant 2 : index
    %c0_28 = arith.constant 0 : index
    %c0_29 = arith.constant 0 : index
    %38 = vector.load %arg2[%c1_26, %c2_27, %c0_28, %c0_29] : memref<10x3x64x128xbf16, #tpu.memory_space<vmem>>, vector<1x1x64x128xbf16>
    %39 = vector.shape_cast %38 : vector<1x1x64x128xbf16> to vector<64x128xbf16>
    %cst_30 = arith.constant dense<0.000000e+00> : vector<224x128xf32>
    %40 = tpu.matmul %37, %39, %cst_30 {dimension_numbers = #tpu.dot_dimension_numbers<[1], [0], [0], [1], [0, 0, 1, 1], [], []>} : vector<224x64xbf16>, vector<64x128xbf16>, vector<224x128xf32> -> vector<224x128xf32>
    %41 = arith.addf %35, %40 : vector<224x128xf32>
    %c1_31 = arith.constant 1 : index
    %c0_32 = arith.constant 0 : index
    %42 = vector.load %arg3[%c1_31, %c0_32] : memref<10x128xf32, #tpu.memory_space<vmem>>, vector<1x128xf32>
    %43 = vector.broadcast %42 : vector<1x128xf32> to vector<224x128xf32>
    %44 = arith.addf %41, %43 : vector<224x128xf32>
    %cst_33 = arith.constant 0.000000e+00 : f32
    %45 = vector.broadcast %cst_33 : f32 to vector<224x128xf32>
    %46 = arith.maximumf %44, %45 : vector<224x128xf32>
    %47 = vector.extract_strided_slice %46 {offsets = [0, 0], sizes = [224, 64], strides = [1, 1]} : vector<224x128xf32> to vector<224x64xf32>
    %48 = vector.extract_strided_slice %47 {offsets = [0, 0], sizes = [208, 64], strides = [1, 1]} : vector<224x64xf32> to vector<208x64xf32>
    %49 = arith.truncf %48 : vector<208x64xf32> to vector<208x64xbf16>
    %c2_34 = arith.constant 2 : index
    %c0_35 = arith.constant 0 : index
    %c0_36 = arith.constant 0 : index
    %c0_37 = arith.constant 0 : index
    %50 = vector.load %arg2[%c2_34, %c0_35, %c0_36, %c0_37] : memref<10x3x64x128xbf16, #tpu.memory_space<vmem>>, vector<1x1x64x128xbf16>
    %51 = vector.shape_cast %50 : vector<1x1x64x128xbf16> to vector<64x128xbf16>
    %cst_38 = arith.constant dense<0.000000e+00> : vector<208x128xf32>
    %52 = tpu.matmul %49, %51, %cst_38 {dimension_numbers = #tpu.dot_dimension_numbers<[1], [0], [0], [1], [0, 0, 1, 1], [], []>} : vector<208x64xbf16>, vector<64x128xbf16>, vector<208x128xf32> -> vector<208x128xf32>
    %53 = vector.extract_strided_slice %47 {offsets = [8, 0], sizes = [208, 64], strides = [1, 1]} : vector<224x64xf32> to vector<208x64xf32>
    %54 = arith.truncf %53 : vector<208x64xf32> to vector<208x64xbf16>
    %c2_39 = arith.constant 2 : index
    %c1_40 = arith.constant 1 : index
    %c0_41 = arith.constant 0 : index
    %c0_42 = arith.constant 0 : index
    %55 = vector.load %arg2[%c2_39, %c1_40, %c0_41, %c0_42] : memref<10x3x64x128xbf16, #tpu.memory_space<vmem>>, vector<1x1x64x128xbf16>
    %56 = vector.shape_cast %55 : vector<1x1x64x128xbf16> to vector<64x128xbf16>
    %cst_43 = arith.constant dense<0.000000e+00> : vector<208x128xf32>
    %57 = tpu.matmul %54, %56, %cst_43 {dimension_numbers = #tpu.dot_dimension_numbers<[1], [0], [0], [1], [0, 0, 1, 1], [], []>} : vector<208x64xbf16>, vector<64x128xbf16>, vector<208x128xf32> -> vector<208x128xf32>
    %58 = arith.addf %52, %57 : vector<208x128xf32>
    %59 = vector.extract_strided_slice %47 {offsets = [16, 0], sizes = [208, 64], strides = [1, 1]} : vector<224x64xf32> to vector<208x64xf32>
    %60 = arith.truncf %59 : vector<208x64xf32> to vector<208x64xbf16>
    %c2_44 = arith.constant 2 : index
    %c2_45 = arith.constant 2 : index
    %c0_46 = arith.constant 0 : index
    %c0_47 = arith.constant 0 : index
    %61 = vector.load %arg2[%c2_44, %c2_45, %c0_46, %c0_47] : memref<10x3x64x128xbf16, #tpu.memory_space<vmem>>, vector<1x1x64x128xbf16>
    %62 = vector.shape_cast %61 : vector<1x1x64x128xbf16> to vector<64x128xbf16>
    %cst_48 = arith.constant dense<0.000000e+00> : vector<208x128xf32>
    %63 = tpu.matmul %60, %62, %cst_48 {dimension_numbers = #tpu.dot_dimension_numbers<[1], [0], [0], [1], [0, 0, 1, 1], [], []>} : vector<208x64xbf16>, vector<64x128xbf16>, vector<208x128xf32> -> vector<208x128xf32>
    %64 = arith.addf %58, %63 : vector<208x128xf32>
    %c2_49 = arith.constant 2 : index
    %c0_50 = arith.constant 0 : index
    %65 = vector.load %arg3[%c2_49, %c0_50] : memref<10x128xf32, #tpu.memory_space<vmem>>, vector<1x128xf32>
    %66 = vector.broadcast %65 : vector<1x128xf32> to vector<208x128xf32>
    %67 = arith.addf %64, %66 : vector<208x128xf32>
    %cst_51 = arith.constant 0.000000e+00 : f32
    %68 = vector.broadcast %cst_51 : f32 to vector<208x128xf32>
    %69 = arith.maximumf %67, %68 : vector<208x128xf32>
    %70 = vector.extract_strided_slice %69 {offsets = [0, 0], sizes = [208, 64], strides = [1, 1]} : vector<208x128xf32> to vector<208x64xf32>
    %71 = vector.extract_strided_slice %70 {offsets = [0, 0], sizes = [192, 64], strides = [1, 1]} : vector<208x64xf32> to vector<192x64xf32>
    %72 = arith.truncf %71 : vector<192x64xf32> to vector<192x64xbf16>
    %c3 = arith.constant 3 : index
    %c0_52 = arith.constant 0 : index
    %c0_53 = arith.constant 0 : index
    %c0_54 = arith.constant 0 : index
    %73 = vector.load %arg2[%c3, %c0_52, %c0_53, %c0_54] : memref<10x3x64x128xbf16, #tpu.memory_space<vmem>>, vector<1x1x64x128xbf16>
    %74 = vector.shape_cast %73 : vector<1x1x64x128xbf16> to vector<64x128xbf16>
    %cst_55 = arith.constant dense<0.000000e+00> : vector<192x128xf32>
    %75 = tpu.matmul %72, %74, %cst_55 {dimension_numbers = #tpu.dot_dimension_numbers<[1], [0], [0], [1], [0, 0, 1, 1], [], []>} : vector<192x64xbf16>, vector<64x128xbf16>, vector<192x128xf32> -> vector<192x128xf32>
    %76 = vector.extract_strided_slice %70 {offsets = [8, 0], sizes = [192, 64], strides = [1, 1]} : vector<208x64xf32> to vector<192x64xf32>
    %77 = arith.truncf %76 : vector<192x64xf32> to vector<192x64xbf16>
    %c3_56 = arith.constant 3 : index
    %c1_57 = arith.constant 1 : index
    %c0_58 = arith.constant 0 : index
    %c0_59 = arith.constant 0 : index
    %78 = vector.load %arg2[%c3_56, %c1_57, %c0_58, %c0_59] : memref<10x3x64x128xbf16, #tpu.memory_space<vmem>>, vector<1x1x64x128xbf16>
    %79 = vector.shape_cast %78 : vector<1x1x64x128xbf16> to vector<64x128xbf16>
    %cst_60 = arith.constant dense<0.000000e+00> : vector<192x128xf32>
    %80 = tpu.matmul %77, %79, %cst_60 {dimension_numbers = #tpu.dot_dimension_numbers<[1], [0], [0], [1], [0, 0, 1, 1], [], []>} : vector<192x64xbf16>, vector<64x128xbf16>, vector<192x128xf32> -> vector<192x128xf32>
    %81 = arith.addf %75, %80 : vector<192x128xf32>
    %82 = vector.extract_strided_slice %70 {offsets = [16, 0], sizes = [192, 64], strides = [1, 1]} : vector<208x64xf32> to vector<192x64xf32>
    %83 = arith.truncf %82 : vector<192x64xf32> to vector<192x64xbf16>
    %c3_61 = arith.constant 3 : index
    %c2_62 = arith.constant 2 : index
    %c0_63 = arith.constant 0 : index
    %c0_64 = arith.constant 0 : index
    %84 = vector.load %arg2[%c3_61, %c2_62, %c0_63, %c0_64] : memref<10x3x64x128xbf16, #tpu.memory_space<vmem>>, vector<1x1x64x128xbf16>
    %85 = vector.shape_cast %84 : vector<1x1x64x128xbf16> to vector<64x128xbf16>
    %cst_65 = arith.constant dense<0.000000e+00> : vector<192x128xf32>
    %86 = tpu.matmul %83, %85, %cst_65 {dimension_numbers = #tpu.dot_dimension_numbers<[1], [0], [0], [1], [0, 0, 1, 1], [], []>} : vector<192x64xbf16>, vector<64x128xbf16>, vector<192x128xf32> -> vector<192x128xf32>
    %87 = arith.addf %81, %86 : vector<192x128xf32>
    %c3_66 = arith.constant 3 : index
    %c0_67 = arith.constant 0 : index
    %88 = vector.load %arg3[%c3_66, %c0_67] : memref<10x128xf32, #tpu.memory_space<vmem>>, vector<1x128xf32>
    %89 = vector.broadcast %88 : vector<1x128xf32> to vector<192x128xf32>
    %90 = arith.addf %87, %89 : vector<192x128xf32>
    %cst_68 = arith.constant 0.000000e+00 : f32
    %91 = vector.broadcast %cst_68 : f32 to vector<192x128xf32>
    %92 = arith.maximumf %90, %91 : vector<192x128xf32>
    %93 = vector.extract_strided_slice %92 {offsets = [0, 0], sizes = [192, 64], strides = [1, 1]} : vector<192x128xf32> to vector<192x64xf32>
    %94 = vector.extract_strided_slice %93 {offsets = [0, 0], sizes = [176, 64], strides = [1, 1]} : vector<192x64xf32> to vector<176x64xf32>
    %95 = arith.truncf %94 : vector<176x64xf32> to vector<176x64xbf16>
    %c4 = arith.constant 4 : index
    %c0_69 = arith.constant 0 : index
    %c0_70 = arith.constant 0 : index
    %c0_71 = arith.constant 0 : index
    %96 = vector.load %arg2[%c4, %c0_69, %c0_70, %c0_71] : memref<10x3x64x128xbf16, #tpu.memory_space<vmem>>, vector<1x1x64x128xbf16>
    %97 = vector.shape_cast %96 : vector<1x1x64x128xbf16> to vector<64x128xbf16>
    %cst_72 = arith.constant dense<0.000000e+00> : vector<176x128xf32>
    %98 = tpu.matmul %95, %97, %cst_72 {dimension_numbers = #tpu.dot_dimension_numbers<[1], [0], [0], [1], [0, 0, 1, 1], [], []>} : vector<176x64xbf16>, vector<64x128xbf16>, vector<176x128xf32> -> vector<176x128xf32>
    %99 = vector.extract_strided_slice %93 {offsets = [8, 0], sizes = [176, 64], strides = [1, 1]} : vector<192x64xf32> to vector<176x64xf32>
    %100 = arith.truncf %99 : vector<176x64xf32> to vector<176x64xbf16>
    %c4_73 = arith.constant 4 : index
    %c1_74 = arith.constant 1 : index
    %c0_75 = arith.constant 0 : index
    %c0_76 = arith.constant 0 : index
    %101 = vector.load %arg2[%c4_73, %c1_74, %c0_75, %c0_76] : memref<10x3x64x128xbf16, #tpu.memory_space<vmem>>, vector<1x1x64x128xbf16>
    %102 = vector.shape_cast %101 : vector<1x1x64x128xbf16> to vector<64x128xbf16>
    %cst_77 = arith.constant dense<0.000000e+00> : vector<176x128xf32>
    %103 = tpu.matmul %100, %102, %cst_77 {dimension_numbers = #tpu.dot_dimension_numbers<[1], [0], [0], [1], [0, 0, 1, 1], [], []>} : vector<176x64xbf16>, vector<64x128xbf16>, vector<176x128xf32> -> vector<176x128xf32>
    %104 = arith.addf %98, %103 : vector<176x128xf32>
    %105 = vector.extract_strided_slice %93 {offsets = [16, 0], sizes = [176, 64], strides = [1, 1]} : vector<192x64xf32> to vector<176x64xf32>
    %106 = arith.truncf %105 : vector<176x64xf32> to vector<176x64xbf16>
    %c4_78 = arith.constant 4 : index
    %c2_79 = arith.constant 2 : index
    %c0_80 = arith.constant 0 : index
    %c0_81 = arith.constant 0 : index
    %107 = vector.load %arg2[%c4_78, %c2_79, %c0_80, %c0_81] : memref<10x3x64x128xbf16, #tpu.memory_space<vmem>>, vector<1x1x64x128xbf16>
    %108 = vector.shape_cast %107 : vector<1x1x64x128xbf16> to vector<64x128xbf16>
    %cst_82 = arith.constant dense<0.000000e+00> : vector<176x128xf32>
    %109 = tpu.matmul %106, %108, %cst_82 {dimension_numbers = #tpu.dot_dimension_numbers<[1], [0], [0], [1], [0, 0, 1, 1], [], []>} : vector<176x64xbf16>, vector<64x128xbf16>, vector<176x128xf32> -> vector<176x128xf32>
    %110 = arith.addf %104, %109 : vector<176x128xf32>
    %c4_83 = arith.constant 4 : index
    %c0_84 = arith.constant 0 : index
    %111 = vector.load %arg3[%c4_83, %c0_84] : memref<10x128xf32, #tpu.memory_space<vmem>>, vector<1x128xf32>
    %112 = vector.broadcast %111 : vector<1x128xf32> to vector<176x128xf32>
    %113 = arith.addf %110, %112 : vector<176x128xf32>
    %cst_85 = arith.constant 0.000000e+00 : f32
    %114 = vector.broadcast %cst_85 : f32 to vector<176x128xf32>
    %115 = arith.maximumf %113, %114 : vector<176x128xf32>
    %116 = vector.extract_strided_slice %115 {offsets = [0, 0], sizes = [176, 64], strides = [1, 1]} : vector<176x128xf32> to vector<176x64xf32>
    %117 = vector.extract_strided_slice %116 {offsets = [0, 0], sizes = [160, 64], strides = [1, 1]} : vector<176x64xf32> to vector<160x64xf32>
    %118 = arith.truncf %117 : vector<160x64xf32> to vector<160x64xbf16>
    %c5 = arith.constant 5 : index
    %c0_86 = arith.constant 0 : index
    %c0_87 = arith.constant 0 : index
    %c0_88 = arith.constant 0 : index
    %119 = vector.load %arg2[%c5, %c0_86, %c0_87, %c0_88] : memref<10x3x64x128xbf16, #tpu.memory_space<vmem>>, vector<1x1x64x128xbf16>
    %120 = vector.shape_cast %119 : vector<1x1x64x128xbf16> to vector<64x128xbf16>
    %cst_89 = arith.constant dense<0.000000e+00> : vector<160x128xf32>
    %121 = tpu.matmul %118, %120, %cst_89 {dimension_numbers = #tpu.dot_dimension_numbers<[1], [0], [0], [1], [0, 0, 1, 1], [], []>} : vector<160x64xbf16>, vector<64x128xbf16>, vector<160x128xf32> -> vector<160x128xf32>
    %122 = vector.extract_strided_slice %116 {offsets = [8, 0], sizes = [160, 64], strides = [1, 1]} : vector<176x64xf32> to vector<160x64xf32>
    %123 = arith.truncf %122 : vector<160x64xf32> to vector<160x64xbf16>
    %c5_90 = arith.constant 5 : index
    %c1_91 = arith.constant 1 : index
    %c0_92 = arith.constant 0 : index
    %c0_93 = arith.constant 0 : index
    %124 = vector.load %arg2[%c5_90, %c1_91, %c0_92, %c0_93] : memref<10x3x64x128xbf16, #tpu.memory_space<vmem>>, vector<1x1x64x128xbf16>
    %125 = vector.shape_cast %124 : vector<1x1x64x128xbf16> to vector<64x128xbf16>
    %cst_94 = arith.constant dense<0.000000e+00> : vector<160x128xf32>
    %126 = tpu.matmul %123, %125, %cst_94 {dimension_numbers = #tpu.dot_dimension_numbers<[1], [0], [0], [1], [0, 0, 1, 1], [], []>} : vector<160x64xbf16>, vector<64x128xbf16>, vector<160x128xf32> -> vector<160x128xf32>
    %127 = arith.addf %121, %126 : vector<160x128xf32>
    %128 = vector.extract_strided_slice %116 {offsets = [16, 0], sizes = [160, 64], strides = [1, 1]} : vector<176x64xf32> to vector<160x64xf32>
    %129 = arith.truncf %128 : vector<160x64xf32> to vector<160x64xbf16>
    %c5_95 = arith.constant 5 : index
    %c2_96 = arith.constant 2 : index
    %c0_97 = arith.constant 0 : index
    %c0_98 = arith.constant 0 : index
    %130 = vector.load %arg2[%c5_95, %c2_96, %c0_97, %c0_98] : memref<10x3x64x128xbf16, #tpu.memory_space<vmem>>, vector<1x1x64x128xbf16>
    %131 = vector.shape_cast %130 : vector<1x1x64x128xbf16> to vector<64x128xbf16>
    %cst_99 = arith.constant dense<0.000000e+00> : vector<160x128xf32>
    %132 = tpu.matmul %129, %131, %cst_99 {dimension_numbers = #tpu.dot_dimension_numbers<[1], [0], [0], [1], [0, 0, 1, 1], [], []>} : vector<160x64xbf16>, vector<64x128xbf16>, vector<160x128xf32> -> vector<160x128xf32>
    %133 = arith.addf %127, %132 : vector<160x128xf32>
    %c5_100 = arith.constant 5 : index
    %c0_101 = arith.constant 0 : index
    %134 = vector.load %arg3[%c5_100, %c0_101] : memref<10x128xf32, #tpu.memory_space<vmem>>, vector<1x128xf32>
    %135 = vector.broadcast %134 : vector<1x128xf32> to vector<160x128xf32>
    %136 = arith.addf %133, %135 : vector<160x128xf32>
    %cst_102 = arith.constant 0.000000e+00 : f32
    %137 = vector.broadcast %cst_102 : f32 to vector<160x128xf32>
    %138 = arith.maximumf %136, %137 : vector<160x128xf32>
    %139 = vector.extract_strided_slice %138 {offsets = [0, 0], sizes = [160, 64], strides = [1, 1]} : vector<160x128xf32> to vector<160x64xf32>
    %140 = vector.extract_strided_slice %139 {offsets = [0, 0], sizes = [144, 64], strides = [1, 1]} : vector<160x64xf32> to vector<144x64xf32>
    %141 = arith.truncf %140 : vector<144x64xf32> to vector<144x64xbf16>
    %c6 = arith.constant 6 : index
    %c0_103 = arith.constant 0 : index
    %c0_104 = arith.constant 0 : index
    %c0_105 = arith.constant 0 : index
    %142 = vector.load %arg2[%c6, %c0_103, %c0_104, %c0_105] : memref<10x3x64x128xbf16, #tpu.memory_space<vmem>>, vector<1x1x64x128xbf16>
    %143 = vector.shape_cast %142 : vector<1x1x64x128xbf16> to vector<64x128xbf16>
    %cst_106 = arith.constant dense<0.000000e+00> : vector<144x128xf32>
    %144 = tpu.matmul %141, %143, %cst_106 {dimension_numbers = #tpu.dot_dimension_numbers<[1], [0], [0], [1], [0, 0, 1, 1], [], []>} : vector<144x64xbf16>, vector<64x128xbf16>, vector<144x128xf32> -> vector<144x128xf32>
    %145 = vector.extract_strided_slice %139 {offsets = [8, 0], sizes = [144, 64], strides = [1, 1]} : vector<160x64xf32> to vector<144x64xf32>
    %146 = arith.truncf %145 : vector<144x64xf32> to vector<144x64xbf16>
    %c6_107 = arith.constant 6 : index
    %c1_108 = arith.constant 1 : index
    %c0_109 = arith.constant 0 : index
    %c0_110 = arith.constant 0 : index
    %147 = vector.load %arg2[%c6_107, %c1_108, %c0_109, %c0_110] : memref<10x3x64x128xbf16, #tpu.memory_space<vmem>>, vector<1x1x64x128xbf16>
    %148 = vector.shape_cast %147 : vector<1x1x64x128xbf16> to vector<64x128xbf16>
    %cst_111 = arith.constant dense<0.000000e+00> : vector<144x128xf32>
    %149 = tpu.matmul %146, %148, %cst_111 {dimension_numbers = #tpu.dot_dimension_numbers<[1], [0], [0], [1], [0, 0, 1, 1], [], []>} : vector<144x64xbf16>, vector<64x128xbf16>, vector<144x128xf32> -> vector<144x128xf32>
    %150 = arith.addf %144, %149 : vector<144x128xf32>
    %151 = vector.extract_strided_slice %139 {offsets = [16, 0], sizes = [144, 64], strides = [1, 1]} : vector<160x64xf32> to vector<144x64xf32>
    %152 = arith.truncf %151 : vector<144x64xf32> to vector<144x64xbf16>
    %c6_112 = arith.constant 6 : index
    %c2_113 = arith.constant 2 : index
    %c0_114 = arith.constant 0 : index
    %c0_115 = arith.constant 0 : index
    %153 = vector.load %arg2[%c6_112, %c2_113, %c0_114, %c0_115] : memref<10x3x64x128xbf16, #tpu.memory_space<vmem>>, vector<1x1x64x128xbf16>
    %154 = vector.shape_cast %153 : vector<1x1x64x128xbf16> to vector<64x128xbf16>
    %cst_116 = arith.constant dense<0.000000e+00> : vector<144x128xf32>
    %155 = tpu.matmul %152, %154, %cst_116 {dimension_numbers = #tpu.dot_dimension_numbers<[1], [0], [0], [1], [0, 0, 1, 1], [], []>} : vector<144x64xbf16>, vector<64x128xbf16>, vector<144x128xf32> -> vector<144x128xf32>
    %156 = arith.addf %150, %155 : vector<144x128xf32>
    %c6_117 = arith.constant 6 : index
    %c0_118 = arith.constant 0 : index
    %157 = vector.load %arg3[%c6_117, %c0_118] : memref<10x128xf32, #tpu.memory_space<vmem>>, vector<1x128xf32>
    %158 = vector.broadcast %157 : vector<1x128xf32> to vector<144x128xf32>
    %159 = arith.addf %156, %158 : vector<144x128xf32>
    %cst_119 = arith.constant 0.000000e+00 : f32
    %160 = vector.broadcast %cst_119 : f32 to vector<144x128xf32>
    %161 = arith.maximumf %159, %160 : vector<144x128xf32>
    %162 = vector.extract_strided_slice %161 {offsets = [0, 0], sizes = [144, 64], strides = [1, 1]} : vector<144x128xf32> to vector<144x64xf32>
    %163 = vector.extract_strided_slice %162 {offsets = [0, 0], sizes = [128, 64], strides = [1, 1]} : vector<144x64xf32> to vector<128x64xf32>
    %164 = arith.truncf %163 : vector<128x64xf32> to vector<128x64xbf16>
    %c7 = arith.constant 7 : index
    %c0_120 = arith.constant 0 : index
    %c0_121 = arith.constant 0 : index
    %c0_122 = arith.constant 0 : index
    %165 = vector.load %arg2[%c7, %c0_120, %c0_121, %c0_122] : memref<10x3x64x128xbf16, #tpu.memory_space<vmem>>, vector<1x1x64x128xbf16>
    %166 = vector.shape_cast %165 : vector<1x1x64x128xbf16> to vector<64x128xbf16>
    %cst_123 = arith.constant dense<0.000000e+00> : vector<128x128xf32>
    %167 = tpu.matmul %164, %166, %cst_123 {dimension_numbers = #tpu.dot_dimension_numbers<[1], [0], [0], [1], [0, 0, 1, 1], [], []>} : vector<128x64xbf16>, vector<64x128xbf16>, vector<128x128xf32> -> vector<128x128xf32>
    %168 = vector.extract_strided_slice %162 {offsets = [8, 0], sizes = [128, 64], strides = [1, 1]} : vector<144x64xf32> to vector<128x64xf32>
    %169 = arith.truncf %168 : vector<128x64xf32> to vector<128x64xbf16>
    %c7_124 = arith.constant 7 : index
    %c1_125 = arith.constant 1 : index
    %c0_126 = arith.constant 0 : index
    %c0_127 = arith.constant 0 : index
    %170 = vector.load %arg2[%c7_124, %c1_125, %c0_126, %c0_127] : memref<10x3x64x128xbf16, #tpu.memory_space<vmem>>, vector<1x1x64x128xbf16>
    %171 = vector.shape_cast %170 : vector<1x1x64x128xbf16> to vector<64x128xbf16>
    %cst_128 = arith.constant dense<0.000000e+00> : vector<128x128xf32>
    %172 = tpu.matmul %169, %171, %cst_128 {dimension_numbers = #tpu.dot_dimension_numbers<[1], [0], [0], [1], [0, 0, 1, 1], [], []>} : vector<128x64xbf16>, vector<64x128xbf16>, vector<128x128xf32> -> vector<128x128xf32>
    %173 = arith.addf %167, %172 : vector<128x128xf32>
    %174 = vector.extract_strided_slice %162 {offsets = [16, 0], sizes = [128, 64], strides = [1, 1]} : vector<144x64xf32> to vector<128x64xf32>
    %175 = arith.truncf %174 : vector<128x64xf32> to vector<128x64xbf16>
    %c7_129 = arith.constant 7 : index
    %c2_130 = arith.constant 2 : index
    %c0_131 = arith.constant 0 : index
    %c0_132 = arith.constant 0 : index
    %176 = vector.load %arg2[%c7_129, %c2_130, %c0_131, %c0_132] : memref<10x3x64x128xbf16, #tpu.memory_space<vmem>>, vector<1x1x64x128xbf16>
    %177 = vector.shape_cast %176 : vector<1x1x64x128xbf16> to vector<64x128xbf16>
    %cst_133 = arith.constant dense<0.000000e+00> : vector<128x128xf32>
    %178 = tpu.matmul %175, %177, %cst_133 {dimension_numbers = #tpu.dot_dimension_numbers<[1], [0], [0], [1], [0, 0, 1, 1], [], []>} : vector<128x64xbf16>, vector<64x128xbf16>, vector<128x128xf32> -> vector<128x128xf32>
    %179 = arith.addf %173, %178 : vector<128x128xf32>
    %c7_134 = arith.constant 7 : index
    %c0_135 = arith.constant 0 : index
    %180 = vector.load %arg3[%c7_134, %c0_135] : memref<10x128xf32, #tpu.memory_space<vmem>>, vector<1x128xf32>
    %181 = vector.broadcast %180 : vector<1x128xf32> to vector<128x128xf32>
    %182 = arith.addf %179, %181 : vector<128x128xf32>
    %cst_136 = arith.constant 0.000000e+00 : f32
    %183 = vector.broadcast %cst_136 : f32 to vector<128x128xf32>
    %184 = arith.maximumf %182, %183 : vector<128x128xf32>
    %185 = vector.extract_strided_slice %184 {offsets = [0, 0], sizes = [128, 64], strides = [1, 1]} : vector<128x128xf32> to vector<128x64xf32>
    %186 = vector.extract_strided_slice %185 {offsets = [0, 0], sizes = [112, 64], strides = [1, 1]} : vector<128x64xf32> to vector<112x64xf32>
    %187 = arith.truncf %186 : vector<112x64xf32> to vector<112x64xbf16>
    %c8 = arith.constant 8 : index
    %c0_137 = arith.constant 0 : index
    %c0_138 = arith.constant 0 : index
    %c0_139 = arith.constant 0 : index
    %188 = vector.load %arg2[%c8, %c0_137, %c0_138, %c0_139] : memref<10x3x64x128xbf16, #tpu.memory_space<vmem>>, vector<1x1x64x128xbf16>
    %189 = vector.shape_cast %188 : vector<1x1x64x128xbf16> to vector<64x128xbf16>
    %cst_140 = arith.constant dense<0.000000e+00> : vector<112x128xf32>
    %190 = tpu.matmul %187, %189, %cst_140 {dimension_numbers = #tpu.dot_dimension_numbers<[1], [0], [0], [1], [0, 0, 1, 1], [], []>} : vector<112x64xbf16>, vector<64x128xbf16>, vector<112x128xf32> -> vector<112x128xf32>
    %191 = vector.extract_strided_slice %185 {offsets = [8, 0], sizes = [112, 64], strides = [1, 1]} : vector<128x64xf32> to vector<112x64xf32>
    %192 = arith.truncf %191 : vector<112x64xf32> to vector<112x64xbf16>
    %c8_141 = arith.constant 8 : index
    %c1_142 = arith.constant 1 : index
    %c0_143 = arith.constant 0 : index
    %c0_144 = arith.constant 0 : index
    %193 = vector.load %arg2[%c8_141, %c1_142, %c0_143, %c0_144] : memref<10x3x64x128xbf16, #tpu.memory_space<vmem>>, vector<1x1x64x128xbf16>
    %194 = vector.shape_cast %193 : vector<1x1x64x128xbf16> to vector<64x128xbf16>
    %cst_145 = arith.constant dense<0.000000e+00> : vector<112x128xf32>
    %195 = tpu.matmul %192, %194, %cst_145 {dimension_numbers = #tpu.dot_dimension_numbers<[1], [0], [0], [1], [0, 0, 1, 1], [], []>} : vector<112x64xbf16>, vector<64x128xbf16>, vector<112x128xf32> -> vector<112x128xf32>
    %196 = arith.addf %190, %195 : vector<112x128xf32>
    %197 = vector.extract_strided_slice %185 {offsets = [16, 0], sizes = [112, 64], strides = [1, 1]} : vector<128x64xf32> to vector<112x64xf32>
    %198 = arith.truncf %197 : vector<112x64xf32> to vector<112x64xbf16>
    %c8_146 = arith.constant 8 : index
    %c2_147 = arith.constant 2 : index
    %c0_148 = arith.constant 0 : index
    %c0_149 = arith.constant 0 : index
    %199 = vector.load %arg2[%c8_146, %c2_147, %c0_148, %c0_149] : memref<10x3x64x128xbf16, #tpu.memory_space<vmem>>, vector<1x1x64x128xbf16>
    %200 = vector.shape_cast %199 : vector<1x1x64x128xbf16> to vector<64x128xbf16>
    %cst_150 = arith.constant dense<0.000000e+00> : vector<112x128xf32>
    %201 = tpu.matmul %198, %200, %cst_150 {dimension_numbers = #tpu.dot_dimension_numbers<[1], [0], [0], [1], [0, 0, 1, 1], [], []>} : vector<112x64xbf16>, vector<64x128xbf16>, vector<112x128xf32> -> vector<112x128xf32>
    %202 = arith.addf %196, %201 : vector<112x128xf32>
    %c8_151 = arith.constant 8 : index
    %c0_152 = arith.constant 0 : index
    %203 = vector.load %arg3[%c8_151, %c0_152] : memref<10x128xf32, #tpu.memory_space<vmem>>, vector<1x128xf32>
    %204 = vector.broadcast %203 : vector<1x128xf32> to vector<112x128xf32>
    %205 = arith.addf %202, %204 : vector<112x128xf32>
    %cst_153 = arith.constant 0.000000e+00 : f32
    %206 = vector.broadcast %cst_153 : f32 to vector<112x128xf32>
    %207 = arith.maximumf %205, %206 : vector<112x128xf32>
    %208 = vector.extract_strided_slice %207 {offsets = [0, 0], sizes = [112, 64], strides = [1, 1]} : vector<112x128xf32> to vector<112x64xf32>
    %209 = vector.extract_strided_slice %208 {offsets = [0, 0], sizes = [96, 64], strides = [1, 1]} : vector<112x64xf32> to vector<96x64xf32>
    %210 = arith.truncf %209 : vector<96x64xf32> to vector<96x64xbf16>
    %c9 = arith.constant 9 : index
    %c0_154 = arith.constant 0 : index
    %c0_155 = arith.constant 0 : index
    %c0_156 = arith.constant 0 : index
    %211 = vector.load %arg2[%c9, %c0_154, %c0_155, %c0_156] : memref<10x3x64x128xbf16, #tpu.memory_space<vmem>>, vector<1x1x64x128xbf16>
    %212 = vector.shape_cast %211 : vector<1x1x64x128xbf16> to vector<64x128xbf16>
    %cst_157 = arith.constant dense<0.000000e+00> : vector<96x128xf32>
    %213 = tpu.matmul %210, %212, %cst_157 {dimension_numbers = #tpu.dot_dimension_numbers<[1], [0], [0], [1], [0, 0, 1, 1], [], []>} : vector<96x64xbf16>, vector<64x128xbf16>, vector<96x128xf32> -> vector<96x128xf32>
    %214 = vector.extract_strided_slice %208 {offsets = [8, 0], sizes = [96, 64], strides = [1, 1]} : vector<112x64xf32> to vector<96x64xf32>
    %215 = arith.truncf %214 : vector<96x64xf32> to vector<96x64xbf16>
    %c9_158 = arith.constant 9 : index
    %c1_159 = arith.constant 1 : index
    %c0_160 = arith.constant 0 : index
    %c0_161 = arith.constant 0 : index
    %216 = vector.load %arg2[%c9_158, %c1_159, %c0_160, %c0_161] : memref<10x3x64x128xbf16, #tpu.memory_space<vmem>>, vector<1x1x64x128xbf16>
    %217 = vector.shape_cast %216 : vector<1x1x64x128xbf16> to vector<64x128xbf16>
    %cst_162 = arith.constant dense<0.000000e+00> : vector<96x128xf32>
    %218 = tpu.matmul %215, %217, %cst_162 {dimension_numbers = #tpu.dot_dimension_numbers<[1], [0], [0], [1], [0, 0, 1, 1], [], []>} : vector<96x64xbf16>, vector<64x128xbf16>, vector<96x128xf32> -> vector<96x128xf32>
    %219 = arith.addf %213, %218 : vector<96x128xf32>
    %220 = vector.extract_strided_slice %208 {offsets = [16, 0], sizes = [96, 64], strides = [1, 1]} : vector<112x64xf32> to vector<96x64xf32>
    %221 = arith.truncf %220 : vector<96x64xf32> to vector<96x64xbf16>
    %c9_163 = arith.constant 9 : index
    %c2_164 = arith.constant 2 : index
    %c0_165 = arith.constant 0 : index
    %c0_166 = arith.constant 0 : index
    %222 = vector.load %arg2[%c9_163, %c2_164, %c0_165, %c0_166] : memref<10x3x64x128xbf16, #tpu.memory_space<vmem>>, vector<1x1x64x128xbf16>
    %223 = vector.shape_cast %222 : vector<1x1x64x128xbf16> to vector<64x128xbf16>
    %cst_167 = arith.constant dense<0.000000e+00> : vector<96x128xf32>
    %224 = tpu.matmul %221, %223, %cst_167 {dimension_numbers = #tpu.dot_dimension_numbers<[1], [0], [0], [1], [0, 0, 1, 1], [], []>} : vector<96x64xbf16>, vector<64x128xbf16>, vector<96x128xf32> -> vector<96x128xf32>
    %225 = arith.addf %219, %224 : vector<96x128xf32>
    %c9_168 = arith.constant 9 : index
    %c0_169 = arith.constant 0 : index
    %226 = vector.load %arg3[%c9_168, %c0_169] : memref<10x128xf32, #tpu.memory_space<vmem>>, vector<1x128xf32>
    %227 = vector.broadcast %226 : vector<1x128xf32> to vector<96x128xf32>
    %228 = arith.addf %225, %227 : vector<96x128xf32>
    %cst_170 = arith.constant 0.000000e+00 : f32
    %229 = vector.broadcast %cst_170 : f32 to vector<96x128xf32>
    %230 = arith.maximumf %228, %229 : vector<96x128xf32>
    %231 = vector.extract_strided_slice %230 {offsets = [0, 0], sizes = [96, 64], strides = [1, 1]} : vector<96x128xf32> to vector<96x64xf32>
    %232 = arith.truncf %231 : vector<96x64xf32> to vector<96x64xbf16>
    %233 = vector.shape_cast %232 : vector<96x64xbf16> to vector<12x8x64xbf16>
    %c0_171 = arith.constant 0 : index
    %c0_172 = arith.constant 0 : index
    %c0_173 = arith.constant 0 : index
    %234 = vector.load %arg4[%c0_171, %c0_172, %c0_173] : memref<12x64x128xbf16, #tpu.memory_space<vmem>>, vector<12x64x128xbf16>
    "tpu.trace_start"() <{level = 10 : i32, message = "lbc,lch->lbh"}> : () -> ()
    %cst_174 = arith.constant dense<0.000000e+00> : vector<12x8x128xf32>
    %235 = tpu.matmul %233, %234, %cst_174 {dimension_numbers = #tpu.dot_dimension_numbers<[2], [1], [1], [2], [0, 0, 0, 1, 1, 2], [0], [0]>} : vector<12x8x64xbf16>, vector<12x64x128xbf16>, vector<12x8x128xf32> -> vector<12x8x128xf32>
    "tpu.trace_stop"() : () -> ()
    %cst_175 = arith.constant dense<0.000000e+00> : vector<8x128xf32>
    %236 = vector.multi_reduction <add>, %235, %cst_175 [0] : vector<12x8x128xf32> to vector<8x128xf32>
    %c0_176 = arith.constant 0 : index
    %c0_177 = arith.constant 0 : index
    %237 = vector.load %arg5[%c0_176, %c0_177] : memref<2x128xf32, #tpu.memory_space<vmem>>, vector<1x128xf32>
    %238 = vector.broadcast %237 : vector<1x128xf32> to vector<8x128xf32>
    %239 = arith.addf %236, %238 : vector<8x128xf32>
    %cst_178 = arith.constant 0.000000e+00 : f32
    %240 = vector.broadcast %cst_178 : f32 to vector<8x128xf32>
    %241 = arith.maximumf %239, %240 : vector<8x128xf32>
    %242 = arith.truncf %241 : vector<8x128xf32> to vector<8x128xbf16>
    %c0_179 = arith.constant 0 : index
    %c0_180 = arith.constant 0 : index
    %243 = vector.load %arg6[%c0_179, %c0_180] : memref<128x128xbf16, #tpu.memory_space<vmem>>, vector<128x128xbf16>
    %cst_181 = arith.constant dense<0.000000e+00> : vector<8x128xf32>
    %244 = tpu.matmul %242, %243, %cst_181 {dimension_numbers = #tpu.dot_dimension_numbers<[1], [0], [0], [1], [0, 0, 1, 1], [], []>} : vector<8x128xbf16>, vector<128x128xbf16>, vector<8x128xf32> -> vector<8x128xf32>
    %c1_182 = arith.constant 1 : index
    %c0_183 = arith.constant 0 : index
    %245 = vector.load %arg5[%c1_182, %c0_183] : memref<2x128xf32, #tpu.memory_space<vmem>>, vector<1x128xf32>
    %246 = vector.broadcast %245 : vector<1x128xf32> to vector<8x128xf32>
    %247 = arith.addf %244, %246 : vector<8x128xf32>
    %c0_184 = arith.constant 0 : index
    %c0_185 = arith.constant 0 : index
    %248 = vector.load %arg7[%c0_184, %c0_185] : memref<8x128xf32, #tpu.memory_space<vmem>>, vector<8x128xf32>
    tpu.vector_store %arg7[%c0_184, %c0_185], %247 {strides = array<i32>} : memref<8x128xf32, #tpu.memory_space<vmem>>, vector<8x128xf32>,
    return
  }
  func.func @transform_0(%arg0: i32) -> (i32, i32) {
    %c0_i32 = arith.constant 0 : i32
    %c0_i32_0 = arith.constant 0 : i32
    return %arg0, %c0_i32 : i32, i32
  }
  func.func @transform_1(%arg0: i32) -> (i32, i32, i32, i32) {
    %c0_i32 = arith.constant 0 : i32
    %c0_i32_0 = arith.constant 0 : i32
    %c0_i32_1 = arith.constant 0 : i32
    %c0_i32_2 = arith.constant 0 : i32
    %c0_i32_3 = arith.constant 0 : i32
    return %c0_i32, %c0_i32_0, %c0_i32_1, %c0_i32_2 : i32, i32, i32, i32
  }
  func.func @transform_2(%arg0: i32) -> (i32, i32) {
    %c0_i32 = arith.constant 0 : i32
    %c0_i32_0 = arith.constant 0 : i32
    %c0_i32_1 = arith.constant 0 : i32
    return %c0_i32, %c0_i32_0 : i32, i32
  }
  func.func @transform_3(%arg0: i32) -> (i32, i32, i32) {
    %c0_i32 = arith.constant 0 : i32
    %c0_i32_0 = arith.constant 0 : i32
    %c0_i32_1 = arith.constant 0 : i32
    %c0_i32_2 = arith.constant 0 : i32
    return %c0_i32, %c0_i32_0, %c0_i32_1 : i32, i32, i32
  }
  func.func @transform_4(%arg0: i32) -> (i32, i32) {
    %c0_i32 = arith.constant 0 : i32
    %c0_i32_0 = arith.constant 0 : i32
    %c0_i32_1 = arith.constant 0 : i32
    return %c0_i32, %c0_i32_0 : i32, i32
  }
  func.func @transform_5(%arg0: i32) -> (i32, i32) {
    %c0_i32 = arith.constant 0 : i32
    %c0_i32_0 = arith.constant 0 : i32
    %c0_i32_1 = arith.constant 0 : i32
    return %c0_i32, %c0_i32_0 : i32, i32
  }
  func.func @transform_6(%arg0: i32) -> (i32, i32) {
    %c0_i32 = arith.constant 0 : i32
    %c0_i32_0 = arith.constant 0 : i32
    return %arg0, %c0_i32 : i32, i32
  }
}

</mosaic_0001>

<bundles_post_ra>
// kernel: tpu_custom_call.1
= control target key start
LH: loop header
LB: loop body
LE: loop exit
PB: predicated region body
PF: predicated region fallthrough
CT: control target
= control target key end

     0   :  { %11 = vsyncpa [#allocation3], 0  ;;  %s8462_s0 = inlined_call_operand.hbm [shape: f32[512,128], index: 0, kind: input, shape index: {}]   ;;  %s8463_s1 = inlined_call_operand.hbm [shape: bf16[10,3,64,128], index: 1, kind: input, shape index: {}]   ;;  %s8464_s2 = inlined_call_operand.hbm [shape: f32[10,128], index: 2, kind: input, shape index: {}]   ;;  %s8465_s3 = inlined_call_operand.hbm [shape: bf16[12,64,128], index: 3, kind: input, shape index: {}]   ;;  %s8466_s4 = inlined_call_operand.vmem [shape: f32[2,128], index: 4, kind: input, shape index: {}]   ;;  %s8467_s5 = inlined_call_operand.hbm [shape: bf16[128,128], index: 5, kind: input, shape index: {}]   ;;  %s8468_s6 = inlined_call_operand.hbm [shape: f32[16,128], index: 6, kind: output, shape index: {}]  }
   0x1   :  { %13 = vsyncpa [#allocation3 + $0x1], 0 }
   0x2   :  { %14 = vsyncpa [#allocation6], 0 }
   0x3   :  { %15 = vsyncpa [#allocation9], 0 }
   0x4   :  { %16 = vsyncpa [#allocation4], 0 }
   0x5   :  { %18 = vsyncpa [#allocation4 + $0x1], 0  ;;  %s7146_s21 = smov 0   ;;  %s7148_s22 = smov 0  }
   0x6   :  { %s7150_s23 = smov 0   ;;  %s7152_s24 = smov 0  }
   0x7 LB: > { %s7167_s25 = sadd.s32 4294967295, %s7101_s24   ;;  %s5545_s26 = sadd.s32 4294967294, %s7101_s24   ;;  %s7101_s24 = sphi %s7152_s24, %s8483_s24   ;;  %s7097_s23 = sphi %s7150_s23, %s8482_s23   ;;  %s7093_s22 = sphi %s7148_s22, %s8481_s22   ;;  %s7089_s21 = sphi %s7146_s21, %s8480_s21  }
   0x8   : > { %p44_p0 = scmp.ne.s32.totalorder %s7093_s22, %s7089_s21  ;;  %p45_p1 = scmp.eq.s32.totalorder %s7167_s25, 0 }
   0x9   : > { %p173_p2 = scmp.eq.s32.totalorder %s7167_s25, 1  ;;  %p179_p3 = scmp.eq.s32.totalorder %s5545_s26, 1 }
   0xa   : > { %p7176_p4 = por %p45_p1, %p44_p0  ;;  %p5546_p5 = scmp.ge.s32.totalorder %s7101_s24, 1 }
   0xb   : > { %p7181_p6 = por %p179_p3, %p44_p0  ;;  %p186_p7 = scmp.lt.s32.totalorder %s7101_s24, 3 }
   0xc   : > { %s197_s7 = sshll.u32 %s8463_s1, 4  ;;  %s7103_s9 = smov [#allocation5]   ;;  %s198_s7 = int_to_ptr.hbm [resolvable:$true] %s197_s7 }
   0xd   : > { %p7189_p8 = pnand %p5546_p5, %p186_p7  ;;  %s199_s10 = sshll.u32 %s7103_s9, 4  ;;  %s200_s10 = int_to_ptr.vmem [resolvable:$true] %s199_s10 }
   0xe   : > { %s225_s14 = sshll.u32 %s8465_s3, 4  ;;  %s7104_s15 = smov 64   ;;  %s226_s14 = int_to_ptr.hbm [resolvable:$true] %s225_s14 }
   0xf   : > { %p6794_p9 = pneg %p7189_p8  ;;  %s7105_s16 = smov 4  }
  0x10   : > { %s7106_s17 = smov [#allocation8]   ;;  %s211_s26 = sshll.u32 %s8464_s2, 4  ;;  %s212_s26 = int_to_ptr.hbm [resolvable:$true] %s211_s26 }
  0x11   : > { %p7197_p10 = pnand %p6794_p9, %p45_p1  ;;  %s227_s18 = sshll.u32 %s7106_s17, 4  ;;  %s228_s18 = int_to_ptr.vmem [resolvable:$true] %s227_s18 }
  0x12   : > { %s7107_s29 = smov [#allocation7]   ;;  %s8469_s12 = smov 128  }
  0x13   : > { %6797 = dma.hbm_to_vmem [thread:$0]  (!%p7197_p10), %s198_s7, 15360, %s200_s10, [#allocation6], %s7104_s15, %s7104_s15, %s7105_s16  }
  0x14   : > { %6803 = dma.hbm_to_vmem [thread:$0]  (!%p7197_p10), %s226_s14, 6144, %s228_s18, [#allocation9], %s7104_s15, %s7104_s15, %s7105_s16  }
  0x15   : > { %s213_s30 = sshll.u32 %s7107_s29, 4  ;;  %s242_s10 = sshll.u32 %s8467_s5, 4  ;;  %s214_s30 = int_to_ptr.vmem [resolvable:$true] %s213_s30  ;;  %s243_s10 = int_to_ptr.hbm [resolvable:$true] %s242_s10 }
  0x16   : > { %s8470_s13 = smov 8   ;;  %s7110_s14 = smov [#allocation10]  }
  0x17   : > { %6800 = dma.hbm_to_vmem [thread:$0]  (!%p7197_p10), %s212_s26, 256, %s214_s30, [#allocation6], %s8469_s12, %s8469_s12, %s8470_s13  }
  0x18   : > { %s244_s17 = sshll.u32 %s7110_s14, 4  ;;  %s7223_s18 = sadd.s32 1, %s7101_s24   ;;  %s245_s17 = int_to_ptr.vmem [resolvable:$true] %s244_s17 }
  0x19   : > { %6806 = dma.hbm_to_vmem [thread:$0]  (!%p7197_p10), %s243_s10, 1024, %s245_s17, [#allocation9], %s7104_s15, %s7104_s15, %s7105_s16  }
  0x1a   : > { %s31_s19 = sadd.s32 1, %s7097_s23  ;;  %s28_s20 = ssub.s32 %s7101_s24, %s7223_s18 }
  0x1b   : > { %p38_p12 = scmp.ne.s32.totalorder %s7097_s23, %s7093_s22  ;;  %p29_p13 = scmp.eq.s32.totalorder %s28_s20, 0 }
  0x1c   : > { %p39_p0 = scmp.eq.s32.totalorder %s7101_s24, 0  ;;  %p6819_p5 = scmp.lt.s32.totalorder %s7101_s24, 2 }
  0x1d   : > { %p7233_p3 = por %p173_p2, %p38_p12  ;;  %s258_s30 = sand.u32 1, %s7097_s23  }
  0x1e   : > { %s7239_s26 = scalar_select %p29_p13, %s7097_s23, %s31_s19  }
  0x1f   : > { %p40_p7 = por %p39_p0, %p38_p12  ;;  %s5552_s11 = sshll.u32 %s258_s30, 8 }
  0x20   : > { %s6597_s15 = sshll.u32 %s7101_s24, 8  ;;  %s262_s10 = scalar_lea.vmem [#allocation2], %s5552_s11 }
  0x21   : > { %s267_s9 = scalar_lea.hbm %s8462_s0, %s6597_s15  ;;  %s270_s14 = sshll.u32 %s262_s10, 4  ;;  %s271_s14 = int_to_ptr.vmem [resolvable:$true] %s270_s14 }
  0x22   : > { %s268_s17 = sshll.u32 %s267_s9, 4  ;;  %p7246_p2 = pnand %p6819_p5, %p40_p7  ;;  %s269_s17 = int_to_ptr.hbm [resolvable:$true] %s268_s17 }
  0x23   : > { %s259_s19 = scalar_lea.sflag [#allocation3], %s258_s30  ;;  %s6997_s12 = sshra.s32 %s269_s17, 4  ;;  %s6998_s12 = int_to_ptr.hbm [resolvable:$true] %s6997_s12 }
  0x24   : > { %s6999_s13 = scalar_lea.hbm %s6998_s12, 256  ;;  %p7001_p10 = pneg %p7246_p2 }
  0x25   : > { %p7000_p9 = scmp.ne.s32.totalorder %s6998_s12, %s6999_s13  ;;  %s7004_s16 = scalar_lea.hbm %s8462_s0, 512 }
  0x26   : > { %p7005_p0 = scmp.lt.s32.totalorder %s6998_s12, %s8462_s0  ;;  %p7006_p5 = scmp.lt.s32.totalorder %s7004_s16, %s6999_s13 }
  0x27   : > { %p7002_p12 = pnand %p7001_p10, %p7000_p9 }
  0x28   : > { %p7007_p7 = por %p7006_p5, %p7005_p0 }
  0x29   : > { %p7003_p13 = pneg %p7002_p12 }
  0x2b   : > { %p7008_p11 = pnand %p7007_p7, %p7003_p13 }
  0x2d   : > { %7011 = shalt.err (!%p7008_p11)
}
  0x2e   : > { %s8477_s30 = smov 8   ;;  %s8478_s10 = smov 128  }
  0x2f   : > { %6810 = dma.hbm_to_vmem [thread:$0]  (!%p7246_p2), %s269_s17, 4096, %s271_s14, %s259_s19, %s8478_s10, %s8478_s10, %s8477_s30  }
  0x30   : > { %282 = sbr.rel (%p7189_p8) target bundleno = 2868 (0xb34), region = 44  ;;  %s7266_s15 = sand.u32 (!%p7189_p8), 1, %s7093_s22  }
  0x31   : > { %s5556_s12 = sshll.u32 (!%p7189_p8), %s7266_s15, 8  ;;  %s285_s13 = scalar_lea.sflag (!%p7189_p8), [#allocation3], %s7266_s15 }
  0x32   : > { %s7270_s11 = scalar_lea.vmem (!%p7189_p8), [#allocation2], %s5556_s12 }
  0x35   : > { %7072 = dma.done.wait (%p7176_p4), %s285_s13, 4096  }
  0x36   : > { %7074 = vsyncadd (%p7176_p4), %s285_s13, 4294963200 }
  0x37   : > { %7076 = dma.done.wait (%p45_p1), [#allocation6], 15616  }
  0x38   : > { %7078 = vsyncadd (%p45_p1), [#allocation6], 4294951680 }
  0x39   : > { %7080 = dma.done.wait (%p45_p1), [#allocation9], 7168  }
  0x3a   : > { %7082 = vsyncadd (%p45_p1), [#allocation9], 4294960128  ;;  %v6605_v0 = vld [vmem:[#allocation5 + $0x38] sm:$0xff]  ;;  %v6604_v3 = vld [vmem:[#allocation5 + $0x30] sm:$0xff]  ;;  %vm443_vm0 = vcmask 523264   ;;  %s6594_s14 = sshll.u32 %s7167_s25, 3 }
  0x3b   : > { %v6601_v1 = vld [vmem:[#allocation5 + $0x18] sm:$0xff]  ;;  %493 = vmatpush.bf16.msra.mxu0 %v6605_v0  ;;  %v6600_v4 = vld [vmem:[#allocation5 + $0x10] sm:$0xff]  ;;  %v6603_v6 = vld [vmem:[#allocation5 + $0x28] sm:$0xff]  ;;  %s5561_s17 = sshll.u32 %s7266_s15, 3  ;;  %s5432_s16 = scalar_lea.hbm %s8468_s6, %s6594_s14 }
  0x3c   : > { %v6609_v2 = vld [vmem:[#allocation5 + $0x58] sm:$0xff]  ;;  %646 = vmatpush.bf16.msra.mxu1 %v6601_v1  ;;  %v6608_v5 = vld [vmem:[#allocation5 + $0x50] sm:$0xff]  ;;  %v6599_v7 = vld [vmem:[#allocation5 + $0x8] sm:$0xff]  ;;  %s337_s30 = scalar_lea.vmem [#allocation11], %s5561_s17  ;;  %s5436_s12 = sshll.u32 %s5432_s16, 4  ;;  %s5437_s12 = int_to_ptr.hbm [resolvable:$true] %s5436_s12 }
  0x3d   : > { %767 = vmatpush.bf16.msra.mxu2 %v6609_v2  ;;  %v6607_v8 = vld [vmem:[#allocation5 + $0x48] sm:$0xff]  ;;  %v6602_v9 = vld [vmem:[#allocation5 + $0x20] sm:$0xff]  ;;  %v342_v12 = vld [vmem:[%s7270_s11 + $0x10] sm:$0xff]  ;;  %s5434_s10 = sshll.u32 %s337_s30, 4  ;;  %s5422_s13 = scalar_lea.sflag [#allocation4], %s7266_s15  ;;  %s5435_s10 = int_to_ptr.vmem [resolvable:$true] %s5434_s10 }
  0x3e   : > { %v6598_v10 = vld [vmem:[#allocation5] sm:$0xff]  ;;  %v341_v11 = vld [vmem:[%s7270_s11 + $0x8] sm:$0xff]  ;;  %v343_v15 = vld [vmem:[%s7270_s11 + $0x18] sm:$0xff]  ;;  %s7041_s25 = sshra.s32 %s5437_s12, 4  ;;  %s7047_s14 = scalar_lea.hbm %s8468_s6, 16  ;;  %s7042_s25 = int_to_ptr.hbm [resolvable:$true] %s7041_s25 }
  0x3f   : > { %494 = vmatpush.bf16.msra.mxu0 %v6604_v3  ;;  %v340_v13 = vld [vmem:[%s7270_s11] sm:$0xff]  ;;  %v395_v16 = vpack.c.bf16 %v342_v12, %v341_v11  ;;  %v373_v18 = vpack.c.bf16 %v343_v15, %v342_v12  ;;  %v345_v20 = vld [vmem:[%s7270_s11 + $0x28] sm:$0xff]  ;;  %v346_v23 = vld [vmem:[%s7270_s11 + $0x30] sm:$0xff]  ;;  %p7048_p11 = scmp.lt.s32.totalorder %s7042_s25, %s8468_s6 }
  0x40   : > { %647 = vmatpush.bf16.msra.mxu1 %v6600_v4  ;;  %v6606_v14 = vld [vmem:[#allocation5 + $0x40] sm:$0xff]  ;;  %v372_v17 = vpack.c.bf16 %v341_v11, %v340_v13  ;;  %v347_v24 = vld [vmem:[%s7270_s11 + $0x38] sm:$0xff]  ;;  %v397_v25 = vpack.c.bf16 %v346_v23, %v345_v20  ;;  %v349_v28 = vld [vmem:[%s7270_s11 + $0x48] sm:$0xff] }
  0x41   : > { %768 = vmatpush.bf16.msra.mxu2 %v6608_v5  ;;  %v344_v19 = vld [vmem:[%s7270_s11 + $0x20] sm:$0xff]  ;;  %v375_v26 = vpack.c.bf16 %v347_v24, %v346_v23  ;;  %v350_v31 = vld [vmem:[%s7270_s11 + $0x50] sm:$0xff]  ;;  %v351_v32 = vld [vmem:[%s7270_s11 + $0x58] sm:$0xff] }
  0x42   : > { %v396_v21 = vpack.c.bf16 %v344_v19, %v343_v15  ;;  %v374_v22 = vpack.c.bf16 %v345_v20, %v344_v19  ;;  %v348_v27 = vld [vmem:[%s7270_s11 + $0x40] sm:$0xff]  ;;  %v399_v33 = vpack.c.bf16 %v350_v31, %v349_v28  ;;  %v377_v34 = vpack.c.bf16 %v351_v32, %v350_v31  ;;  %v353_v36 = vld [vmem:[%s7270_s11 + $0x68] sm:$0xff]  ;;  %v354_v39 = vld [vmem:[%s7270_s11 + $0x70] sm:$0xff] }
  0x43   : > { %495 = vmatpush.bf16.msra.mxu0 %v6603_v6  ;;  %v398_v29 = vpack.c.bf16 %v348_v27, %v347_v24  ;;  %v376_v30 = vpack.c.bf16 %v349_v28, %v348_v27  ;;  %v352_v35 = vld [vmem:[%s7270_s11 + $0x60] sm:$0xff]  ;;  %v355_v40 = vld [vmem:[%s7270_s11 + $0x78] sm:$0xff]  ;;  %v401_v41 = vpack.c.bf16 %v354_v39, %v353_v36  ;;  %v357_v44 = vld [vmem:[%s7270_s11 + $0x88] sm:$0xff] }
  0x44   : > { %648 = vmatpush.bf16.msra.mxu1 %v6599_v7  ;;  %v400_v37 = vpack.c.bf16 %v352_v35, %v351_v32  ;;  %v378_v38 = vpack.c.bf16 %v353_v36, %v352_v35  ;;  %v379_v42 = vpack.c.bf16 %v355_v40, %v354_v39  ;;  %v356_v43 = vld [vmem:[%s7270_s11 + $0x80] sm:$0xff]  ;;  %v6617_v46 = vld [vmem:[#allocation5 + $0x98] sm:$0xff]  ;;  %v6616_v48 = vld [vmem:[#allocation5 + $0x90] sm:$0xff] }
  0x45   : > { %769 = vmatpush.bf16.msra.mxu2 %v6607_v8  ;;  %v402_v45 = vpack.c.bf16 %v356_v43, %v355_v40  ;;  %v380_v47 = vpack.c.bf16 %v357_v44, %v356_v43  ;;  %1055 = vmatpush.bf16.msra.mxu3 %v6617_v46  ;;  %v6615_v49 = vld [vmem:[#allocation5 + $0x88] sm:$0xff]  ;;  %v6614_v50 = vld [vmem:[#allocation5 + $0x80] sm:$0xff]  ;;  %v358_v51 = vld [vmem:[%s7270_s11 + $0x90] sm:$0xff] }
  0x46   : > { %v6621_v52 = vld [vmem:[#allocation5 + $0xb8] sm:$0xff]  ;;  %v403_v54 = vpack.c.bf16 %v358_v51, %v357_v44  ;;  %v7331_v0 = vld [vmem:[#allocation7] ss:$0 sm:$0xff]  ;;  %v361_v2 = vld [vmem:[%s7270_s11 + $0xa8] sm:$0xff] }
  0x47   : > { %496 = vmatpush.bf16.msra.mxu0 %v6602_v9  ;;  %v359_v53 = vld [vmem:[%s7270_s11 + $0x98] sm:$0xff]  ;;  %v360_v1 = vld [vmem:[%s7270_s11 + $0xa0] sm:$0xff]  ;;  %v365_v43 = vld [vmem:[%s7270_s11 + $0xc8] sm:$0xff] }
  0x48   : > { %649 = vmatpush.bf16.msra.mxu1 %v6598_v10  ;;  %v381_v57 = vpack.c.bf16 %v359_v53, %v358_v51  ;;  %v6613_v59 = vld [vmem:[#allocation5 + $0x78] sm:$0xff]  ;;  %v404_v5 = vpack.c.bf16 %v360_v1, %v359_v53  ;;  %v382_v10 = vpack.c.bf16 %v361_v2, %v360_v1  ;;  %v6612_v1 = vld [vmem:[#allocation5 + $0x70] sm:$0xff] }
  0x49   : > { %770 = vmatpush.bf16.msra.mxu2 %v6606_v14  ;;  %1056 = vmatpush.bf16.msra.mxu3 %v6616_v48  ;;  %v363_v23 = vld [vmem:[%s7270_s11 + $0xb8] sm:$0xff] }
  0x4a   : > { %5578 = vmatmul.msk.bf16.vlgmr.msra.gmra.mxu0 %vm443_vm0, %v395_v16 }
  0x4b   : > { %5609 = vmatmul.msk.bf16.vlgmr.msra.gmra.mxu1 %vm443_vm0, %v372_v17  ;;  %1316 = vmatpush.bf16.msrb.mxu0 %v6621_v52 }
  0x4c   : > { %5640 = vmatmul.msk.bf16.vlgmr.msra.gmra.mxu2 %vm443_vm0, %v373_v18 }
  0x4d   : > { %1057 = vmatpush.bf16.msra.mxu3 %v6615_v49 }
  0x51   : > { %1058 = vmatpush.bf16.msra.mxu3 %v6614_v50 }
  0x55   : > { %1200 = vmatpush.bf16.msrb.mxu3 %v6613_v59 }
  0x59   : > { %1201 = vmatpush.bf16.msrb.mxu3 %v6612_v1 }
  0x5a   : > { %5579 = vmatmul.msk.bf16.gmra.mxu0 %vm443_vm0, %v396_v21 }
  0x5b   : > { %5610 = vmatmul.msk.bf16.gmra.mxu1 %vm443_vm0, %v373_v18 }
  0x5c   : > { %5641 = vmatmul.msk.bf16.gmra.mxu2 %vm443_vm0, %v374_v22 }
  0x6a   : > { %5580 = vmatmul.msk.bf16.gmra.mxu0 %vm443_vm0, %v397_v25 }
  0x6b   : > { %5611 = vmatmul.msk.bf16.gmra.mxu1 %vm443_vm0, %v374_v22  ;;  %v362_v22 = vld [vmem:[%s7270_s11 + $0xb0] sm:$0xff] }
  0x6c   : > { %5642 = vmatmul.msk.bf16.gmra.mxu2 %vm443_vm0, %v375_v26  ;;  %v405_v27 = vpack.c.bf16 %v362_v22, %v361_v2  ;;  %v383_v31 = vpack.c.bf16 %v363_v23, %v362_v22  ;;  %v367_v2 = vld [vmem:[%s7270_s11 + $0xd8] sm:$0xff] }
  0x7a   : > { %5581 = vmatmul.msk.bf16.gmra.mxu0 %vm443_vm0, %v398_v29 }
  0x7b   : > { %5612 = vmatmul.msk.bf16.gmra.mxu1 %vm443_vm0, %v375_v26 }
  0x7c   : > { %5643 = vmatmul.msk.bf16.gmra.mxu2 %vm443_vm0, %v376_v30 }
  0x8a   : > { %5582 = vmatmul.msk.bf16.gmra.mxu0 %vm443_vm0, %v399_v33 }
  0x8b   : > { %5613 = vmatmul.msk.bf16.gmra.mxu1 %vm443_vm0, %v376_v30 }
  0x8c   : > { %5644 = vmatmul.msk.bf16.gmra.mxu2 %vm443_vm0, %v377_v34 }
  0x9a   : > { %5583 = vmatmul.msk.bf16.gmra.mxu0 %vm443_vm0, %v400_v37 }
  0x9b   : > { %5614 = vmatmul.msk.bf16.gmra.mxu1 %vm443_vm0, %v377_v34 }
  0x9c   : > { %5645 = vmatmul.msk.bf16.gmra.mxu2 %vm443_vm0, %v378_v38 }
  0xaa   : > { %5584 = vmatmul.msk.bf16.gmra.mxu0 %vm443_vm0, %v401_v41 }
  0xab   : > { %5615 = vmatmul.msk.bf16.gmra.mxu1 %vm443_vm0, %v378_v38 }
  0xac   : > { %5646 = vmatmul.msk.bf16.gmra.mxu2 %vm443_vm0, %v379_v42 }
  0xba   : > { %5585 = vmatmul.msk.bf16.gmra.mxu0 %vm443_vm0, %v402_v45 }
  0xbb   : > { %5616 = vmatmul.msk.bf16.gmra.mxu1 %vm443_vm0, %v379_v42  ;;  %v364_v42 = vld [vmem:[%s7270_s11 + $0xc0] sm:$0xff] }
  0xbc   : > { %5647 = vmatmul.msk.bf16.gmra.mxu2 %vm443_vm0, %v380_v47  ;;  %v384_v51 = vpack.c.bf16 %v365_v43, %v364_v42 }
  0xc7   : > { %v498_v55 = vpop.f32.mrf.mxu0 }
  0xc8   : > { %v651_v56 = vpop.f32.mrf.mxu1 }
  0xc9   : > { %v652_v58 = vadd.f32 %v651_v56, %v498_v55  ;;  %v6620_v56 = vld [vmem:[#allocation5 + $0xb0] sm:$0xff] }
  0xca   : > { %5586 = vmatmul.msk.bf16.gmra.mxu0 %vm443_vm0, %v403_v54 }
  0xcb   : > { %5617 = vmatmul.msk.bf16.gmra.mxu1 %vm443_vm0, %v380_v47  ;;  %v406_v47 = vpack.c.bf16 %v364_v42, %v363_v23  ;;  %1317 = vmatpush.bf16.msrb.mxu0 %v6620_v56  ;;  %v368_v23 = vld [vmem:[%s7270_s11 + $0xe0] sm:$0xff] }
  0xcc   : > { %5648 = vmatmul.msk.bf16.gmra.mxu2 %vm443_vm0, %v381_v57 }
  0xcf   : > { %v772_v60 = vpop.f32.mrf.mxu2  ;;  %v500_v62 = vpop.f32.mrf.mxu0 }
  0xd0   : > { %v847_v61 = vadd.f32 %v772_v60, %v652_v58  ;;  %v653_v63 = vpop.f32.mrf.mxu1 }
  0xd1   : > { %v654_v3 = vadd.f32 %v653_v63, %v500_v62  ;;  %v366_v62 = vld [vmem:[%s7270_s11 + $0xd0] sm:$0xff] }
  0xd2   : > { %v879_v6 = vadd.f32 %v7331_v0, %v847_v61 }
  0xd4   : > { %v909_v12 = vmax.f32 %v879_v6, 0.0 }
  0xd7   : > { %v774_v4 = vpop.f32.mrf.mxu2  ;;  %v503_v8 = vpop.f32.mrf.mxu0 }
  0xd8   : > { %v848_v7 = vadd.f32 %v774_v4, %v654_v3  ;;  %v656_v9 = vpop.f32.mrf.mxu1 }
  0xd9   : > { %v657_v14 = vadd.f32 %v656_v9, %v503_v8 }
  0xda   : > { %v880_v11 = vadd.f32 %v7331_v0, %v848_v7  ;;  %5587 = vmatmul.msk.bf16.gmra.mxu0 %vm443_vm0, %v404_v5  ;;  %v407_v5 = vpack.c.bf16 %v366_v62, %v365_v43 }
  0xdb   : > { %5618 = vmatmul.msk.bf16.gmra.mxu1 %vm443_vm0, %v381_v57 }
  0xdc   : > { %v910_v13 = vmax.f32 %v880_v11, 0.0  ;;  %5649 = vmatmul.msk.bf16.gmra.mxu2 %vm443_vm0, %v382_v10 }
  0xde   : > { %v7340_v15 = vpack.c.bf16 %v910_v13, %v909_v12 }
  0xdf   : > { %v777_v16 = vpop.f32.mrf.mxu2  ;;  %v505_v18 = vpop.f32.mrf.mxu0 }
  0xe0   : > { %v849_v17 = vadd.f32 %v777_v16, %v657_v14  ;;  %v658_v19 = vpop.f32.mrf.mxu1 }
  0xe1   : > { %v659_v24 = vadd.f32 %v658_v19, %v505_v18 }
  0xe2   : > { %v881_v20 = vadd.f32 %v7331_v0, %v849_v17 }
  0xe4   : > { %v911_v21 = vmax.f32 %v881_v20, 0.0 }
  0xe6   : > { %v962_v25 = vpack.c.bf16 %v911_v21, %v910_v13 }
  0xe7   : > { %v779_v26 = vpop.f32.mrf.mxu2  ;;  %v508_v29 = vpop.f32.mrf.mxu0 }
  0xe8   : > { %v850_v28 = vadd.f32 %v779_v26, %v659_v24  ;;  %5671 = vmatmul.msk.bf16.vlgmr.msra.gmra.mxu3 %vm443_vm0, %v962_v25  ;;  %v661_v30 = vpop.f32.mrf.mxu1  ;;  %v369_v24 = vld [vmem:[%s7270_s11 + $0xe8] sm:$0xff] }
  0xe9   : > { %v662_v34 = vadd.f32 %v661_v30, %v508_v29  ;;  %v6618_v29 = vld [vmem:[#allocation5 + $0xa0] sm:$0xff] }
  0xea   : > { %v882_v32 = vadd.f32 %v7331_v0, %v850_v28  ;;  %5588 = vmatmul.msk.bf16.gmra.mxu0 %vm443_vm0, %v405_v27  ;;  %v408_v28 = vpack.c.bf16 %v368_v23, %v367_v2 }
  0xeb   : > { %5619 = vmatmul.msk.bf16.gmra.mxu1 %vm443_vm0, %v382_v10  ;;  %v385_v10 = vpack.c.bf16 %v367_v2, %v366_v62 }
  0xec   : > { %v912_v33 = vmax.f32 %v882_v32, 0.0  ;;  %5650 = vmatmul.msk.bf16.gmra.mxu2 %vm443_vm0, %v383_v31 }
  0xee   : > { %v7350_v35 = vpack.c.bf16 %v912_v33, %v911_v21  ;;  %v6619_v21 = vld [vmem:[#allocation5 + $0xa8] sm:$0xff] }
  0xef   : > { %v782_v36 = vpop.f32.mrf.mxu2  ;;  %v510_v38 = vpop.f32.mrf.mxu0  ;;  %1318 = vmatpush.bf16.msrb.mxu0 %v6619_v21 }
  0xf0   : > { %v851_v37 = vadd.f32 %v782_v36, %v662_v34  ;;  %v663_v39 = vpop.f32.mrf.mxu1 }
  0xf1   : > { %v664_v44 = vadd.f32 %v663_v39, %v510_v38 }
  0xf2   : > { %v883_v40 = vadd.f32 %v7331_v0, %v851_v37 }
  0xf3   : > { %1319 = vmatpush.bf16.msrb.mxu0 %v6618_v29 }
  0xf4   : > { %v913_v41 = vmax.f32 %v883_v40, 0.0 }
  0xf6   : > { %v963_v45 = vpack.c.bf16 %v913_v41, %v912_v33  ;;  %v386_v33 = vpack.c.bf16 %v369_v24, %v368_v23 }
  0xf7   : > { %v784_v46 = vpop.f32.mrf.mxu2  ;;  %v513_v49 = vpop.f32.mrf.mxu0 }
  0xf8   : > { %v852_v48 = vadd.f32 %v784_v46, %v664_v44  ;;  %5672 = vmatmul.msk.bf16.gmra.mxu3 %vm443_vm0, %v963_v45  ;;  %v666_v50 = vpop.f32.mrf.mxu1  ;;  %v370_v45 = vld [vmem:[%s7270_s11 + $0xf0] sm:$0xff]  ;;  %v371_v46 = vld [vmem:[%s7270_s11 + $0xf8] sm:$0xff]  ;;  %s7043_s11 = scalar_lea.hbm %s7042_s25, 8 }
  0xf9   : > { %v667_v54 = vadd.f32 %v666_v50, %v513_v49  ;;  %v409_v50 = vpack.c.bf16 %v370_v45, %v369_v24  ;;  %p7044_p1 = scmp.ne.s32.totalorder %s7042_s25, %s7043_s11  ;;  %p7049_p2 = scmp.lt.s32.totalorder %s7047_s14, %s7043_s11 }
  0xfa   : > { %v884_v52 = vadd.f32 %v7331_v0, %v852_v48  ;;  %5589 = vmatmul.msk.bf16.gmra.mxu0 %vm443_vm0, %v406_v47 }
  0xfb   : > { %5620 = vmatmul.msk.bf16.gmra.mxu1 %vm443_vm0, %v383_v31  ;;  %p7045_p4 = pnand %p7044_p1, %p7233_p3  ;;  %p7050_p9 = por %p7049_p2, %p7048_p11 }
  0xfc   : > { %v914_v53 = vmax.f32 %v884_v52, 0.0  ;;  %5651 = vmatmul.msk.bf16.gmra.mxu2 %vm443_vm0, %v384_v51 }
  0xfd   : > { %p7046_p8 = pneg %p7045_p4 }
  0xfe   : > { %v7360_v55 = vpack.c.bf16 %v914_v53, %v913_v41 }
  0xff   : > { %v787_v57 = vpop.f32.mrf.mxu2  ;;  %v515_v59 = vpop.f32.mrf.mxu0  ;;  %p7051_p10 = pnand %p7050_p9, %p7046_p8 }
 0x100   : > { %v853_v58 = vadd.f32 %v787_v57, %v667_v54  ;;  %v668_v60 = vpop.f32.mrf.mxu1  ;;  %v726_v54 = vpack.c.bf16 %v371_v46, %v370_v45 }
 0x101   : > { %v669_v3 = vadd.f32 %v668_v60, %v515_v59 }
 0x102   : > { %v885_v61 = vadd.f32 %v7331_v0, %v853_v58 }
 0x104   : > { %v915_v63 = vmax.f32 %v885_v61, 0.0 }
 0x106   : > { %v964_v4 = vpack.c.bf16 %v915_v63, %v914_v53 }
 0x107   : > { %v789_v6 = vpop.f32.mrf.mxu2  ;;  %v518_v8 = vpop.f32.mrf.mxu0 }
 0x108   : > { %v854_v7 = vadd.f32 %v789_v6, %v669_v3  ;;  %5673 = vmatmul.msk.bf16.gmra.mxu3 %vm443_vm0, %v964_v4  ;;  %v671_v9 = vpop.f32.mrf.mxu1 }
 0x109   : > { %v672_v13 = vadd.f32 %v671_v9, %v518_v8 }
 0x10a   : > { %v886_v11 = vadd.f32 %v7331_v0, %v854_v7  ;;  %5590 = vmatmul.msk.bf16.gmra.mxu0 %vm443_vm0, %v407_v5 }
 0x10b   : > { %5621 = vmatmul.msk.bf16.gmra.mxu1 %vm443_vm0, %v384_v51 }
 0x10c   : > { %v916_v12 = vmax.f32 %v886_v11, 0.0  ;;  %5652 = vmatmul.msk.bf16.gmra.mxu2 %vm443_vm0, %v385_v10 }
 0x10e   : > { %v7370_v14 = vpack.c.bf16 %v916_v12, %v915_v63 }
 0x10f   : > { %v792_v16 = vpop.f32.mrf.mxu2  ;;  %v520_v18 = vpop.f32.mrf.mxu0 }
 0x110   : > { %v855_v17 = vadd.f32 %v792_v16, %v672_v13  ;;  %v673_v19 = vpop.f32.mrf.mxu1  ;;  %v6611_v13 = vld [vmem:[#allocation5 + $0x68] sm:$0xff] }
 0x111   : > { %v674_v25 = vadd.f32 %v673_v19, %v520_v18  ;;  %1202 = vmatpush.bf16.msrb.mxu3 %v6611_v13 }
 0x112   : > { %v887_v20 = vadd.f32 %v7331_v0, %v855_v17 }
 0x114   : > { %v917_v22 = vmax.f32 %v887_v20, 0.0 }
 0x116   : > { %v965_v26 = vpack.c.bf16 %v917_v22, %v916_v12 }
 0x117   : > { %v794_v27 = vpop.f32.mrf.mxu2  ;;  %v523_v31 = vpop.f32.mrf.mxu0 }
 0x118   : > { %v856_v30 = vadd.f32 %v794_v27, %v674_v25  ;;  %5674 = vmatmul.msk.bf16.gmra.mxu3 %vm443_vm0, %v965_v26  ;;  %v676_v32 = vpop.f32.mrf.mxu1 }
 0x119   : > { %v677_v37 = vadd.f32 %v676_v32, %v523_v31 }
 0x11a   : > { %v888_v34 = vadd.f32 %v7331_v0, %v856_v30  ;;  %5591 = vmatmul.msk.bf16.gmra.mxu0 %vm443_vm0, %v408_v28 }
 0x11b   : > { %5622 = vmatmul.msk.bf16.gmra.mxu1 %vm443_vm0, %v385_v10 }
 0x11c   : > { %v918_v36 = vmax.f32 %v888_v34, 0.0  ;;  %5653 = vmatmul.msk.bf16.gmra.mxu2 %vm443_vm0, %v386_v33 }
 0x11e   : > { %v7380_v38 = vpack.c.bf16 %v918_v36, %v917_v22 }
 0x11f   : > { %v797_v39 = vpop.f32.mrf.mxu2  ;;  %v525_v41 = vpop.f32.mrf.mxu0 }
 0x120   : > { %v857_v40 = vadd.f32 %v797_v39, %v677_v37  ;;  %v678_v42 = vpop.f32.mrf.mxu1 }
 0x121   : > { %v679_v47 = vadd.f32 %v678_v42, %v525_v41 }
 0x122   : > { %v889_v43 = vadd.f32 %v7331_v0, %v857_v40  ;;  %v6629_v40 = vld [vmem:[#allocation5 + $0xf8] sm:$0xff] }
 0x123   : > { %1588 = vmatpush.bf16.msrb.mxu1 %v6629_v40 }
 0x124   : > { %v919_v44 = vmax.f32 %v889_v43, 0.0 }
 0x126   : > { %v966_v48 = vpack.c.bf16 %v919_v44, %v918_v36 }
 0x127   : > { %v799_v49 = vpop.f32.mrf.mxu2  ;;  %v528_v52 = vpop.f32.mrf.mxu0 }
 0x128   : > { %v858_v51 = vadd.f32 %v799_v49, %v679_v47  ;;  %5675 = vmatmul.msk.bf16.gmra.mxu3 %vm443_vm0, %v966_v48  ;;  %v681_v53 = vpop.f32.mrf.mxu1 }
 0x129   : > { %v682_v58 = vadd.f32 %v681_v53, %v528_v52 }
 0x12a   : > { %v890_v56 = vadd.f32 %v7331_v0, %v858_v51  ;;  %5592 = vmatmul.msk.bf16.gmra.mxu0 %vm443_vm0, %v409_v50 }
 0x12b   : > { %5623 = vmatmul.msk.bf16.gmra.mxu1 %vm443_vm0, %v386_v33 }
 0x12c   : > { %v920_v57 = vmax.f32 %v890_v56, 0.0  ;;  %5654 = vmatmul.msk.bf16.gmra.mxu2 %vm443_vm0, %v726_v54 }
 0x12e   : > { %v7390_v59 = vpack.c.bf16 %v920_v57, %v919_v44 }
 0x12f   : > { %v802_v60 = vpop.f32.mrf.mxu2  ;;  %v530_v62 = vpop.f32.mrf.mxu0 }
 0x130   : > { %v859_v61 = vadd.f32 %v802_v60, %v682_v58  ;;  %v683_v63 = vpop.f32.mrf.mxu1 }
 0x131   : > { %v684_v3 = vadd.f32 %v683_v63, %v530_v62 }
 0x132   : > { %v891_v1 = vadd.f32 %v7331_v0, %v859_v61 }
 0x134   : > { %v921_v2 = vmax.f32 %v891_v1, 0.0 }
 0x136   : > { %v967_v4 = vpack.c.bf16 %v921_v2, %v920_v57 }
 0x137   : > { %v804_v5 = vpop.f32.mrf.mxu2  ;;  %v533_v7 = vpop.f32.mrf.mxu0 }
 0x138   : > { %v860_v6 = vadd.f32 %v804_v5, %v684_v3  ;;  %5676 = vmatmul.msk.bf16.gmra.mxu3 %vm443_vm0, %v967_v4  ;;  %v686_v8 = vpop.f32.mrf.mxu1 }
 0x139   : > { %v687_v11 = vadd.f32 %v686_v8, %v533_v7 }
 0x13a   : > { %v892_v9 = vadd.f32 %v7331_v0, %v860_v6  ;;  %5731 = vmatmul.msk.bf16.vlgmr.msrb.gmra.mxu0 %vm443_vm0, %v7350_v35 }
 0x13c   : > { %v922_v10 = vmax.f32 %v892_v9, 0.0 }
 0x13e   : > { %v7397_v12 = vpack.c.bf16 %v922_v10, %v921_v2 }
 0x13f   : > { %v807_v16 = vpop.f32.mrf.mxu2  ;;  %v535_v18 = vpop.f32.mrf.mxu0 }
 0x140   : > { %v861_v17 = vadd.f32 %v807_v16, %v687_v11  ;;  %v688_v19 = vpop.f32.mrf.mxu1 }
 0x141   : > { %v689_v22 = vadd.f32 %v688_v19, %v535_v18 }
 0x142   : > { %v893_v20 = vadd.f32 %v7331_v0, %v861_v17  ;;  %v6610_v17 = vld [vmem:[#allocation5 + $0x60] sm:$0xff] }
 0x143   : > { %1203 = vmatpush.bf16.msrb.mxu3 %v6610_v17 }
 0x144   : > { %v923_v21 = vmax.f32 %v893_v20, 0.0 }
 0x146   : > { %v968_v23 = vpack.c.bf16 %v923_v21, %v922_v10 }
 0x147   : > { %v809_v24 = vpop.f32.mrf.mxu2  ;;  %v538_v26 = vpop.f32.mrf.mxu0 }
 0x148   : > { %v862_v25 = vadd.f32 %v809_v24, %v689_v22  ;;  %5677 = vmatmul.msk.bf16.gmra.mxu3 %vm443_vm0, %v968_v23  ;;  %v691_v27 = vpop.f32.mrf.mxu1 }
 0x149   : > { %v692_v30 = vadd.f32 %v691_v27, %v538_v26 }
 0x14a   : > { %v894_v28 = vadd.f32 %v7331_v0, %v862_v25  ;;  %5732 = vmatmul.msk.bf16.gmra.mxu0 %vm443_vm0, %v7360_v55 }
 0x14c   : > { %v924_v29 = vmax.f32 %v894_v28, 0.0 }
 0x14e   : > { %v7404_v31 = vpack.c.bf16 %v924_v29, %v923_v21 }
 0x14f   : > { %v812_v32 = vpop.f32.mrf.mxu2  ;;  %v540_v34 = vpop.f32.mrf.mxu0 }
 0x150   : > { %v863_v33 = vadd.f32 %v812_v32, %v692_v30  ;;  %v693_v36 = vpop.f32.mrf.mxu1 }
 0x151   : > { %v694_v41 = vadd.f32 %v693_v36, %v540_v34 }
 0x152   : > { %v895_v37 = vadd.f32 %v7331_v0, %v863_v33 }
 0x154   : > { %v925_v39 = vmax.f32 %v895_v37, 0.0 }
 0x156   : > { %v969_v42 = vpack.c.bf16 %v925_v39, %v924_v29 }
 0x157   : > { %v814_v43 = vpop.f32.mrf.mxu2  ;;  %v543_v45 = vpop.f32.mrf.mxu0 }
 0x158   : > { %v864_v44 = vadd.f32 %v814_v43, %v694_v41  ;;  %5678 = vmatmul.msk.bf16.gmra.mxu3 %vm443_vm0, %v969_v42  ;;  %v696_v46 = vpop.f32.mrf.mxu1 }
 0x159   : > { %v697_v49 = vadd.f32 %v696_v46, %v543_v45 }
 0x15a   : > { %v896_v47 = vadd.f32 %v7331_v0, %v864_v44  ;;  %5733 = vmatmul.msk.bf16.gmra.mxu0 %vm443_vm0, %v7370_v14 }
 0x15c   : > { %v926_v48 = vmax.f32 %v896_v47, 0.0 }
 0x15e   : > { %v7411_v50 = vpack.c.bf16 %v926_v48, %v925_v39 }
 0x15f   : > { %v817_v51 = vpop.f32.mrf.mxu2  ;;  %v545_v53 = vpop.f32.mrf.mxu0 }
 0x160   : > { %v865_v52 = vadd.f32 %v817_v51, %v697_v49  ;;  %v698_v54 = vpop.f32.mrf.mxu1 }
 0x161   : > { %v699_v58 = vadd.f32 %v698_v54, %v545_v53 }
 0x162   : > { %v897_v56 = vadd.f32 %v7331_v0, %v865_v52 }
 0x164   : > { %v927_v57 = vmax.f32 %v897_v56, 0.0 }
 0x166   : > { %v970_v60 = vpack.c.bf16 %v927_v57, %v926_v48 }
 0x167   : > { %v819_v61 = vpop.f32.mrf.mxu2  ;;  %v548_v63 = vpop.f32.mrf.mxu0 }
 0x168   : > { %v866_v62 = vadd.f32 %v819_v61, %v699_v58  ;;  %5679 = vmatmul.msk.bf16.gmra.mxu3 %vm443_vm0, %v970_v60  ;;  %v701_v1 = vpop.f32.mrf.mxu1 }
 0x169   : > { %v702_v5 = vadd.f32 %v701_v1, %v548_v63 }
 0x16a   : > { %v898_v2 = vadd.f32 %v7331_v0, %v866_v62  ;;  %5734 = vmatmul.msk.bf16.gmra.mxu0 %vm443_vm0, %v7380_v38  ;;  %v6628_v62 = vld [vmem:[#allocation5 + $0xf0] sm:$0xff] }
 0x16b   : > { %v7416_v3 = vpop.f32.mrf.mxu3  ;;  %1589 = vmatpush.bf16.msrb.mxu1 %v6628_v62 }
 0x16c   : > { %v928_v4 = vmax.f32 %v898_v2, 0.0 }
 0x16e   : > { %v7420_v6 = vpack.c.bf16 %v928_v4, %v927_v57 }
 0x16f   : > { %v822_v7 = vpop.f32.mrf.mxu2  ;;  %v550_v9 = vpop.f32.mrf.mxu0 }
 0x170   : > { %v867_v8 = vadd.f32 %v822_v7, %v702_v5  ;;  %v703_v10 = vpop.f32.mrf.mxu1 }
 0x171   : > { %v704_v18 = vadd.f32 %v703_v10, %v550_v9 }
 0x172   : > { %v899_v11 = vadd.f32 %v7331_v0, %v867_v8 }
 0x173   : > { %v7423_v13 = vpop.f32.mrf.mxu3 }
 0x174   : > { %v929_v16 = vmax.f32 %v899_v11, 0.0 }
 0x176   : > { %v971_v19 = vpack.c.bf16 %v929_v16, %v928_v4 }
 0x177   : > { %v824_v20 = vpop.f32.mrf.mxu2  ;;  %v553_v22 = vpop.f32.mrf.mxu0 }
 0x178   : > { %v868_v21 = vadd.f32 %v824_v20, %v704_v18  ;;  %5680 = vmatmul.msk.bf16.gmra.mxu3 %vm443_vm0, %v971_v19  ;;  %v706_v23 = vpop.f32.mrf.mxu1 }
 0x179   : > { %v707_v27 = vadd.f32 %v706_v23, %v553_v22 }
 0x17a   : > { %v900_v24 = vadd.f32 %v7331_v0, %v868_v21  ;;  %5735 = vmatmul.msk.bf16.gmra.mxu0 %vm443_vm0, %v7390_v59 }
 0x17b   : > { %v7427_v25 = vpop.f32.mrf.mxu3 }
 0x17c   : > { %v930_v26 = vmax.f32 %v900_v24, 0.0 }
 0x17e   : > { %v7431_v28 = vpack.c.bf16 %v930_v26, %v929_v16 }
 0x17f   : > { %v827_v29 = vpop.f32.mrf.mxu2  ;;  %v555_v32 = vpop.f32.mrf.mxu0 }
 0x180   : > { %v869_v30 = vadd.f32 %v827_v29, %v707_v27  ;;  %v708_v33 = vpop.f32.mrf.mxu1 }
 0x181   : > { %v709_v39 = vadd.f32 %v708_v33, %v555_v32 }
 0x182   : > { %v901_v34 = vadd.f32 %v7331_v0, %v869_v30 }
 0x183   : > { %v7434_v36 = vpop.f32.mrf.mxu3 }
 0x184   : > { %v931_v37 = vmax.f32 %v901_v34, 0.0 }
 0x186   : > { %v972_v40 = vpack.c.bf16 %v931_v37, %v930_v26 }
 0x187   : > { %v829_v41 = vpop.f32.mrf.mxu2  ;;  %v558_v43 = vpop.f32.mrf.mxu0 }
 0x188   : > { %v870_v42 = vadd.f32 %v829_v41, %v709_v39  ;;  %5681 = vmatmul.msk.bf16.gmra.mxu3 %vm443_vm0, %v972_v40  ;;  %v711_v44 = vpop.f32.mrf.mxu1 }
 0x189   : > { %v712_v48 = vadd.f32 %v711_v44, %v558_v43 }
 0x18a   : > { %v902_v45 = vadd.f32 %v7331_v0, %v870_v42  ;;  %5736 = vmatmul.msk.bf16.gmra.mxu0 %vm443_vm0, %v7397_v12 }
 0x18b   : > { %v7438_v46 = vpop.f32.mrf.mxu3 }
 0x18c   : > { %v932_v47 = vmax.f32 %v902_v45, 0.0 }
 0x18e   : > { %v7442_v49 = vpack.c.bf16 %v932_v47, %v931_v37 }
 0x18f   : > { %v832_v51 = vpop.f32.mrf.mxu2  ;;  %v560_v53 = vpop.f32.mrf.mxu0 }
 0x190   : > { %v871_v52 = vadd.f32 %v832_v51, %v712_v48  ;;  %v713_v54 = vpop.f32.mrf.mxu1  ;;  %v6627_v51 = vld [vmem:[#allocation5 + $0xe8] sm:$0xff] }
 0x191   : > { %v714_v60 = vadd.f32 %v713_v54, %v560_v53  ;;  %1590 = vmatpush.bf16.msrb.mxu1 %v6627_v51 }
 0x192   : > { %v903_v56 = vadd.f32 %v7331_v0, %v871_v52 }
 0x193   : > { %v7445_v57 = vpop.f32.mrf.mxu3 }
 0x194   : > { %v933_v58 = vmax.f32 %v903_v56, 0.0 }
 0x196   : > { %v973_v61 = vpack.c.bf16 %v933_v58, %v932_v47 }
 0x197   : > { %v834_v63 = vpop.f32.mrf.mxu2  ;;  %v563_v2 = vpop.f32.mrf.mxu0 }
 0x198   : > { %v872_v1 = vadd.f32 %v834_v63, %v714_v60  ;;  %5682 = vmatmul.msk.bf16.gmra.mxu3 %vm443_vm0, %v973_v61  ;;  %v716_v4 = vpop.f32.mrf.mxu1 }
 0x199   : > { %v717_v9 = vadd.f32 %v716_v4, %v563_v2 }
 0x19a   : > { %v904_v5 = vadd.f32 %v7331_v0, %v872_v1  ;;  %5737 = vmatmul.msk.bf16.gmra.mxu0 %vm443_vm0, %v7404_v31 }
 0x19b   : > { %v7449_v7 = vpop.f32.mrf.mxu3 }
 0x19c   : > { %v934_v8 = vmax.f32 %v904_v5, 0.0 }
 0x19e   : > { %v7453_v10 = vpack.c.bf16 %v934_v8, %v933_v58  ;;  %v6625_v58 = vld [vmem:[#allocation5 + $0xd8] sm:$0xff] }
 0x19f   : > { %v837_v11 = vpop.f32.mrf.mxu2  ;;  %v565_v17 = vpop.f32.mrf.mxu0  ;;  %1725 = vmatpush.bf16.msrb.mxu2 %v6625_v58 }
 0x1a0   : > { %v873_v16 = vadd.f32 %v837_v11, %v717_v9  ;;  %v718_v18 = vpop.f32.mrf.mxu1  ;;  %v6626_v11 = vld [vmem:[#allocation5 + $0xe0] sm:$0xff] }
 0x1a1   : > { %v719_v23 = vadd.f32 %v718_v18, %v565_v17  ;;  %1591 = vmatpush.bf16.msrb.mxu1 %v6626_v11 }
 0x1a2   : > { %v905_v19 = vadd.f32 %v7331_v0, %v873_v16 }
 0x1a3   : > { %v7456_v20 = vpop.f32.mrf.mxu3 }
 0x1a4   : > { %v935_v21 = vmax.f32 %v905_v19, 0.0 }
 0x1a6   : > { %v974_v22 = vpack.c.bf16 %v935_v21, %v934_v8 }
 0x1a7   : > { %v839_v24 = vpop.f32.mrf.mxu2  ;;  %v568_v29 = vpop.f32.mrf.mxu0 }
 0x1a8   : > { %v874_v26 = vadd.f32 %v839_v24, %v719_v23  ;;  %5683 = vmatmul.msk.bf16.gmra.mxu3 %vm443_vm0, %v974_v22  ;;  %v721_v30 = vpop.f32.mrf.mxu1  ;;  %v6623_v23 = vld [vmem:[#allocation5 + $0xc8] sm:$0xff]  ;;  %v6622_v24 = vld [vmem:[#allocation5 + $0xc0] sm:$0xff] }
 0x1a9   : > { %v722_v34 = vadd.f32 %v721_v30, %v568_v29  ;;  %v6633_v29 = vld [vmem:[#allocation5 + $0x118] sm:$0xff] }
 0x1aa   : > { %v906_v27 = vadd.f32 %v7331_v0, %v874_v26  ;;  %5738 = vmatmul.msk.bf16.gmra.mxu0 %vm443_vm0, %v7411_v50  ;;  %1836 = vmatpush.bf16.msra.mxu1 %v6633_v29 }
 0x1ab   : > { %v7460_v32 = vpop.f32.mrf.mxu3 }
 0x1ac   : > { %v936_v33 = vmax.f32 %v906_v27, 0.0 }
 0x1ae   : > { %v7464_v37 = vpack.c.bf16 %v936_v33, %v935_v21 }
 0x1af   : > { %v842_v39 = vpop.f32.mrf.mxu2  ;;  %v570_v54 = vpop.f32.mrf.mxu0 }
 0x1b0   : > { %v875_v40 = vadd.f32 %v842_v39, %v722_v34  ;;  %v723_v62 = vpop.f32.mrf.mxu1  ;;  %v7537_v39 = vld [vmem:[#allocation7 + $0x1] ss:$0 sm:$0xff] }
 0x1b1   : > { %v724_v1 = vadd.f32 %v723_v62, %v570_v54 }
 0x1b2   : > { %v907_v41 = vadd.f32 %v7331_v0, %v875_v40 }
 0x1b3   : > { %v7467_v42 = vpop.f32.mrf.mxu3 }
 0x1b4   : > { %v937_v43 = vmax.f32 %v907_v41, 0.0 }
 0x1b6   : > { %v975_v44 = vpack.c.bf16 %v937_v43, %v936_v33 }
 0x1b7   : > { %v1321_v60 = vpop.f32.mrf.mxu0  ;;  %v844_v63 = vpop.f32.mrf.mxu2 }
 0x1b8   : > { %5684 = vmatmul.msk.bf16.gmra.mxu3 %vm443_vm0, %v975_v44 }
 0x1ba   : > { %5739 = vmatmul.msk.bf16.gmra.mxu0 %vm443_vm0, %v7420_v6 }
 0x1bb   : > { %v7470_v45 = vpop.f32.mrf.mxu3 }
 0x1bf   : > { %v1323_v61 = vpop.f32.mrf.mxu0 }
 0x1c3   : > { %v7474_v47 = vpop.f32.mrf.mxu3 }
 0x1c7   : > { %v1326_v5 = vpop.f32.mrf.mxu0 }
 0x1c8   : > { %5701 = vmatmul.msk.bf16.vlgmr.msrb.gmra.mxu3 %vm443_vm0, %v7340_v15 }
 0x1ca   : > { %5740 = vmatmul.msk.bf16.gmra.mxu0 %vm443_vm0, %v7431_v28 }
 0x1cb   : > { %v7478_v48 = vpop.f32.mrf.mxu3 }
 0x1d3   : > { %v7482_v52 = vpop.f32.mrf.mxu3 }
 0x1d8   : > { %5702 = vmatmul.msk.bf16.gmra.mxu3 %vm443_vm0, %v7350_v35 }
 0x1da   : > { %5741 = vmatmul.msk.bf16.gmra.mxu0 %vm443_vm0, %v7442_v49 }
 0x1db   : > { %v7486_v53 = vpop.f32.mrf.mxu3 }
 0x1e3   : > { %v7490_v56 = vpop.f32.mrf.mxu3 }
 0x1e8   : > { %5703 = vmatmul.msk.bf16.gmra.mxu3 %vm443_vm0, %v7360_v55  ;;  %v876_v55 = vadd.f32 %v844_v63, %v724_v1 }
 0x1ea   : > { %5742 = vmatmul.msk.bf16.gmra.mxu0 %vm443_vm0, %v7453_v10  ;;  %v908_v4 = vadd.f32 %v7331_v0, %v876_v55 }
 0x1eb   : > { %v7494_v15 = vpop.f32.mrf.mxu3 }
 0x1ec   : > { %v938_v9 = vmax.f32 %v908_v4, 0.0 }
 0x1ee   : > { %v1275_v16 = vpack.c.bf16 %v938_v9, %v937_v43 }
 0x1f3   : > { %v7498_v35 = vpop.f32.mrf.mxu3 }
 0x1f8   : > { %5704 = vmatmul.msk.bf16.gmra.mxu3 %vm443_vm0, %v7370_v14  ;;  %v1328_v14 = vpop.f32.mrf.mxu0 }
 0x1fa   : > { %5743 = vmatmul.msk.bf16.gmra.mxu0 %vm443_vm0, %v7464_v37 }
 0x1fb   : > { %v7502_v2 = vpop.f32.mrf.mxu3 }
 0x200   : > { %v1331_v26 = vpop.f32.mrf.mxu0 }
 0x203   : > { %v7507_v8 = vpop.f32.mrf.mxu3 }
 0x208   : > { %5705 = vmatmul.msk.bf16.gmra.mxu3 %vm443_vm0, %v7380_v38  ;;  %v6624_v38 = vld [vmem:[#allocation5 + $0xd0] sm:$0xff] }
 0x209   : > { %1726 = vmatpush.bf16.msrb.mxu2 %v6624_v38 }
 0x20a   : > { %5744 = vmatmul.msk.bf16.gmra.mxu0 %vm443_vm0, %v1275_v16 }
 0x20b   : > { %v7511_v17 = vpop.f32.mrf.mxu3 }
 0x20d   : > { %1727 = vmatpush.bf16.msrb.mxu2 %v6623_v23 }
 0x211   : > { %1728 = vmatpush.bf16.msrb.mxu2 %v6622_v24 }
 0x213   : > { %v7514_v18 = vpop.f32.mrf.mxu3 }
 0x218   : > { %5706 = vmatmul.msk.bf16.gmra.mxu3 %vm443_vm0, %v7390_v59 }
 0x21b   : > { %v7518_v0 = vpop.f32.mrf.mxu3 }
 0x223   : > { %v7520_v19 = vpop.f32.mrf.mxu3 }
 0x228   : > { %5707 = vmatmul.msk.bf16.gmra.mxu3 %vm443_vm0, %v7397_v12  ;;  %v1333_v12 = vpop.f32.mrf.mxu0 }
 0x22b   : > { %v7524_v21 = vpop.f32.mrf.mxu3 }
 0x230   : > { %v1336_v40 = vpop.f32.mrf.mxu0 }
 0x233   : > { %v7526_v22 = vpop.f32.mrf.mxu3 }
 0x238   : > { %5708 = vmatmul.msk.bf16.gmra.mxu3 %vm443_vm0, %v7404_v31 }
 0x23b   : > { %v7530_v59 = vpop.f32.mrf.mxu3 }
 0x243   : > { %v7532_v27 = vpop.f32.mrf.mxu3 }
 0x248   : > { %5709 = vmatmul.msk.bf16.gmra.mxu3 %vm443_vm0, %v7411_v50 }
 0x24b   : > { %v1205_v30 = vpop.f32.mrf.mxu3 }
 0x24c   : > { %v1206_v33 = vadd.f32 %v1205_v30, %v7416_v3 }
 0x24e   : > { %v1391_v34 = vadd.f32 %v1321_v60, %v1206_v33  ;;  %v1338_v60 = vpop.f32.mrf.mxu0 }
 0x250   : > { %v1421_v43 = vadd.f32 %v7537_v39, %v1391_v34 }
 0x252   : > { %v1449_v50 = vmax.f32 %v1421_v43, 0.0 }
 0x253   : > { %v1207_v31 = vpop.f32.mrf.mxu3 }
 0x254   : > { %v1208_v41 = vadd.f32 %v1207_v31, %v7423_v13 }
 0x256   : > { %v1392_v44 = vadd.f32 %v1323_v61, %v1208_v41 }
 0x258   : > { %v1422_v51 = vadd.f32 %v7537_v39, %v1392_v44  ;;  %5710 = vmatmul.msk.bf16.gmra.mxu3 %vm443_vm0, %v7420_v6  ;;  %v1341_v6 = vpop.f32.mrf.mxu0 }
 0x25a   : > { %v1450_v54 = vmax.f32 %v1422_v51, 0.0 }
 0x25b   : > { %v1210_v58 = vpop.f32.mrf.mxu3 }
 0x25c   : > { %v1477_v62 = vpack.c.bf16 %v1450_v54, %v1449_v50  ;;  %v1211_v3 = vadd.f32 %v1210_v58, %v7427_v25 }
 0x25e   : > { %v1393_v63 = vadd.f32 %v1326_v5, %v1211_v3  ;;  %5790 = vmatmul.msk.bf16.vlgmr.msrb.gmra.mxu2 %vm443_vm0, %v1477_v62 }
 0x260   : > { %v1423_v13 = vadd.f32 %v7537_v39, %v1393_v63 }
 0x262   : > { %v1451_v1 = vmax.f32 %v1423_v13, 0.0 }
 0x263   : > { %v1212_v55 = vpop.f32.mrf.mxu3 }
 0x264   : > { %v1499_v61 = vpack.c.bf16 %v1451_v1, %v1450_v54  ;;  %v1213_v4 = vadd.f32 %v1212_v55, %v7434_v36 }
 0x266   : > { %v1394_v9 = vadd.f32 %v1328_v14, %v1213_v4  ;;  %5761 = vmatmul.msk.bf16.vlgmr.msrb.gmra.mxu1 %vm443_vm0, %v1499_v61  ;;  %v1343_v14 = vpop.f32.mrf.mxu0 }
 0x268   : > { %v1424_v11 = vadd.f32 %v7537_v39, %v1394_v9  ;;  %5711 = vmatmul.msk.bf16.gmra.mxu3 %vm443_vm0, %v7431_v28 }
 0x26a   : > { %v1452_v25 = vmax.f32 %v1424_v11, 0.0 }
 0x26b   : > { %v1215_v5 = vpop.f32.mrf.mxu3 }
 0x26c   : > { %v1216_v16 = vadd.f32 %v1215_v5, %v7438_v46  ;;  %v7553_v38 = vpack.c.bf16 %v1452_v25, %v1451_v1 }
 0x26e   : > { %v1395_v23 = vadd.f32 %v1331_v26, %v1216_v16  ;;  %5791 = vmatmul.msk.bf16.gmra.mxu2 %vm443_vm0, %v7553_v38  ;;  %v6632_v26 = vld [vmem:[#allocation5 + $0x110] sm:$0xff]  ;;  %v1346_v41 = vpop.f32.mrf.mxu0 }
 0x26f   : > { %1837 = vmatpush.bf16.msra.mxu1 %v6632_v26 }
 0x270   : > { %v1425_v36 = vadd.f32 %v7537_v39, %v1395_v23 }
 0x272   : > { %v1453_v24 = vmax.f32 %v1425_v36, 0.0 }
 0x273   : > { %v1217_v29 = vpop.f32.mrf.mxu3 }
 0x274   : > { %v1500_v30 = vpack.c.bf16 %v1453_v24, %v1452_v25  ;;  %v1218_v33 = vadd.f32 %v1217_v29, %v7445_v57 }
 0x276   : > { %v1396_v34 = vadd.f32 %v1333_v12, %v1218_v33  ;;  %5762 = vmatmul.msk.bf16.gmra.mxu1 %vm443_vm0, %v1500_v30  ;;  %v1348_v58 = vpop.f32.mrf.mxu0 }
 0x278   : > { %v1426_v28 = vadd.f32 %v7537_v39, %v1396_v34  ;;  %5712 = vmatmul.msk.bf16.gmra.mxu3 %vm443_vm0, %v7442_v49 }
 0x27a   : > { %v1454_v46 = vmax.f32 %v1426_v28, 0.0 }
 0x27b   : > { %v1220_v31 = vpop.f32.mrf.mxu3 }
 0x27c   : > { %v1221_v43 = vadd.f32 %v1220_v31, %v7449_v7  ;;  %v7564_v44 = vpack.c.bf16 %v1454_v46, %v1453_v24 }
 0x27e   : > { %v1397_v51 = vadd.f32 %v1336_v40, %v1221_v43  ;;  %5792 = vmatmul.msk.bf16.gmra.mxu2 %vm443_vm0, %v7564_v44 }
 0x280   : > { %v1427_v57 = vadd.f32 %v7537_v39, %v1397_v51 }
 0x282   : > { %v1455_v12 = vmax.f32 %v1427_v57, 0.0 }
 0x283   : > { %v1222_v50 = vpop.f32.mrf.mxu3 }
 0x284   : > { %v1501_v54 = vpack.c.bf16 %v1455_v12, %v1454_v46  ;;  %v1223_v49 = vadd.f32 %v1222_v50, %v7456_v20  ;;  %v1351_v20 = vpop.f32.mrf.mxu0 }
 0x286   : > { %v1398_v62 = vadd.f32 %v1338_v60, %v1223_v49  ;;  %5763 = vmatmul.msk.bf16.gmra.mxu1 %vm443_vm0, %v1501_v54 }
 0x288   : > { %v1428_v7 = vadd.f32 %v7537_v39, %v1398_v62  ;;  %5713 = vmatmul.msk.bf16.gmra.mxu3 %vm443_vm0, %v7453_v10 }
 0x28a   : > { %v1456_v40 = vmax.f32 %v1428_v7, 0.0 }
 0x28b   : > { %v1225_v3 = vpop.f32.mrf.mxu3 }
 0x28c   : > { %v1226_v63 = vadd.f32 %v1225_v3, %v7460_v32  ;;  %v7575_v13 = vpack.c.bf16 %v1456_v40, %v1455_v12  ;;  %v1353_v32 = vpop.f32.mrf.mxu0  ;;  %v6631_v12 = vld [vmem:[#allocation5 + $0x108] sm:$0xff] }
 0x28d   : > { %1838 = vmatpush.bf16.msra.mxu1 %v6631_v12 }
 0x28e   : > { %v1399_v1 = vadd.f32 %v1341_v6, %v1226_v63  ;;  %5793 = vmatmul.msk.bf16.gmra.mxu2 %vm443_vm0, %v7575_v13 }
 0x290   : > { %v1429_v60 = vadd.f32 %v7537_v39, %v1399_v1 }
 0x292   : > { %v1457_v55 = vmax.f32 %v1429_v60, 0.0 }
 0x293   : > { %v1227_v61 = vpop.f32.mrf.mxu3 }
 0x294   : > { %v1502_v4 = vpack.c.bf16 %v1457_v55, %v1456_v40  ;;  %v1228_v9 = vadd.f32 %v1227_v61, %v7467_v42  ;;  %v1356_v24 = vpop.f32.mrf.mxu0 }
 0x296   : > { %v1400_v11 = vadd.f32 %v1343_v14, %v1228_v9  ;;  %5764 = vmatmul.msk.bf16.gmra.mxu1 %vm443_vm0, %v1502_v4 }
 0x298   : > { %v1430_v10 = vadd.f32 %v7537_v39, %v1400_v11  ;;  %5714 = vmatmul.msk.bf16.gmra.mxu3 %vm443_vm0, %v7464_v37 }
 0x29a   : > { %v1458_v6 = vmax.f32 %v1430_v10, 0.0 }
 0x29b   : > { %v1230_v25 = vpop.f32.mrf.mxu3 }
 0x29c   : > { %v1231_v5 = vadd.f32 %v1230_v25, %v7470_v45  ;;  %v7586_v16 = vpack.c.bf16 %v1458_v6, %v1457_v55  ;;  %v1358_v26 = vpop.f32.mrf.mxu0 }
 0x29e   : > { %v1401_v23 = vadd.f32 %v1346_v41, %v1231_v5  ;;  %5794 = vmatmul.msk.bf16.gmra.mxu2 %vm443_vm0, %v7586_v16 }
 0x2a0   : > { %v1431_v42 = vadd.f32 %v7537_v39, %v1401_v23 }
 0x2a2   : > { %v1459_v36 = vmax.f32 %v1431_v42, 0.0  ;;  %v6637_v42 = vld [vmem:[#allocation5 + $0x138] sm:$0xff] }
 0x2a3   : > { %v1232_v14 = vpop.f32.mrf.mxu3  ;;  %2221 = vmatpush.bf16.msra.mxu3 %v6637_v42 }
 0x2a4   : > { %v1503_v29 = vpack.c.bf16 %v1459_v36, %v1458_v6  ;;  %v1233_v30 = vadd.f32 %v1232_v14, %v7474_v47 }
 0x2a6   : > { %v1402_v37 = vadd.f32 %v1348_v58, %v1233_v30  ;;  %5765 = vmatmul.msk.bf16.gmra.mxu1 %vm443_vm0, %v1503_v29  ;;  %v6645_v29 = vld [vmem:[#allocation5 + $0x178] sm:$0xff] }
 0x2a7   : > { %2327 = vmatpush.bf16.msra.mxu0 %v6645_v29 }
 0x2a8   : > { %v1432_v33 = vadd.f32 %v7537_v39, %v1402_v37 }
 0x2aa   : > { %v1460_v45 = vmax.f32 %v1432_v33, 0.0 }
 0x2ab   : > { %v1235_v34 = vpop.f32.mrf.mxu3 }
 0x2ac   : > { %v1236_v28 = vadd.f32 %v1235_v34, %v7478_v48  ;;  %v7595_v46 = vpack.c.bf16 %v1460_v45, %v1459_v36  ;;  %v1361_v48 = vpop.f32.mrf.mxu0 }
 0x2ae   : > { %v1403_v31 = vadd.f32 %v1351_v20, %v1236_v28  ;;  %5795 = vmatmul.msk.bf16.gmra.mxu2 %vm443_vm0, %v7595_v46 }
 0x2b0   : > { %v1433_v41 = vadd.f32 %v7537_v39, %v1403_v31 }
 0x2b2   : > { %v1461_v43 = vmax.f32 %v1433_v41, 0.0 }
 0x2b3   : > { %v1237_v47 = vpop.f32.mrf.mxu3 }
 0x2b4   : > { %v1504_v51 = vpack.c.bf16 %v1461_v43, %v1460_v45  ;;  %v1238_v57 = vadd.f32 %v1237_v47, %v7482_v52  ;;  %v1363_v3 = vpop.f32.mrf.mxu0 }
 0x2b6   : > { %v1404_v50 = vadd.f32 %v1353_v32, %v1238_v57  ;;  %5766 = vmatmul.msk.bf16.gmra.mxu1 %vm443_vm0, %v1504_v51  ;;  %v6630_v57 = vld [vmem:[#allocation5 + $0x100] sm:$0xff] }
 0x2b7   : > { %1839 = vmatpush.bf16.msra.mxu1 %v6630_v57 }
 0x2b8   : > { %v1434_v54 = vadd.f32 %v7537_v39, %v1404_v50 }
 0x2ba   : > { %v1462_v49 = vmax.f32 %v1434_v54, 0.0 }
 0x2bb   : > { %v1240_v58 = vpop.f32.mrf.mxu3 }
 0x2bc   : > { %v1241_v62 = vadd.f32 %v1240_v58, %v7486_v53  ;;  %v7604_v7 = vpack.c.bf16 %v1462_v49, %v1461_v43  ;;  %v1366_v9 = vpop.f32.mrf.mxu0 }
 0x2be   : > { %v1405_v40 = vadd.f32 %v1356_v24, %v1241_v62  ;;  %5796 = vmatmul.msk.bf16.gmra.mxu2 %vm443_vm0, %v7604_v7 }
 0x2c0   : > { %v1435_v52 = vadd.f32 %v7537_v39, %v1405_v40 }
 0x2c2   : > { %v1463_v63 = vmax.f32 %v1435_v52, 0.0 }
 0x2c3   : > { %v1242_v1 = vpop.f32.mrf.mxu3 }
 0x2c4   : > { %v1505_v20 = vpack.c.bf16 %v1463_v63, %v1462_v49  ;;  %v1243_v60 = vadd.f32 %v1242_v1, %v7490_v56  ;;  %v1368_v36 = vpop.f32.mrf.mxu0 }
 0x2c6   : > { %v1406_v55 = vadd.f32 %v1358_v26, %v1243_v60  ;;  %5767 = vmatmul.msk.bf16.gmra.mxu1 %vm443_vm0, %v1505_v20 }
 0x2c8   : > { %v1436_v61 = vadd.f32 %v7537_v39, %v1406_v55 }
 0x2ca   : > { %v1464_v53 = vmax.f32 %v1436_v61, 0.0 }
 0x2cb   : > { %v1245_v4 = vpop.f32.mrf.mxu3 }
 0x2cc   : > { %v1246_v11 = vadd.f32 %v1245_v4, %v7494_v15  ;;  %v7613_v10 = vpack.c.bf16 %v1464_v53, %v1463_v63 }
 0x2ce   : > { %v1407_v32 = vadd.f32 %v1361_v48, %v1246_v11  ;;  %5797 = vmatmul.msk.bf16.gmra.mxu2 %vm443_vm0, %v7613_v10 }
 0x2d0   : > { %v1437_v6 = vadd.f32 %v7537_v39, %v1407_v32 }
 0x2d2   : > { %v1465_v25 = vmax.f32 %v1437_v6, 0.0 }
 0x2d3   : > { %v1247_v56 = vpop.f32.mrf.mxu3 }
 0x2d4   : > { %v1506_v5 = vpack.c.bf16 %v1465_v25, %v1464_v53  ;;  %v1248_v23 = vadd.f32 %v1247_v56, %v7498_v35  ;;  %v1371_v35 = vpop.f32.mrf.mxu0 }
 0x2d6   : > { %v1408_v14 = vadd.f32 %v1363_v3, %v1248_v23  ;;  %5768 = vmatmul.msk.bf16.gmra.mxu1 %vm443_vm0, %v1506_v5 }
 0x2d8   : > { %v1438_v15 = vadd.f32 %v7537_v39, %v1408_v14 }
 0x2da   : > { %v1466_v24 = vmax.f32 %v1438_v15, 0.0 }
 0x2db   : > { %v1250_v30 = vpop.f32.mrf.mxu3 }
 0x2dc   : > { %v1251_v37 = vadd.f32 %v1250_v30, %v7502_v2  ;;  %v7622_v33 = vpack.c.bf16 %v1466_v24, %v1465_v25  ;;  %v6641_v2 = vld [vmem:[#allocation5 + $0x158] sm:$0xff]  ;;  %v1373_v48 = vpop.f32.mrf.mxu0 }
 0x2dd   : > { %2092 = vmatpush.bf16.msra.mxu2 %v6641_v2 }
 0x2de   : > { %v1409_v45 = vadd.f32 %v1366_v9, %v1251_v37  ;;  %5798 = vmatmul.msk.bf16.gmra.mxu2 %vm443_vm0, %v7622_v33  ;;  %v6636_v37 = vld [vmem:[#allocation5 + $0x130] sm:$0xff] }
 0x2df   : > { %2222 = vmatpush.bf16.msra.mxu3 %v6636_v37 }
 0x2e0   : > { %v1439_v34 = vadd.f32 %v7537_v39, %v1409_v45 }
 0x2e1   : > { %v1730_v28 = vpop.f32.mrf.mxu2 }
 0x2e2   : > { %v1467_v26 = vmax.f32 %v1439_v34, 0.0 }
 0x2e3   : > { %v1252_v31 = vpop.f32.mrf.mxu3  ;;  %v1593_v41 = vpop.f32.mrf.mxu1 }
 0x2e4   : > { %v1507_v43 = vpack.c.bf16 %v1467_v26, %v1466_v24  ;;  %v1253_v47 = vadd.f32 %v1252_v31, %v7507_v8  ;;  %v7628_v51 = vadd.f32 %v1730_v28, %v1593_v41  ;;  %v1376_v55 = vpop.f32.mrf.mxu0  ;;  %v6640_v31 = vld [vmem:[#allocation5 + $0x150] sm:$0xff] }
 0x2e5   : > { %2093 = vmatpush.bf16.msra.mxu2 %v6640_v31 }
 0x2e6   : > { %v1410_v12 = vadd.f32 %v1368_v36, %v1253_v47  ;;  %5769 = vmatmul.msk.bf16.gmra.mxu1 %vm443_vm0, %v1507_v43 }
 0x2e8   : > { %v1440_v50 = vadd.f32 %v7537_v39, %v1410_v12 }
 0x2e9   : > { %v1732_v49 = vpop.f32.mrf.mxu2 }
 0x2ea   : > { %v1468_v54 = vmax.f32 %v1440_v50, 0.0 }
 0x2eb   : > { %v1255_v58 = vpop.f32.mrf.mxu3  ;;  %v1595_v62 = vpop.f32.mrf.mxu1 }
 0x2ec   : > { %v1256_v40 = vadd.f32 %v1255_v58, %v7511_v17  ;;  %v7633_v52 = vadd.f32 %v1732_v49, %v1595_v62  ;;  %v7635_v8 = vpack.c.bf16 %v1468_v54, %v1467_v26  ;;  %v1378_v56 = vpop.f32.mrf.mxu0  ;;  %v6644_v26 = vld [vmem:[#allocation5 + $0x170] sm:$0xff] }
 0x2ed   : > { %2328 = vmatpush.bf16.msra.mxu0 %v6644_v26 }
 0x2ee   : > { %v1411_v3 = vadd.f32 %v1371_v35, %v1256_v40  ;;  %5799 = vmatmul.msk.bf16.gmra.mxu2 %vm443_vm0, %v7635_v8 }
 0x2f0   : > { %v1441_v63 = vadd.f32 %v7537_v39, %v1411_v3 }
 0x2f2   : > { %v1469_v1 = vmax.f32 %v1441_v63, 0.0 }
 0x2f3   : > { %v1257_v20 = vpop.f32.mrf.mxu3  ;;  %v7640_v60 = vpop.f32.mrf.mxu1 }
 0x2f4   : > { %v1508_v61 = vpack.c.bf16 %v1469_v1, %v1468_v54  ;;  %v1258_v53 = vadd.f32 %v1257_v20, %v7514_v18 }
 0x2f6   : > { %v1412_v4 = vadd.f32 %v1373_v48, %v1258_v53  ;;  %5770 = vmatmul.msk.bf16.gmra.mxu1 %vm443_vm0, %v1508_v61 }
 0x2f8   : > { %v1442_v17 = vadd.f32 %v7537_v39, %v1412_v4  ;;  %v6635_v4 = vld [vmem:[#allocation5 + $0x128] sm:$0xff] }
 0x2f9   : > { %2223 = vmatpush.bf16.msra.mxu3 %v6635_v4 }
 0x2fa   : > { %v1470_v9 = vmax.f32 %v1442_v17, 0.0 }
 0x2fb   : > { %v1260_v11 = vpop.f32.mrf.mxu3  ;;  %v7645_v32 = vpop.f32.mrf.mxu1 }
 0x2fc   : > { %v1261_v6 = vadd.f32 %v1260_v11, %v7518_v0  ;;  %v7648_v25 = vpack.c.bf16 %v1470_v9, %v1469_v1  ;;  %v1381_v0 = vpop.f32.mrf.mxu0  ;;  %v6643_v11 = vld [vmem:[#allocation5 + $0x168] sm:$0xff] }
 0x2fd   : > { %2329 = vmatpush.bf16.msra.mxu0 %v6643_v11 }
 0x2fe   : > { %v1413_v5 = vadd.f32 %v1376_v55, %v1261_v6  ;;  %5800 = vmatmul.msk.bf16.gmra.mxu2 %vm443_vm0, %v7648_v25 }
 0x300   : > { %v1443_v18 = vadd.f32 %v7537_v39, %v1413_v5  ;;  %v1735_v5 = vpop.f32.mrf.mxu2 }
 0x302   : > { %v1471_v23 = vmax.f32 %v1443_v18, 0.0 }
 0x303   : > { %v1262_v42 = vpop.f32.mrf.mxu3  ;;  %v7653_v36 = vpop.f32.mrf.mxu1 }
 0x304   : > { %v1509_v14 = vpack.c.bf16 %v1471_v23, %v1470_v9  ;;  %v1263_v15 = vadd.f32 %v1262_v42, %v7520_v19  ;;  %v1383_v43 = vpop.f32.mrf.mxu0  ;;  %v6639_v9 = vld [vmem:[#allocation5 + $0x148] sm:$0xff] }
 0x305   : > { %2094 = vmatpush.bf16.msra.mxu2 %v6639_v9 }
 0x306   : > { %v1414_v24 = vadd.f32 %v1378_v56, %v1263_v15  ;;  %5771 = vmatmul.msk.bf16.gmra.mxu1 %vm443_vm0, %v1509_v14  ;;  %v6634_v14 = vld [vmem:[#allocation5 + $0x120] sm:$0xff] }
 0x307   : > { %2224 = vmatpush.bf16.msra.mxu3 %v6634_v14 }
 0x308   : > { %v1444_v29 = vadd.f32 %v7537_v39, %v1414_v24 }
 0x30a   : > { %v1472_v30 = vmax.f32 %v1444_v29, 0.0 }
 0x30b   : > { %v1265_v45 = vpop.f32.mrf.mxu3  ;;  %v7658_v35 = vpop.f32.mrf.mxu1 }
 0x30c   : > { %v1266_v34 = vadd.f32 %v1265_v45, %v7524_v21  ;;  %v7661_v28 = vpack.c.bf16 %v1472_v30, %v1471_v23  ;;  %v1386_v3 = vpop.f32.mrf.mxu0  ;;  %v1737_v23 = vpop.f32.mrf.mxu2 }
 0x30d   : > { %v1738_v11 = vadd.f32 %v1737_v23, %v7645_v32 }
 0x30e   : > { %v1415_v41 = vadd.f32 %v1381_v0, %v1266_v34  ;;  %5801 = vmatmul.msk.bf16.gmra.mxu2 %vm443_vm0, %v7661_v28  ;;  %v6642_v0 = vld [vmem:[#allocation5 + $0x160] sm:$0xff] }
 0x30f   : > { %2330 = vmatpush.bf16.msra.mxu0 %v6642_v0 }
 0x310   : > { %v1445_v19 = vadd.f32 %v7537_v39, %v1415_v41 }
 0x312   : > { %v1473_v47 = vmax.f32 %v1445_v19, 0.0 }
 0x313   : > { %v1267_v2 = vpop.f32.mrf.mxu3  ;;  %v7666_v57 = vpop.f32.mrf.mxu1 }
 0x314   : > { %v1510_v12 = vpack.c.bf16 %v1473_v47, %v1472_v30  ;;  %v1268_v21 = vadd.f32 %v1267_v2, %v7526_v22  ;;  %v1740_v15 = vpop.f32.mrf.mxu2 }
 0x316   : > { %v1416_v50 = vadd.f32 %v1383_v43, %v1268_v21  ;;  %5772 = vmatmul.msk.bf16.gmra.mxu1 %vm443_vm0, %v1510_v12  ;;  %v6653_v43 = vld [vmem:[#allocation5 + $0x1b8] sm:$0xff]  ;;  %v7750_v12 = vld [vmem:[#allocation7 + $0x2] ss:$0 sm:$0xff] }
 0x317   : > { %v6657_v21 = vld [vmem:[#allocation5 + $0x1d8] sm:$0xff] }
 0x318   : > { %v1446_v48 = vadd.f32 %v7537_v39, %v1416_v50  ;;  %2789 = vmatpush.bf16.msrb.mxu0 %v6657_v21 }
 0x31a   : > { %v1474_v54 = vmax.f32 %v1446_v48, 0.0 }
 0x31b   : > { %v1270_v49 = vpop.f32.mrf.mxu3  ;;  %v7671_v58 = vpop.f32.mrf.mxu1 }
 0x31c   : > { %v1271_v62 = vadd.f32 %v1270_v49, %v7530_v59  ;;  %v7674_v40 = vpack.c.bf16 %v1474_v54, %v1473_v47  ;;  %v1742_v29 = vpop.f32.mrf.mxu2  ;;  %v6649_v47 = vld [vmem:[#allocation5 + $0x198] sm:$0xff] }
 0x31d   : > { %2688 = vmatpush.bf16.msrb.mxu3 %v6649_v47  ;;  %v1741_v47 = vadd.f32 %v1740_v15, %v7653_v36 }
 0x31e   : > { %v1417_v63 = vadd.f32 %v1386_v3, %v1271_v62  ;;  %5802 = vmatmul.msk.bf16.gmra.mxu2 %vm443_vm0, %v7674_v40 }
 0x320   : > { %v7679_v22 = vadd.f32 %v7537_v39, %v1417_v63  ;;  %v1736_v63 = vadd.f32 %v1735_v5, %v7640_v60 }
 0x322   : > { %v1475_v1 = vmax.f32 %v7679_v22, 0.0 }
 0x323   : > { %v7682_v20 = vpop.f32.mrf.mxu1 }
 0x324   : > { %v1511_v55 = vpack.c.bf16 %v1475_v1, %v1474_v54 }
 0x326   : > { %5773 = vmatmul.msk.bf16.gmra.mxu1 %vm443_vm0, %v1511_v55 }
 0x32b   : > { %v7687_v59 = vpop.f32.mrf.mxu1 }
 0x333   : > { %v7689_v61 = vpop.f32.mrf.mxu1 }
 0x336   : > { %5819 = vmatmul.msk.bf16.vlgmr.msra.gmra.mxu1 %vm443_vm0, %v7553_v38 }
 0x33b   : > { %v7693_v53 = vpop.f32.mrf.mxu1 }
 0x343   : > { %v7695_v17 = vpop.f32.mrf.mxu1 }
 0x346   : > { %5820 = vmatmul.msk.bf16.gmra.mxu1 %vm443_vm0, %v7564_v44 }
 0x34b   : > { %v7699_v6 = vpop.f32.mrf.mxu1 }
 0x353   : > { %v7701_v56 = vpop.f32.mrf.mxu1 }
 0x356   : > { %5821 = vmatmul.msk.bf16.gmra.mxu1 %vm443_vm0, %v7575_v13  ;;  %v6638_v13 = vld [vmem:[#allocation5 + $0x140] sm:$0xff] }
 0x357   : > { %2095 = vmatpush.bf16.msra.mxu2 %v6638_v13 }
 0x35b   : > { %v7705_v38 = vpop.f32.mrf.mxu1  ;;  %2567 = vmatpush.bf16.msrb.mxu2 %v6653_v43 }
 0x363   : > { %v7707_v18 = vpop.f32.mrf.mxu1 }
 0x366   : > { %5822 = vmatmul.msk.bf16.gmra.mxu1 %vm443_vm0, %v7586_v16  ;;  %v7723_v16 = vpop.f32.mrf.mxu2 }
 0x36b   : > { %v7711_v42 = vpop.f32.mrf.mxu1 }
 0x36e   : > { %v7727_v45 = vpop.f32.mrf.mxu2 }
 0x373   : > { %v7713_v44 = vpop.f32.mrf.mxu1 }
 0x376   : > { %5823 = vmatmul.msk.bf16.gmra.mxu1 %vm443_vm0, %v7595_v46  ;;  %v7735_v26 = vpop.f32.mrf.mxu2 }
 0x37b   : > { %v7717_v24 = vpop.f32.mrf.mxu1 }
 0x383   : > { %v7719_v30 = vpop.f32.mrf.mxu1 }
 0x386   : > { %5824 = vmatmul.msk.bf16.gmra.mxu1 %vm443_vm0, %v7604_v7  ;;  %v7741_v7 = vpop.f32.mrf.mxu2 }
 0x38b   : > { %v7725_v37 = vpop.f32.mrf.mxu1 }
 0x38e   : > { %v7745_v19 = vpop.f32.mrf.mxu2 }
 0x393   : > { %v7729_v46 = vpop.f32.mrf.mxu1 }
 0x396   : > { %5825 = vmatmul.msk.bf16.gmra.mxu1 %vm443_vm0, %v7613_v10 }
 0x39b   : > { %v7733_v34 = vpop.f32.mrf.mxu1 }
 0x3a3   : > { %v7737_v31 = vpop.f32.mrf.mxu1 }
 0x3a6   : > { %5826 = vmatmul.msk.bf16.gmra.mxu1 %vm443_vm0, %v7622_v33  ;;  %v7752_v33 = vpop.f32.mrf.mxu2 }
 0x3ab   : > { %v7743_v41 = vpop.f32.mrf.mxu1 }
 0x3ae   : > { %v7759_v4 = vpop.f32.mrf.mxu2 }
 0x3b3   : > { %v1841_v2 = vpop.f32.mrf.mxu1 }
 0x3b4   : > { %v1906_v10 = vadd.f32 %v1841_v2, %v7628_v51 }
 0x3b6   : > { %5827 = vmatmul.msk.bf16.gmra.mxu1 %vm443_vm0, %v7635_v8  ;;  %v1934_v48 = vadd.f32 %v7750_v12, %v1906_v10  ;;  %v7767_v5 = vpop.f32.mrf.mxu2 }
 0x3b8   : > { %v1960_v62 = vmax.f32 %v1934_v48, 0.0 }
 0x3bb   : > { %v1843_v50 = vpop.f32.mrf.mxu1 }
 0x3bc   : > { %v1907_v54 = vadd.f32 %v1843_v50, %v7633_v52  ;;  %v1743_v50 = vadd.f32 %v1742_v29, %v7658_v35 }
 0x3be   : > { %v1935_v49 = vadd.f32 %v7750_v12, %v1907_v54  ;;  %v7775_v23 = vpop.f32.mrf.mxu2 }
 0x3c0   : > { %v1961_v3 = vmax.f32 %v1935_v49, 0.0 }
 0x3c2   : > { %v1986_v8 = vpack.c.bf16 %v1961_v3, %v1960_v62  ;;  %v1272_v62 = vpop.f32.mrf.mxu3 }
 0x3c3   : > { %v1846_v55 = vpop.f32.mrf.mxu1  ;;  %v1273_v35 = vadd.f32 %v1272_v62, %v7532_v27  ;;  %v6656_v27 = vld [vmem:[#allocation5 + $0x1d0] sm:$0xff] }
 0x3c4   : > { %v1908_v51 = vadd.f32 %v1846_v55, %v1736_v63  ;;  %5876 = vmatmul.msk.bf16.vlgmr.msra.gmra.mxu3 %vm443_vm0, %v1986_v8  ;;  %v6652_v8 = vld [vmem:[#allocation5 + $0x1b0] sm:$0xff]  ;;  %2790 = vmatpush.bf16.msrb.mxu0 %v6656_v27  ;;  %v1763_v27 = vadd.f32 %v7767_v5, %v7699_v6 }
 0x3c5   : > { %2568 = vmatpush.bf16.msrb.mxu2 %v6652_v8 }
 0x3c6   : > { %v1936_v9 = vadd.f32 %v7750_v12, %v1908_v51  ;;  %5828 = vmatmul.msk.bf16.gmra.mxu1 %vm443_vm0, %v7648_v25  ;;  %v7782_v55 = vpop.f32.mrf.mxu2 }
 0x3c8   : > { %v1962_v52 = vmax.f32 %v1936_v9, 0.0 }
 0x3ca   : > { %v2007_v14 = vpack.c.bf16 %v1962_v52, %v1961_v3  ;;  %v1746_v3 = vadd.f32 %v7723_v16, %v7666_v57  ;;  %v1388_v57 = vpop.f32.mrf.mxu0 }
 0x3cb   : > { %v1848_v13 = vpop.f32.mrf.mxu1  ;;  %v1418_v16 = vadd.f32 %v1388_v57, %v1273_v35  ;;  %v6651_v57 = vld [vmem:[#allocation5 + $0x1a8] sm:$0xff] }
 0x3cc   : > { %v1909_v0 = vadd.f32 %v1848_v13, %v1738_v11  ;;  %5848 = vmatmul.msk.bf16.vlgmr.msra.gmra.mxu2 %vm443_vm0, %v2007_v14  ;;  %v1748_v11 = vadd.f32 %v7727_v45, %v7671_v58 }
 0x3cd   : > { %2569 = vmatpush.bf16.msrb.mxu2 %v6651_v57  ;;  %v6654_v57 = vld [vmem:[#allocation5 + $0x1c0] sm:$0xff] }
 0x3ce   : > { %v1937_v60 = vadd.f32 %v7750_v12, %v1909_v0  ;;  %v1448_v0 = vadd.f32 %v7537_v39, %v1418_v16  ;;  %v6647_v16 = vld [vmem:[#allocation5 + $0x188] sm:$0xff] }
 0x3d0   : > { %v1963_v43 = vmax.f32 %v1937_v60, 0.0 }
 0x3d2   : > { %v1987_v2 = vpack.c.bf16 %v1963_v43, %v1962_v52 }
 0x3d3   : > { %v1851_v10 = vpop.f32.mrf.mxu1 }
 0x3d4   : > { %v1910_v21 = vadd.f32 %v1851_v10, %v1741_v47  ;;  %5877 = vmatmul.msk.bf16.gmra.mxu3 %vm443_vm0, %v1987_v2  ;;  %5904 = vmatmul.msk.bf16.vlgmr.msra.gmra.mxu0 %vm443_vm0, %v1987_v2  ;;  %v1751_v10 = vadd.f32 %v7735_v26, %v7682_v20  ;;  %v1753_v20 = vadd.f32 %v7741_v7, %v7687_v59 }
 0x3d6   : > { %v1938_v32 = vadd.f32 %v7750_v12, %v1910_v21  ;;  %5829 = vmatmul.msk.bf16.gmra.mxu1 %vm443_vm0, %v7661_v28  ;;  %v6648_v28 = vld [vmem:[#allocation5 + $0x190] sm:$0xff] }
 0x3d7   : > { %2689 = vmatpush.bf16.msrb.mxu3 %v6648_v28 }
 0x3d8   : > { %v1964_v25 = vmax.f32 %v1938_v32, 0.0 }
 0x3da   : > { %v2008_v48 = vpack.c.bf16 %v1964_v25, %v1963_v43  ;;  %v7794_v43 = vpop.f32.mrf.mxu2 }
 0x3db   : > { %v1853_v54 = vpop.f32.mrf.mxu1  ;;  %2690 = vmatpush.bf16.msrb.mxu3 %v6647_v16 }
 0x3dc   : > { %v1911_v36 = vadd.f32 %v1853_v54, %v1743_v50  ;;  %5849 = vmatmul.msk.bf16.gmra.mxu2 %vm443_vm0, %v2008_v48 }
 0x3de   : > { %v1939_v15 = vadd.f32 %v7750_v12, %v1911_v36 }
 0x3e0   : > { %v1965_v49 = vmax.f32 %v1939_v15, 0.0 }
 0x3e2   : > { %v1988_v63 = vpack.c.bf16 %v1965_v49, %v1964_v25  ;;  %v7805_v25 = vpop.f32.mrf.mxu2 }
 0x3e3   : > { %v1856_v51 = vpop.f32.mrf.mxu1 }
 0x3e4   : > { %v1912_v29 = vadd.f32 %v1856_v51, %v1746_v3  ;;  %5878 = vmatmul.msk.bf16.gmra.mxu3 %vm443_vm0, %v1988_v63  ;;  %5905 = vmatmul.msk.bf16.gmra.mxu0 %vm443_vm0, %v1988_v63  ;;  %v1758_v63 = vadd.f32 %v7752_v33, %v7693_v53 }
 0x3e6   : > { %v1940_v9 = vadd.f32 %v7750_v12, %v1912_v29  ;;  %5830 = vmatmul.msk.bf16.gmra.mxu1 %vm443_vm0, %v7674_v40  ;;  %v1476_v40 = vmax.f32 %v1448_v0, 0.0  ;;  %v1761_v29 = vadd.f32 %v7759_v4, %v7695_v17  ;;  %v6655_v4 = vld [vmem:[#allocation5 + $0x1c8] sm:$0xff] }
 0x3e7   : > { %2791 = vmatpush.bf16.msrb.mxu0 %v6655_v4 }
 0x3e8   : > { %v1966_v52 = vmax.f32 %v1940_v9, 0.0  ;;  %v1795_v39 = vpack.c.bf16 %v1476_v40, %v1475_v1  ;;  %v1756_v1 = vadd.f32 %v7745_v19, %v7689_v61 }
 0x3ea   : > { %v2009_v14 = vpack.c.bf16 %v1966_v52, %v1965_v49  ;;  %v7811_v22 = vpop.f32.mrf.mxu2 }
 0x3eb   : > { %v1858_v13 = vpop.f32.mrf.mxu1  ;;  %2792 = vmatpush.bf16.msrb.mxu0 %v6654_v57 }
 0x3ec   : > { %v1913_v60 = vadd.f32 %v1858_v13, %v1748_v11  ;;  %5850 = vmatmul.msk.bf16.gmra.mxu2 %vm443_vm0, %v2009_v14 }
 0x3ee   : > { %v1941_v47 = vadd.f32 %v7750_v12, %v1913_v60 }
 0x3f0   : > { %v1967_v2 = vmax.f32 %v1941_v47, 0.0 }
 0x3f2   : > { %v1989_v21 = vpack.c.bf16 %v1967_v2, %v1966_v52  ;;  %v7820_v28 = vpop.f32.mrf.mxu2 }
 0x3f3   : > { %v1861_v58 = vpop.f32.mrf.mxu1 }
 0x3f4   : > { %v1914_v45 = vadd.f32 %v1861_v58, %v1751_v10  ;;  %5879 = vmatmul.msk.bf16.gmra.mxu3 %vm443_vm0, %v1989_v21  ;;  %5906 = vmatmul.msk.bf16.gmra.mxu0 %vm443_vm0, %v1989_v21 }
 0x3f6   : > { %v1942_v32 = vadd.f32 %v7750_v12, %v1914_v45  ;;  %5831 = vmatmul.msk.bf16.gmra.mxu1 %vm443_vm0, %v1795_v39  ;;  %v1768_v39 = vadd.f32 %v7782_v55, %v7705_v38 }
 0x3f8   : > { %v1968_v50 = vmax.f32 %v1942_v32, 0.0 }
 0x3fa   : > { %v2010_v26 = vpack.c.bf16 %v1968_v50, %v1967_v2  ;;  %v7828_v53 = vpop.f32.mrf.mxu2  ;;  %v1766_v2 = vadd.f32 %v7775_v23, %v7701_v56 }
 0x3fb   : > { %v1863_v48 = vpop.f32.mrf.mxu1  ;;  %v1781_v4 = vadd.f32 %v7828_v53, %v7719_v30 }
 0x3fc   : > { %v1915_v54 = vadd.f32 %v1863_v48, %v1753_v20  ;;  %5851 = vmatmul.msk.bf16.gmra.mxu2 %vm443_vm0, %v2010_v26  ;;  %v1771_v26 = vadd.f32 %v7794_v43, %v7707_v18 }
 0x3fe   : > { %v1943_v36 = vadd.f32 %v7750_v12, %v1915_v54 }
 0x400   : > { %v1969_v15 = vmax.f32 %v1943_v36, 0.0 }
 0x402   : > { %v1990_v49 = vpack.c.bf16 %v1969_v15, %v1968_v50  ;;  %v7835_v47 = vpop.f32.mrf.mxu2 }
 0x403   : > { %v1866_v62 = vpop.f32.mrf.mxu1 }
 0x404   : > { %v1916_v3 = vadd.f32 %v1866_v62, %v1756_v1  ;;  %5880 = vmatmul.msk.bf16.gmra.mxu3 %vm443_vm0, %v1990_v49  ;;  %5907 = vmatmul.msk.bf16.gmra.mxu0 %vm443_vm0, %v1990_v49  ;;  %v1773_v1 = vadd.f32 %v7805_v25, %v7711_v42 }
 0x406   : > { %v1944_v59 = vadd.f32 %v7750_v12, %v1916_v3 }
 0x408   : > { %v1970_v7 = vmax.f32 %v1944_v59, 0.0 }
 0x40a   : > { %v2011_v8 = vpack.c.bf16 %v1970_v7, %v1969_v15  ;;  %v7842_v45 = vpop.f32.mrf.mxu2 }
 0x40b   : > { %v1868_v51 = vpop.f32.mrf.mxu1 }
 0x40c   : > { %v1917_v35 = vadd.f32 %v1868_v51, %v1758_v63  ;;  %5852 = vmatmul.msk.bf16.gmra.mxu2 %vm443_vm0, %v2011_v8  ;;  %v1776_v63 = vadd.f32 %v7811_v22, %v7713_v44  ;;  %v6650_v51 = vld [vmem:[#allocation5 + $0x1a0] sm:$0xff]  ;;  %v1778_v44 = vadd.f32 %v7820_v28, %v7717_v24 }
 0x40d   : > { %2570 = vmatpush.bf16.msrb.mxu2 %v6650_v51 }
 0x40e   : > { %v1945_v61 = vadd.f32 %v7750_v12, %v1917_v35  ;;  %v6646_v35 = vld [vmem:[#allocation5 + $0x180] sm:$0xff] }
 0x40f   : > { %2691 = vmatpush.bf16.msrb.mxu3 %v6646_v35 }
 0x410   : > { %v1971_v19 = vmax.f32 %v1945_v61, 0.0 }
 0x412   : > { %v1991_v9 = vpack.c.bf16 %v1971_v19, %v1970_v7  ;;  %v7850_v54 = vpop.f32.mrf.mxu2  ;;  %v6665_v7 = vld [vmem:[#allocation5 + $0x218] sm:$0xff] }
 0x413   : > { %v1871_v52 = vpop.f32.mrf.mxu1  ;;  %3013 = vmatpush.bf16.msrb.mxu1 %v6665_v7 }
 0x414   : > { %v1918_v11 = vadd.f32 %v1871_v52, %v1761_v29  ;;  %5881 = vmatmul.msk.bf16.gmra.mxu3 %vm443_vm0, %v1991_v9  ;;  %5908 = vmatmul.msk.bf16.gmra.mxu0 %vm443_vm0, %v1991_v9 }
 0x416   : > { %v1946_v33 = vadd.f32 %v7750_v12, %v1918_v11 }
 0x418   : > { %v1972_v14 = vmax.f32 %v1946_v33, 0.0 }
 0x41a   : > { %v2012_v17 = vpack.c.bf16 %v1972_v14, %v1971_v19  ;;  %v7858_v18 = vpop.f32.mrf.mxu2 }
 0x41b   : > { %v1873_v13 = vpop.f32.mrf.mxu1  ;;  %v1791_v7 = vadd.f32 %v7858_v18, %v7737_v31 }
 0x41c   : > { %v1919_v0 = vadd.f32 %v1873_v13, %v1763_v27  ;;  %5853 = vmatmul.msk.bf16.gmra.mxu2 %vm443_vm0, %v2012_v17 }
 0x41e   : > { %v1947_v60 = vadd.f32 %v7750_v12, %v1919_v0 }
 0x420   : > { %v1973_v40 = vmax.f32 %v1947_v60, 0.0 }
 0x422   : > { %v1992_v10 = vpack.c.bf16 %v1973_v40, %v1972_v14  ;;  %v7866_v19 = vpop.f32.mrf.mxu2 }
 0x423   : > { %v1876_v21 = vpop.f32.mrf.mxu1  ;;  %v1793_v18 = vadd.f32 %v7866_v19, %v7743_v41 }
 0x424   : > { %v1920_v58 = vadd.f32 %v1876_v21, %v1766_v2  ;;  %5882 = vmatmul.msk.bf16.gmra.mxu3 %vm443_vm0, %v1992_v10  ;;  %5909 = vmatmul.msk.bf16.gmra.mxu0 %vm443_vm0, %v1992_v10  ;;  %v1783_v21 = vadd.f32 %v7835_v47, %v7725_v37 }
 0x426   : > { %v1948_v6 = vadd.f32 %v7750_v12, %v1920_v58 }
 0x428   : > { %v1974_v5 = vmax.f32 %v1948_v6, 0.0 }
 0x42a   : > { %v2013_v32 = vpack.c.bf16 %v1974_v5, %v1973_v40 }
 0x42b   : > { %v1878_v50 = vpop.f32.mrf.mxu1 }
 0x42c   : > { %v1921_v20 = vadd.f32 %v1878_v50, %v1768_v39  ;;  %5854 = vmatmul.msk.bf16.gmra.mxu2 %vm443_vm0, %v2013_v32 }
 0x42e   : > { %v1949_v56 = vadd.f32 %v7750_v12, %v1921_v20  ;;  %v1786_v20 = vadd.f32 %v7842_v45, %v7729_v46 }
 0x430   : > { %v1975_v23 = vmax.f32 %v1949_v56, 0.0 }
 0x432   : > { %v1993_v48 = vpack.c.bf16 %v1975_v23, %v1974_v5 }
 0x433   : > { %v1881_v36 = vpop.f32.mrf.mxu1 }
 0x434   : > { %v1922_v15 = vadd.f32 %v1881_v36, %v1771_v26  ;;  %5883 = vmatmul.msk.bf16.gmra.mxu3 %vm443_vm0, %v1993_v48  ;;  %5910 = vmatmul.msk.bf16.gmra.mxu0 %vm443_vm0, %v1993_v48 }
 0x436   : > { %v1950_v38 = vadd.f32 %v7750_v12, %v1922_v15 }
 0x438   : > { %v1976_v55 = vmax.f32 %v1950_v38, 0.0  ;;  %v1788_v38 = vadd.f32 %v7850_v54, %v7733_v34 }
 0x43a   : > { %v2014_v49 = vpack.c.bf16 %v1976_v55, %v1975_v23 }
 0x43b   : > { %v1883_v62 = vpop.f32.mrf.mxu1 }
 0x43c   : > { %v1923_v3 = vadd.f32 %v1883_v62, %v1773_v1  ;;  %5855 = vmatmul.msk.bf16.gmra.mxu2 %vm443_vm0, %v2014_v49 }
 0x43e   : > { %v1951_v43 = vadd.f32 %v7750_v12, %v1923_v3 }
 0x440   : > { %v1977_v59 = vmax.f32 %v1951_v43, 0.0  ;;  %v6664_v43 = vld [vmem:[#allocation5 + $0x210] sm:$0xff] }
 0x441   : > { %3014 = vmatpush.bf16.msrb.mxu1 %v6664_v43 }
 0x442   : > { %v1994_v8 = vpack.c.bf16 %v1977_v59, %v1976_v55 }
 0x443   : > { %v1886_v61 = vpop.f32.mrf.mxu1 }
 0x444   : > { %v1924_v42 = vadd.f32 %v1886_v61, %v1776_v63  ;;  %5884 = vmatmul.msk.bf16.gmra.mxu3 %vm443_vm0, %v1994_v8  ;;  %5911 = vmatmul.msk.bf16.gmra.mxu0 %vm443_vm0, %v1994_v8 }
 0x446   : > { %v1952_v25 = vadd.f32 %v7750_v12, %v1924_v42 }
 0x447   : > { %v2226_v29 = vpop.f32.mrf.mxu3 }
 0x448   : > { %v1978_v9 = vmax.f32 %v1952_v25, 0.0 }
 0x44a   : > { %v2015_v22 = vpack.c.bf16 %v1978_v9, %v1977_v59 }
 0x44b   : > { %v1888_v16 = vpop.f32.mrf.mxu1 }
 0x44c   : > { %v1925_v52 = vadd.f32 %v1888_v16, %v1778_v44  ;;  %5856 = vmatmul.msk.bf16.gmra.mxu2 %vm443_vm0, %v2015_v22  ;;  %v7895_v44 = vld [vmem:[#allocation7 + $0x3] ss:$0 sm:$0xff] }
 0x44e   : > { %v1953_v11 = vadd.f32 %v7750_v12, %v1925_v52 }
 0x44f   : > { %v2097_v33 = vpop.f32.mrf.mxu2  ;;  %v2228_v14 = vpop.f32.mrf.mxu3 }
 0x450   : > { %v1979_v27 = vmax.f32 %v1953_v11, 0.0  ;;  %v2227_v34 = vadd.f32 %v2226_v29, %v2097_v33 }
 0x451   : > { %v2332_v17 = vpop.f32.mrf.mxu0 }
 0x452   : > { %v1995_v13 = vpack.c.bf16 %v1979_v27, %v1978_v9  ;;  %v2392_v9 = vadd.f32 %v2332_v17, %v2227_v34 }
 0x453   : > { %v1891_v0 = vpop.f32.mrf.mxu1 }
 0x454   : > { %v1926_v60 = vadd.f32 %v1891_v0, %v1781_v4  ;;  %5885 = vmatmul.msk.bf16.gmra.mxu3 %vm443_vm0, %v1995_v13  ;;  %5912 = vmatmul.msk.bf16.gmra.mxu0 %vm443_vm0, %v1995_v13  ;;  %v2418_v11 = vadd.f32 %v7895_v44, %v2392_v9 }
 0x456   : > { %v1954_v24 = vadd.f32 %v7750_v12, %v1926_v60  ;;  %v2442_v0 = vmax.f32 %v2418_v11, 0.0 }
 0x457   : > { %v2099_v28 = vpop.f32.mrf.mxu2  ;;  %v2231_v40 = vpop.f32.mrf.mxu3 }
 0x458   : > { %v1980_v2 = vmax.f32 %v1954_v24, 0.0  ;;  %v2229_v63 = vadd.f32 %v2228_v14, %v2099_v28 }
 0x459   : > { %v2334_v10 = vpop.f32.mrf.mxu0 }
 0x45a   : > { %v2016_v58 = vpack.c.bf16 %v1980_v2, %v1979_v27  ;;  %v2393_v35 = vadd.f32 %v2334_v10, %v2229_v63 }
 0x45b   : > { %v1893_v6 = vpop.f32.mrf.mxu1 }
 0x45c   : > { %v1927_v5 = vadd.f32 %v1893_v6, %v1783_v21  ;;  %5857 = vmatmul.msk.bf16.gmra.mxu2 %vm443_vm0, %v2016_v58  ;;  %v2419_v29 = vadd.f32 %v7895_v44, %v2393_v35 }
 0x45e   : > { %v1955_v30 = vadd.f32 %v7750_v12, %v1927_v5  ;;  %v2443_v14 = vmax.f32 %v2419_v29, 0.0 }
 0x45f   : > { %v2102_v53 = vpop.f32.mrf.mxu2  ;;  %v2233_v39 = vpop.f32.mrf.mxu3 }
 0x460   : > { %v1981_v32 = vmax.f32 %v1955_v30, 0.0  ;;  %v2232_v57 = vadd.f32 %v2231_v40, %v2102_v53  ;;  %v2466_v41 = vpack.c.bf16 %v2443_v14, %v2442_v0 }
 0x461   : > { %v2337_v50 = vpop.f32.mrf.mxu0 }
 0x462   : > { %v1996_v56 = vpack.c.bf16 %v1981_v32, %v1980_v2  ;;  %v2394_v27 = vadd.f32 %v2337_v50, %v2232_v57 }
 0x463   : > { %v1896_v23 = vpop.f32.mrf.mxu1 }
 0x464   : > { %v1928_v26 = vadd.f32 %v1896_v23, %v1786_v20  ;;  %5886 = vmatmul.msk.bf16.gmra.mxu3 %vm443_vm0, %v1996_v56  ;;  %5913 = vmatmul.msk.bf16.gmra.mxu0 %vm443_vm0, %v1996_v56  ;;  %v2420_v19 = vadd.f32 %v7895_v44, %v2394_v27 }
 0x466   : > { %v1956_v37 = vadd.f32 %v7750_v12, %v1928_v26  ;;  %v2444_v2 = vmax.f32 %v2420_v19, 0.0 }
 0x467   : > { %v2104_v47 = vpop.f32.mrf.mxu2  ;;  %v2236_v48 = vpop.f32.mrf.mxu3 }
 0x468   : > { %v1982_v36 = vmax.f32 %v1956_v37, 0.0  ;;  %v2234_v28 = vadd.f32 %v2233_v39, %v2104_v47 }
 0x469   : > { %v2339_v15 = vpop.f32.mrf.mxu0 }
 0x46a   : > { %v2017_v55 = vpack.c.bf16 %v1982_v36, %v1981_v32  ;;  %v2395_v10 = vadd.f32 %v2339_v15, %v2234_v28 }
 0x46b   : > { %v1898_v1 = vpop.f32.mrf.mxu1 }
 0x46c   : > { %v1929_v49 = vadd.f32 %v1898_v1, %v1788_v38  ;;  %5858 = vmatmul.msk.bf16.gmra.mxu2 %vm443_vm0, %v2017_v55  ;;  %v2421_v5 = vadd.f32 %v7895_v44, %v2395_v10 }
 0x46e   : > { %v1957_v46 = vadd.f32 %v7750_v12, %v1929_v49  ;;  %v2445_v53 = vmax.f32 %v2421_v5, 0.0 }
 0x46f   : > { %v2107_v45 = vpop.f32.mrf.mxu2  ;;  %v2238_v62 = vpop.f32.mrf.mxu3 }
 0x470   : > { %v1983_v3 = vmax.f32 %v1957_v46, 0.0  ;;  %v2237_v30 = vadd.f32 %v2236_v48, %v2107_v45  ;;  %v2467_v56 = vpack.c.bf16 %v2445_v53, %v2444_v2 }
 0x471   : > { %v2342_v59 = vpop.f32.mrf.mxu0 }
 0x472   : > { %v1997_v8 = vpack.c.bf16 %v1983_v3, %v1982_v36  ;;  %v2396_v32 = vadd.f32 %v2342_v59, %v2237_v30 }
 0x473   : > { %v1901_v51 = vpop.f32.mrf.mxu1 }
 0x474   : > { %v1930_v54 = vadd.f32 %v1901_v51, %v1791_v7  ;;  %5887 = vmatmul.msk.bf16.gmra.mxu3 %vm443_vm0, %v1997_v8  ;;  %5914 = vmatmul.msk.bf16.gmra.mxu0 %vm443_vm0, %v1997_v8  ;;  %v2422_v23 = vadd.f32 %v7895_v44, %v2396_v32 }
 0x476   : > { %v1958_v61 = vadd.f32 %v7750_v12, %v1930_v54  ;;  %v2446_v37 = vmax.f32 %v2422_v23, 0.0  ;;  %v6663_v54 = vld [vmem:[#allocation5 + $0x208] sm:$0xff] }
 0x477   : > { %v2109_v42 = vpop.f32.mrf.mxu2  ;;  %v2241_v25 = vpop.f32.mrf.mxu3  ;;  %3015 = vmatpush.bf16.msrb.mxu1 %v6663_v54 }
 0x478   : > { %v1984_v22 = vmax.f32 %v1958_v61, 0.0  ;;  %v2239_v26 = vadd.f32 %v2238_v62, %v2109_v42  ;;  %v2487_v38 = vpack.c.bf16 %v2446_v37, %v2445_v53 }
 0x479   : > { %v2344_v31 = vpop.f32.mrf.mxu0 }
 0x47a   : > { %v2018_v16 = vpack.c.bf16 %v1984_v22, %v1983_v3  ;;  %v2397_v47 = vadd.f32 %v2344_v31, %v2239_v26 }
 0x47b   : > { %v1903_v52 = vpop.f32.mrf.mxu1 }
 0x47c   : > { %v1931_v33 = vadd.f32 %v1903_v52, %v1793_v18  ;;  %5859 = vmatmul.msk.bf16.gmra.mxu2 %vm443_vm0, %v2018_v16  ;;  %v2423_v55 = vadd.f32 %v7895_v44, %v2397_v47 }
 0x47e   : > { %v1959_v17 = vadd.f32 %v7750_v12, %v1931_v33  ;;  %v2486_v12 = vpack.c.bf16 %v2444_v2, %v2443_v14  ;;  %v2447_v49 = vmax.f32 %v2423_v55, 0.0  ;;  %v6662_v55 = vld [vmem:[#allocation5 + $0x200] sm:$0xff] }
 0x47f   : > { %v2112_v4 = vpop.f32.mrf.mxu2  ;;  %v2243_v13 = vpop.f32.mrf.mxu3  ;;  %3016 = vmatpush.bf16.msrb.mxu1 %v6662_v55 }
 0x480   : > { %v1985_v60 = vmax.f32 %v1959_v17, 0.0  ;;  %v2242_v1 = vadd.f32 %v2241_v25, %v2112_v4  ;;  %v2468_v43 = vpack.c.bf16 %v2447_v49, %v2446_v37 }
 0x481   : > { %v2347_v24 = vpop.f32.mrf.mxu0 }
 0x482   : > { %v2286_v40 = vpack.c.bf16 %v1985_v60, %v1984_v22  ;;  %v2398_v46 = vadd.f32 %v2347_v24, %v2242_v1 }
 0x484   : > { %5915 = vmatmul.msk.bf16.gmra.mxu0 %vm443_vm0, %v2286_v40  ;;  %5959 = vmatmul.msk.bf16.vlgmr.msrb.gmra.mxu3 %vm443_vm0, %v2466_v41  ;;  %v2424_v59 = vadd.f32 %v7895_v44, %v2398_v46 }
 0x486   : > { %v2448_v63 = vmax.f32 %v2424_v59, 0.0 }
 0x487   : > { %v2114_v21 = vpop.f32.mrf.mxu2  ;;  %v2246_v58 = vpop.f32.mrf.mxu3 }
 0x488   : > { %v2244_v7 = vadd.f32 %v2243_v13, %v2114_v21  ;;  %v2488_v61 = vpack.c.bf16 %v2448_v63, %v2447_v49 }
 0x489   : > { %v2349_v6 = vpop.f32.mrf.mxu0 }
 0x48a   : > { %v2399_v8 = vadd.f32 %v2349_v6, %v2244_v7 }
 0x48c   : > { %5932 = vmatmul.msk.bf16.vlgmr.msrb.gmra.mxu2 %vm443_vm0, %v2486_v12  ;;  %v2425_v42 = vadd.f32 %v7895_v44, %v2399_v8 }
 0x48e   : > { %v2449_v9 = vmax.f32 %v2425_v42, 0.0 }
 0x48f   : > { %v2117_v50 = vpop.f32.mrf.mxu2  ;;  %v2248_v39 = vpop.f32.mrf.mxu3 }
 0x490   : > { %v2247_v25 = vadd.f32 %v2246_v58, %v2117_v50  ;;  %v2469_v57 = vpack.c.bf16 %v2449_v9, %v2448_v63 }
 0x491   : > { %v2352_v20 = vpop.f32.mrf.mxu0 }
 0x492   : > { %v2400_v22 = vadd.f32 %v2352_v20, %v2247_v25 }
 0x494   : > { %5960 = vmatmul.msk.bf16.gmra.mxu3 %vm443_vm0, %v2467_v56  ;;  %5986 = vmatmul.msk.bf16.vlgmr.msrb.gmra.mxu0 %vm443_vm0, %v2467_v56  ;;  %v2426_v16 = vadd.f32 %v7895_v44, %v2400_v22 }
 0x496   : > { %v2450_v11 = vmax.f32 %v2426_v16, 0.0 }
 0x497   : > { %v2119_v36 = vpop.f32.mrf.mxu2  ;;  %v2251_v15 = vpop.f32.mrf.mxu3 }
 0x498   : > { %v2249_v52 = vadd.f32 %v2248_v39, %v2119_v36  ;;  %v2489_v4 = vpack.c.bf16 %v2450_v11, %v2449_v9 }
 0x499   : > { %v2354_v48 = vpop.f32.mrf.mxu0 }
 0x49a   : > { %v2401_v33 = vadd.f32 %v2354_v48, %v2249_v52 }
 0x49c   : > { %5933 = vmatmul.msk.bf16.gmra.mxu2 %vm443_vm0, %v2487_v38  ;;  %v2427_v13 = vadd.f32 %v7895_v44, %v2401_v33 }
 0x49e   : > { %v2451_v60 = vmax.f32 %v2427_v13, 0.0 }
 0x49f   : > { %v2122_v45 = vpop.f32.mrf.mxu2  ;;  %v2253_v3 = vpop.f32.mrf.mxu3 }
 0x4a0   : > { %v2252_v0 = vadd.f32 %v2251_v15, %v2122_v45  ;;  %v2470_v40 = vpack.c.bf16 %v2451_v60, %v2450_v11 }
 0x4a1   : > { %v2357_v62 = vpop.f32.mrf.mxu0 }
 0x4a2   : > { %v2402_v24 = vadd.f32 %v2357_v62, %v2252_v0 }
 0x4a4   : > { %5961 = vmatmul.msk.bf16.gmra.mxu3 %vm443_vm0, %v2468_v43  ;;  %5987 = vmatmul.msk.bf16.gmra.mxu0 %vm443_vm0, %v2468_v43  ;;  %v2428_v2 = vadd.f32 %v7895_v44, %v2402_v24 }
 0x4a6   : > { %v2452_v21 = vmax.f32 %v2428_v2, 0.0 }
 0x4a7   : > { %v2124_v51 = vpop.f32.mrf.mxu2  ;;  %v2256_v34 = vpop.f32.mrf.mxu3 }
 0x4a8   : > { %v2254_v10 = vadd.f32 %v2253_v3, %v2124_v51  ;;  %v2490_v30 = vpack.c.bf16 %v2452_v21, %v2451_v60 }
 0x4a9   : > { %v2359_v35 = vpop.f32.mrf.mxu0 }
 0x4aa   : > { %v2403_v58 = vadd.f32 %v2359_v35, %v2254_v10 }
 0x4ac   : > { %5934 = vmatmul.msk.bf16.gmra.mxu2 %vm443_vm0, %v2488_v61  ;;  %v2429_v53 = vadd.f32 %v7895_v44, %v2403_v58 }
 0x4ae   : > { %v2453_v50 = vmax.f32 %v2429_v53, 0.0 }
 0x4af   : > { %v2127_v31 = vpop.f32.mrf.mxu2  ;;  %v2258_v18 = vpop.f32.mrf.mxu3 }
 0x4b0   : > { %v2257_v32 = vadd.f32 %v2256_v34, %v2127_v31  ;;  %v2471_v26 = vpack.c.bf16 %v2453_v50, %v2452_v21 }
 0x4b1   : > { %v2362_v29 = vpop.f32.mrf.mxu0 }
 0x4b2   : > { %v2404_v39 = vadd.f32 %v2362_v29, %v2257_v32 }
 0x4b4   : > { %5962 = vmatmul.msk.bf16.gmra.mxu3 %vm443_vm0, %v2469_v57  ;;  %5988 = vmatmul.msk.bf16.gmra.mxu0 %vm443_vm0, %v2469_v57  ;;  %v2430_v37 = vadd.f32 %v7895_v44, %v2404_v39 }
 0x4b6   : > { %v2454_v36 = vmax.f32 %v2430_v37, 0.0 }
 0x4b7   : > { %v2129_v14 = vpop.f32.mrf.mxu2  ;;  %v2261_v27 = vpop.f32.mrf.mxu3 }
 0x4b8   : > { %v2259_v47 = vadd.f32 %v2258_v18, %v2129_v14  ;;  %v2491_v49 = vpack.c.bf16 %v2454_v36, %v2453_v50 }
 0x4b9   : > { %v2364_v17 = vpop.f32.mrf.mxu0 }
 0x4ba   : > { %v2405_v15 = vadd.f32 %v2364_v17, %v2259_v47  ;;  %v6669_v17 = vld [vmem:[#allocation5 + $0x238] sm:$0xff]  ;;  %v6668_v47 = vld [vmem:[#allocation5 + $0x230] sm:$0xff] }
 0x4bb   : > { %3222 = vmatpush.bf16.msra.mxu2 %v6669_v17 }
 0x4bc   : > { %5935 = vmatmul.msk.bf16.gmra.mxu2 %vm443_vm0, %v2489_v4  ;;  %v2431_v46 = vadd.f32 %v7895_v44, %v2405_v15  ;;  %v6661_v15 = vld [vmem:[#allocation5 + $0x1f8] sm:$0xff] }
 0x4bd   : > { %3126 = vmatpush.bf16.msra.mxu1 %v6661_v15 }
 0x4be   : > { %v2455_v3 = vmax.f32 %v2431_v46, 0.0  ;;  %v6667_v46 = vld [vmem:[#allocation5 + $0x228] sm:$0xff] }
 0x4bf   : > { %v2132_v41 = vpop.f32.mrf.mxu2  ;;  %v2263_v19 = vpop.f32.mrf.mxu3  ;;  %3223 = vmatpush.bf16.msra.mxu2 %v6668_v47 }
 0x4c0   : > { %v2262_v45 = vadd.f32 %v2261_v27, %v2132_v41  ;;  %v2472_v63 = vpack.c.bf16 %v2455_v3, %v2454_v36 }
 0x4c1   : > { %v2367_v28 = vpop.f32.mrf.mxu0 }
 0x4c2   : > { %v2406_v62 = vadd.f32 %v2367_v28, %v2262_v45 }
 0x4c3   : > { %3224 = vmatpush.bf16.msra.mxu2 %v6667_v46 }
 0x4c4   : > { %5963 = vmatmul.msk.bf16.gmra.mxu3 %vm443_vm0, %v2470_v40  ;;  %5989 = vmatmul.msk.bf16.gmra.mxu0 %vm443_vm0, %v2470_v40  ;;  %v2432_v8 = vadd.f32 %v7895_v44, %v2406_v62  ;;  %v7951_v62 = vld [vmem:[#allocation7 + $0x4] ss:$0 sm:$0xff] }
 0x4c6   : > { %v2456_v34 = vmax.f32 %v2432_v8, 0.0 }
 0x4c7   : > { %v2134_v6 = vpop.f32.mrf.mxu2  ;;  %v2266_v12 = vpop.f32.mrf.mxu3 }
 0x4c8   : > { %v2264_v51 = vadd.f32 %v2263_v19, %v2134_v6  ;;  %v2492_v25 = vpack.c.bf16 %v2456_v34, %v2455_v3 }
 0x4c9   : > { %v2369_v5 = vpop.f32.mrf.mxu0 }
 0x4ca   : > { %v2407_v54 = vadd.f32 %v2369_v5, %v2264_v51 }
 0x4cc   : > { %5936 = vmatmul.msk.bf16.gmra.mxu2 %vm443_vm0, %v2490_v30  ;;  %v2433_v9 = vadd.f32 %v7895_v44, %v2407_v54 }
 0x4ce   : > { %v2457_v31 = vmax.f32 %v2433_v9, 0.0 }
 0x4cf   : > { %v2137_v20 = vpop.f32.mrf.mxu2  ;;  %v2268_v56 = vpop.f32.mrf.mxu3 }
 0x4d0   : > { %v2267_v22 = vadd.f32 %v2266_v12, %v2137_v20  ;;  %v2473_v52 = vpack.c.bf16 %v2457_v31, %v2456_v34 }
 0x4d1   : > { %v2372_v23 = vpop.f32.mrf.mxu0 }
 0x4d2   : > { %v2408_v18 = vadd.f32 %v2372_v23, %v2267_v22 }
 0x4d4   : > { %5964 = vmatmul.msk.bf16.gmra.mxu3 %vm443_vm0, %v2471_v26  ;;  %5990 = vmatmul.msk.bf16.gmra.mxu0 %vm443_vm0, %v2471_v26  ;;  %v2434_v11 = vadd.f32 %v7895_v44, %v2408_v18 }
 0x4d6   : > { %v2458_v14 = vmax.f32 %v2434_v11, 0.0 }
 0x4d7   : > { %v2139_v48 = vpop.f32.mrf.mxu2  ;;  %v2271_v38 = vpop.f32.mrf.mxu3 }
 0x4d8   : > { %v2269_v33 = vadd.f32 %v2268_v56, %v2139_v48  ;;  %v2493_v60 = vpack.c.bf16 %v2458_v14, %v2457_v31 }
 0x4d9   : > { %v2374_v1 = vpop.f32.mrf.mxu0 }
 0x4da   : > { %v2409_v27 = vadd.f32 %v2374_v1, %v2269_v33 }
 0x4dc   : > { %5937 = vmatmul.msk.bf16.gmra.mxu2 %vm443_vm0, %v2491_v49  ;;  %v2435_v24 = vadd.f32 %v7895_v44, %v2409_v27 }
 0x4de   : > { %v2459_v19 = vmax.f32 %v2435_v24, 0.0 }
 0x4df   : > { %v2142_v43 = vpop.f32.mrf.mxu2  ;;  %v2273_v59 = vpop.f32.mrf.mxu3 }
 0x4e0   : > { %v2272_v41 = vadd.f32 %v2271_v38, %v2142_v43  ;;  %v2474_v21 = vpack.c.bf16 %v2459_v19, %v2458_v14 }
 0x4e1   : > { %v2377_v7 = vpop.f32.mrf.mxu0 }
 0x4e2   : > { %v2410_v28 = vadd.f32 %v2377_v7, %v2272_v41  ;;  %v6666_v7 = vld [vmem:[#allocation5 + $0x220] sm:$0xff] }
 0x4e3   : > { %3225 = vmatpush.bf16.msra.mxu2 %v6666_v7 }
 0x4e4   : > { %5965 = vmatmul.msk.bf16.gmra.mxu3 %vm443_vm0, %v2472_v63  ;;  %5991 = vmatmul.msk.bf16.gmra.mxu0 %vm443_vm0, %v2472_v63  ;;  %v2436_v58 = vadd.f32 %v7895_v44, %v2410_v28 }
 0x4e6   : > { %v2460_v12 = vmax.f32 %v2436_v58, 0.0 }
 0x4e7   : > { %v2144_v35 = vpop.f32.mrf.mxu2  ;;  %v2276_v61 = vpop.f32.mrf.mxu3 }
 0x4e8   : > { %v2274_v6 = vadd.f32 %v2273_v59, %v2144_v35  ;;  %v2494_v39 = vpack.c.bf16 %v2460_v12, %v2459_v19 }
 0x4e9   : > { %v2379_v42 = vpop.f32.mrf.mxu0 }
 0x4ea   : > { %v2411_v5 = vadd.f32 %v2379_v42, %v2274_v6 }
 0x4ec   : > { %5938 = vmatmul.msk.bf16.gmra.mxu2 %vm443_vm0, %v2492_v25  ;;  %v2437_v20 = vadd.f32 %v7895_v44, %v2411_v5 }
 0x4ee   : > { %v2461_v23 = vmax.f32 %v2437_v20, 0.0 }
 0x4ef   : > { %v2147_v29 = vpop.f32.mrf.mxu2  ;;  %v2278_v57 = vpop.f32.mrf.mxu3 }
 0x4f0   : > { %v2277_v32 = vadd.f32 %v2276_v61, %v2147_v29  ;;  %v2475_v55 = vpack.c.bf16 %v2461_v23, %v2460_v12 }
 0x4f1   : > { %v2382_v16 = vpop.f32.mrf.mxu0 }
 0x4f2   : > { %v2412_v56 = vadd.f32 %v2382_v16, %v2277_v32 }
 0x4f4   : > { %5966 = vmatmul.msk.bf16.gmra.mxu3 %vm443_vm0, %v2473_v52  ;;  %5992 = vmatmul.msk.bf16.gmra.mxu0 %vm443_vm0, %v2473_v52  ;;  %v2438_v48 = vadd.f32 %v7895_v44, %v2412_v56 }
 0x4f6   : > { %v2462_v45 = vmax.f32 %v2438_v48, 0.0 }
 0x4f7   : > { %v2149_v4 = vpop.f32.mrf.mxu2  ;;  %v2281_v13 = vpop.f32.mrf.mxu3 }
 0x4f8   : > { %v2279_v1 = vadd.f32 %v2278_v57, %v2149_v4  ;;  %v2495_v8 = vpack.c.bf16 %v2462_v45, %v2461_v23 }
 0x4f9   : > { %v2384_v0 = vpop.f32.mrf.mxu0 }
 0x4fa   : > { %v2413_v3 = vadd.f32 %v2384_v0, %v2279_v1 }
 0x4fc   : > { %5939 = vmatmul.msk.bf16.gmra.mxu2 %vm443_vm0, %v2493_v60  ;;  %v2439_v34 = vadd.f32 %v7895_v44, %v2413_v3 }
 0x4fe   : > { %v2463_v25 = vmax.f32 %v2439_v34, 0.0 }
 0x4ff   : > { %v2152_v40 = vpop.f32.mrf.mxu2  ;;  %v2283_v2 = vpop.f32.mrf.mxu3 }
 0x500   : > { %v2282_v54 = vadd.f32 %v2281_v13, %v2152_v40  ;;  %v2476_v11 = vpack.c.bf16 %v2463_v25, %v2462_v45 }
 0x501   : > { %v2387_v10 = vpop.f32.mrf.mxu0 }
 0x502   : > { %v2414_v9 = vadd.f32 %v2387_v10, %v2282_v54 }
 0x504   : > { %5967 = vmatmul.msk.bf16.gmra.mxu3 %vm443_vm0, %v2474_v21  ;;  %5993 = vmatmul.msk.bf16.gmra.mxu0 %vm443_vm0, %v2474_v21  ;;  %v2440_v33 = vadd.f32 %v7895_v44, %v2414_v9 }
 0x506   : > { %v2464_v4 = vmax.f32 %v2440_v33, 0.0 }
 0x507   : > { %v2154_v30 = vpop.f32.mrf.mxu2  ;;  %v2693_v53 = vpop.f32.mrf.mxu3 }
 0x508   : > { %v2284_v14 = vadd.f32 %v2283_v2, %v2154_v30  ;;  %v2496_v28 = vpack.c.bf16 %v2464_v4, %v2463_v25 }
 0x509   : > { %v2389_v50 = vpop.f32.mrf.mxu0 }
 0x50a   : > { %v2415_v13 = vadd.f32 %v2389_v50, %v2284_v14 }
 0x50c   : > { %5940 = vmatmul.msk.bf16.gmra.mxu2 %vm443_vm0, %v2494_v39  ;;  %v2441_v40 = vadd.f32 %v7895_v44, %v2415_v13 }
 0x50e   : > { %v2465_v2 = vmax.f32 %v2441_v40, 0.0 }
 0x50f   : > { %v2572_v26 = vpop.f32.mrf.mxu2  ;;  %v2695_v37 = vpop.f32.mrf.mxu3 }
 0x510   : > { %v2694_v36 = vadd.f32 %v2693_v53, %v2572_v26  ;;  %v2748_v30 = vpack.c.bf16 %v2465_v2, %v2464_v4  ;;  %v6660_v26 = vld [vmem:[#allocation5 + $0x1f0] sm:$0xff] }
 0x511   : > { %v2794_v38 = vpop.f32.mrf.mxu0  ;;  %3127 = vmatpush.bf16.msra.mxu1 %v6660_v26 }
 0x512   : > { %v2849_v49 = vadd.f32 %v2794_v38, %v2694_v36 }
 0x514   : > { %5968 = vmatmul.msk.bf16.gmra.mxu3 %vm443_vm0, %v2475_v55  ;;  %5994 = vmatmul.msk.bf16.gmra.mxu0 %vm443_vm0, %v2475_v55  ;;  %v2873_v35 = vadd.f32 %v7951_v62, %v2849_v49 }
 0x516   : > { %v2895_v22 = vmax.f32 %v2873_v35, 0.0 }
 0x517   : > { %v2574_v43 = vpop.f32.mrf.mxu2  ;;  %v2698_v59 = vpop.f32.mrf.mxu3 }
 0x518   : > { %v2696_v63 = vadd.f32 %v2695_v37, %v2574_v43 }
 0x519   : > { %v2796_v51 = vpop.f32.mrf.mxu0 }
 0x51a   : > { %v2850_v61 = vadd.f32 %v2796_v51, %v2696_v63 }
 0x51c   : > { %v2874_v42 = vadd.f32 %v7951_v62, %v2850_v61  ;;  %5941 = vmatmul.msk.bf16.gmra.mxu2 %vm443_vm0, %v2495_v8 }
 0x51e   : > { %v2896_v31 = vmax.f32 %v2874_v42, 0.0 }
 0x51f   : > { %v2577_v18 = vpop.f32.mrf.mxu2  ;;  %v2700_v29 = vpop.f32.mrf.mxu3 }
 0x520   : > { %v7957_v57 = vpack.c.bf16 %v2896_v31, %v2895_v22  ;;  %v2699_v16 = vadd.f32 %v2698_v59, %v2577_v18 }
 0x521   : > { %v2799_v52 = vpop.f32.mrf.mxu0 }
 0x522   : > { %v2851_v27 = vadd.f32 %v2799_v52, %v2699_v16 }
 0x524   : > { %v2875_v17 = vadd.f32 %v7951_v62, %v2851_v27  ;;  %5969 = vmatmul.msk.bf16.gmra.mxu3 %vm443_vm0, %v2476_v11  ;;  %5995 = vmatmul.msk.bf16.gmra.mxu0 %vm443_vm0, %v2476_v11 }
 0x526   : > { %v2897_v0 = vmax.f32 %v2875_v17, 0.0 }
 0x527   : > { %v2579_v60 = vpop.f32.mrf.mxu2  ;;  %v2703_v24 = vpop.f32.mrf.mxu3 }
 0x528   : > { %v2936_v41 = vpack.c.bf16 %v2897_v0, %v2896_v31  ;;  %v2701_v10 = vadd.f32 %v2700_v29, %v2579_v60  ;;  %v6659_v60 = vld [vmem:[#allocation5 + $0x1e8] sm:$0xff] }
 0x529   : > { %v2801_v19 = vpop.f32.mrf.mxu0  ;;  %3128 = vmatpush.bf16.msra.mxu1 %v6659_v60 }
 0x52a   : > { %6013 = vmatmul.msk.bf16.vlgmr.msrb.gmra.mxu1 %vm443_vm0, %v2936_v41  ;;  %v2852_v21 = vadd.f32 %v2801_v19, %v2701_v10 }
 0x52c   : > { %5942 = vmatmul.msk.bf16.gmra.mxu2 %vm443_vm0, %v2496_v28  ;;  %v2876_v53 = vadd.f32 %v7951_v62, %v2852_v21 }
 0x52e   : > { %v2898_v44 = vmax.f32 %v2876_v53, 0.0 }
 0x52f   : > { %v2582_v58 = vpop.f32.mrf.mxu2  ;;  %v2705_v6 = vpop.f32.mrf.mxu3 }
 0x530   : > { %v2704_v12 = vadd.f32 %v2703_v24, %v2582_v58  ;;  %v7969_v47 = vpack.c.bf16 %v2898_v44, %v2897_v0 }
 0x531   : > { %v2804_v5 = vpop.f32.mrf.mxu0 }
 0x532   : > { %v2853_v32 = vadd.f32 %v2804_v5, %v2704_v12 }
 0x534   : > { %v2877_v50 = vadd.f32 %v7951_v62, %v2853_v32  ;;  %5996 = vmatmul.msk.bf16.gmra.mxu0 %vm443_vm0, %v2748_v30 }
 0x536   : > { %v2899_v39 = vmax.f32 %v2877_v50, 0.0 }
 0x537   : > { %v2584_v20 = vpop.f32.mrf.mxu2  ;;  %v2708_v56 = vpop.f32.mrf.mxu3 }
 0x538   : > { %v2937_v23 = vpack.c.bf16 %v2899_v39, %v2898_v44  ;;  %v2706_v36 = vadd.f32 %v2705_v6, %v2584_v20 }
 0x539   : > { %v2806_v37 = vpop.f32.mrf.mxu0 }
 0x53a   : > { %6014 = vmatmul.msk.bf16.gmra.mxu1 %vm443_vm0, %v2937_v23  ;;  %v2854_v15 = vadd.f32 %v2806_v37, %v2706_v36 }
 0x53c   : > { %6065 = vmatmul.msk.bf16.vlgmr.msra.gmra.mxu2 %vm443_vm0, %v7969_v47  ;;  %v2878_v49 = vadd.f32 %v7951_v62, %v2854_v15 }
 0x53e   : > { %v2900_v3 = vmax.f32 %v2878_v49, 0.0 }
 0x53f   : > { %v2587_v48 = vpop.f32.mrf.mxu2  ;;  %v2710_v38 = vpop.f32.mrf.mxu3 }
 0x540   : > { %v2709_v55 = vadd.f32 %v2708_v56, %v2587_v48  ;;  %v7976_v51 = vpack.c.bf16 %v2900_v3, %v2899_v39 }
 0x541   : > { %v2809_v1 = vpop.f32.mrf.mxu0 }
 0x542   : > { %v2855_v46 = vadd.f32 %v2809_v1, %v2709_v55 }
 0x544   : > { %v2879_v45 = vadd.f32 %v7951_v62, %v2855_v46 }
 0x546   : > { %v2901_v43 = vmax.f32 %v2879_v45, 0.0 }
 0x547   : > { %v2589_v59 = vpop.f32.mrf.mxu2  ;;  %v2713_v7 = vpop.f32.mrf.mxu3 }
 0x548   : > { %v2938_v63 = vpack.c.bf16 %v2901_v43, %v2900_v3  ;;  %v2711_v34 = vadd.f32 %v2710_v38, %v2589_v59 }
 0x549   : > { %v2811_v8 = vpop.f32.mrf.mxu0 }
 0x54a   : > { %6015 = vmatmul.msk.bf16.gmra.mxu1 %vm443_vm0, %v2938_v63  ;;  %v2856_v54 = vadd.f32 %v2811_v8, %v2711_v34 }
 0x54c   : > { %6066 = vmatmul.msk.bf16.gmra.mxu2 %vm443_vm0, %v7976_v51  ;;  %v2880_v9 = vadd.f32 %v7951_v62, %v2856_v54 }
 0x54e   : > { %v2902_v18 = vmax.f32 %v2880_v9, 0.0 }
 0x54f   : > { %v2592_v35 = vpop.f32.mrf.mxu2  ;;  %v2715_v61 = vpop.f32.mrf.mxu3 }
 0x550   : > { %v2714_v42 = vadd.f32 %v2713_v7, %v2592_v35  ;;  %v7983_v14 = vpack.c.bf16 %v2902_v18, %v2901_v43 }
 0x551   : > { %v2814_v25 = vpop.f32.mrf.mxu0 }
 0x552   : > { %v2857_v22 = vadd.f32 %v2814_v25, %v2714_v42 }
 0x554   : > { %v2881_v31 = vadd.f32 %v7951_v62, %v2857_v22 }
 0x556   : > { %v2903_v29 = vmax.f32 %v2881_v31, 0.0 }
 0x557   : > { %v2594_v16 = vpop.f32.mrf.mxu2  ;;  %v2718_v52 = vpop.f32.mrf.mxu3 }
 0x558   : > { %v2939_v11 = vpack.c.bf16 %v2903_v29, %v2902_v18  ;;  %v2716_v27 = vadd.f32 %v2715_v61, %v2594_v16  ;;  %v6658_v61 = vld [vmem:[#allocation5 + $0x1e0] sm:$0xff] }
 0x559   : > { %v2816_v33 = vpop.f32.mrf.mxu0  ;;  %3129 = vmatpush.bf16.msra.mxu1 %v6658_v61 }
 0x55a   : > { %6016 = vmatmul.msk.bf16.gmra.mxu1 %vm443_vm0, %v2939_v11  ;;  %v2858_v17 = vadd.f32 %v2816_v33, %v2716_v27 }
 0x55c   : > { %6067 = vmatmul.msk.bf16.gmra.mxu2 %vm443_vm0, %v7983_v14  ;;  %v2882_v41 = vadd.f32 %v7951_v62, %v2858_v17 }
 0x55e   : > { %v2904_v40 = vmax.f32 %v2882_v41, 0.0 }
 0x55f   : > { %v2597_v4 = vpop.f32.mrf.mxu2  ;;  %v2720_v13 = vpop.f32.mrf.mxu3 }
 0x560   : > { %v2719_v0 = vadd.f32 %v2718_v52, %v2597_v4  ;;  %v7990_v12 = vpack.c.bf16 %v2904_v40, %v2903_v29 }
 0x561   : > { %v2819_v24 = vpop.f32.mrf.mxu0 }
 0x562   : > { %v2859_v19 = vadd.f32 %v2819_v24, %v2719_v0  ;;  %v6677_v0 = vld [vmem:[#allocation5 + $0x278] sm:$0xff] }
 0x563   : > { %3430 = vmatpush.bf16.msra.mxu3 %v6677_v0 }
 0x564   : > { %v2883_v28 = vadd.f32 %v7951_v62, %v2859_v19 }
 0x566   : > { %v2905_v10 = vmax.f32 %v2883_v28, 0.0 }
 0x567   : > { %v2599_v2 = vpop.f32.mrf.mxu2  ;;  %v2723_v21 = vpop.f32.mrf.mxu3 }
 0x568   : > { %v2940_v58 = vpack.c.bf16 %v2905_v10, %v2904_v40  ;;  %v2721_v5 = vadd.f32 %v2720_v13, %v2599_v2 }
 0x569   : > { %v2821_v6 = vpop.f32.mrf.mxu0 }
 0x56a   : > { %6017 = vmatmul.msk.bf16.gmra.mxu1 %vm443_vm0, %v2940_v58  ;;  %v2860_v30 = vadd.f32 %v2821_v6, %v2721_v5 }
 0x56c   : > { %6068 = vmatmul.msk.bf16.gmra.mxu2 %vm443_vm0, %v7990_v12  ;;  %v2884_v39 = vadd.f32 %v7951_v62, %v2860_v30 }
 0x56e   : > { %v2906_v23 = vmax.f32 %v2884_v39, 0.0 }
 0x56f   : > { %v2602_v53 = vpop.f32.mrf.mxu2  ;;  %v2725_v32 = vpop.f32.mrf.mxu3 }
 0x570   : > { %v2724_v50 = vadd.f32 %v2723_v21, %v2602_v53  ;;  %v7997_v38 = vpack.c.bf16 %v2906_v23, %v2905_v10 }
 0x571   : > { %v2824_v44 = vpop.f32.mrf.mxu0 }
 0x572   : > { %v2861_v20 = vadd.f32 %v2824_v44, %v2724_v50 }
 0x574   : > { %v2885_v56 = vadd.f32 %v7951_v62, %v2861_v20 }
 0x576   : > { %v2907_v26 = vmax.f32 %v2885_v56, 0.0 }
 0x577   : > { %v2604_v37 = vpop.f32.mrf.mxu2  ;;  %v2728_v36 = vpop.f32.mrf.mxu3 }
 0x578   : > { %v2941_v15 = vpack.c.bf16 %v2907_v26, %v2906_v23  ;;  %v2726_v55 = vadd.f32 %v2725_v32, %v2604_v37 }
 0x579   : > { %v2826_v48 = vpop.f32.mrf.mxu0 }
 0x57a   : > { %6018 = vmatmul.msk.bf16.gmra.mxu1 %vm443_vm0, %v2941_v15  ;;  %v2862_v1 = vadd.f32 %v2826_v48, %v2726_v55 }
 0x57c   : > { %6069 = vmatmul.msk.bf16.gmra.mxu2 %vm443_vm0, %v7997_v38  ;;  %v2886_v43 = vadd.f32 %v7951_v62, %v2862_v1 }
 0x57e   : > { %v2908_v63 = vmax.f32 %v2886_v43, 0.0 }
 0x57f   : > { %v2607_v49 = vpop.f32.mrf.mxu2  ;;  %v2730_v46 = vpop.f32.mrf.mxu3 }
 0x580   : > { %v2729_v45 = vadd.f32 %v2728_v36, %v2607_v49  ;;  %v8004_v25 = vpack.c.bf16 %v2908_v63, %v2907_v26 }
 0x581   : > { %v2829_v3 = vpop.f32.mrf.mxu0 }
 0x582   : > { %v2863_v59 = vadd.f32 %v2829_v3, %v2729_v45 }
 0x584   : > { %v2887_v7 = vadd.f32 %v7951_v62, %v2863_v59 }
 0x586   : > { %v2909_v8 = vmax.f32 %v2887_v7, 0.0 }
 0x587   : > { %v2609_v34 = vpop.f32.mrf.mxu2  ;;  %v2733_v54 = vpop.f32.mrf.mxu3 }
 0x588   : > { %v2942_v35 = vpack.c.bf16 %v2909_v8, %v2908_v63  ;;  %v2731_v9 = vadd.f32 %v2730_v46, %v2609_v34  ;;  %v6676_v34 = vld [vmem:[#allocation5 + $0x270] sm:$0xff] }
 0x589   : > { %v2831_v42 = vpop.f32.mrf.mxu0  ;;  %3431 = vmatpush.bf16.msra.mxu3 %v6676_v34 }
 0x58a   : > { %6019 = vmatmul.msk.bf16.gmra.mxu1 %vm443_vm0, %v2942_v35  ;;  %v2864_v22 = vadd.f32 %v2831_v42, %v2731_v9 }
 0x58c   : > { %6070 = vmatmul.msk.bf16.gmra.mxu2 %vm443_vm0, %v8004_v25  ;;  %v2888_v52 = vadd.f32 %v7951_v62, %v2864_v22 }
 0x58e   : > { %v2910_v27 = vmax.f32 %v2888_v52, 0.0 }
 0x58f   : > { %v2612_v31 = vpop.f32.mrf.mxu2  ;;  %v2735_v29 = vpop.f32.mrf.mxu3 }
 0x590   : > { %v2734_v18 = vadd.f32 %v2733_v54, %v2612_v31  ;;  %v8011_v24 = vpack.c.bf16 %v2910_v27, %v2909_v8 }
 0x591   : > { %v2834_v16 = vpop.f32.mrf.mxu0 }
 0x592   : > { %v2865_v11 = vadd.f32 %v2834_v16, %v2734_v18 }
 0x594   : > { %v2889_v33 = vadd.f32 %v7951_v62, %v2865_v11 }
 0x596   : > { %v2911_v17 = vmax.f32 %v2889_v33, 0.0 }
 0x597   : > { %v2614_v4 = vpop.f32.mrf.mxu2  ;;  %v2738_v19 = vpop.f32.mrf.mxu3 }
 0x598   : > { %v2943_v13 = vpack.c.bf16 %v2911_v17, %v2910_v27  ;;  %v2736_v41 = vadd.f32 %v2735_v29, %v2614_v4 }
 0x599   : > { %v2836_v60 = vpop.f32.mrf.mxu0 }
 0x59a   : > { %6020 = vmatmul.msk.bf16.gmra.mxu1 %vm443_vm0, %v2943_v13  ;;  %v2866_v28 = vadd.f32 %v2836_v60, %v2736_v41  ;;  %v6673_v13 = vld [vmem:[#allocation5 + $0x258] sm:$0xff] }
 0x59b   : > { %3535 = vmatpush.bf16.msra.mxu0 %v6673_v13 }
 0x59c   : > { %6071 = vmatmul.msk.bf16.gmra.mxu2 %vm443_vm0, %v8011_v24  ;;  %v2890_v21 = vadd.f32 %v7951_v62, %v2866_v28  ;;  %v6670_v28 = vld [vmem:[#allocation5 + $0x240] sm:$0xff] }
 0x59e   : > { %v2912_v30 = vmax.f32 %v2890_v21, 0.0  ;;  %v6681_v21 = vld [vmem:[#allocation5 + $0x298] sm:$0xff] }
 0x59f   : > { %v2617_v40 = vpop.f32.mrf.mxu2  ;;  %v2740_v5 = vpop.f32.mrf.mxu3 }
 0x5a0   : > { %v2739_v10 = vadd.f32 %v2738_v19, %v2617_v40  ;;  %v8020_v20 = vpack.c.bf16 %v2912_v30, %v2911_v17  ;;  %v6674_v17 = vld [vmem:[#allocation5 + $0x260] sm:$0xff]  ;;  %v6671_v19 = vld [vmem:[#allocation5 + $0x248] sm:$0xff] }
 0x5a1   : > { %v2839_v2 = vpop.f32.mrf.mxu0 }
 0x5a2   : > { %v2867_v58 = vadd.f32 %v2839_v2, %v2739_v10 }
 0x5a4   : > { %v2891_v6 = vadd.f32 %v7951_v62, %v2867_v58 }
 0x5a6   : > { %v2913_v53 = vmax.f32 %v2891_v6, 0.0 }
 0x5a7   : > { %v2619_v32 = vpop.f32.mrf.mxu2  ;;  %v8018_v44 = vpop.f32.mrf.mxu1 }
 0x5a8   : > { %v2944_v50 = vpack.c.bf16 %v2913_v53, %v2912_v30  ;;  %v2741_v56 = vadd.f32 %v2740_v5, %v2619_v32  ;;  %v2743_v26 = vpop.f32.mrf.mxu3  ;;  %v8091_v30 = vld [vmem:[#allocation7 + $0x5] ss:$0 sm:$0xff] }
 0x5a9   : > { %v2841_v39 = vpop.f32.mrf.mxu0 }
 0x5aa   : > { %6021 = vmatmul.msk.bf16.gmra.mxu1 %vm443_vm0, %v2944_v50  ;;  %v2868_v23 = vadd.f32 %v2841_v39, %v2741_v56 }
 0x5ac   : > { %6072 = vmatmul.msk.bf16.gmra.mxu2 %vm443_vm0, %v8020_v20  ;;  %v2892_v55 = vadd.f32 %v7951_v62, %v2868_v23 }
 0x5ae   : > { %v2914_v46 = vmax.f32 %v2892_v55, 0.0 }
 0x5af   : > { %v2622_v37 = vpop.f32.mrf.mxu2  ;;  %v8025_v15 = vpop.f32.mrf.mxu1 }
 0x5b0   : > { %v2744_v36 = vadd.f32 %v2743_v26, %v2622_v37  ;;  %v2745_v7 = vpop.f32.mrf.mxu3  ;;  %v8031_v63 = vpack.c.bf16 %v2914_v46, %v2913_v53 }
 0x5b1   : > { %v2844_v48 = vpop.f32.mrf.mxu0 }
 0x5b2   : > { %v2869_v1 = vadd.f32 %v2844_v48, %v2744_v36 }
 0x5b4   : > { %v2893_v49 = vadd.f32 %v7951_v62, %v2869_v1 }
 0x5b6   : > { %v2915_v45 = vmax.f32 %v2893_v49, 0.0 }
 0x5b7   : > { %v2624_v3 = vpop.f32.mrf.mxu2  ;;  %v8029_v59 = vpop.f32.mrf.mxu1 }
 0x5b8   : > { %v2945_v43 = vpack.c.bf16 %v2915_v45, %v2914_v46  ;;  %v2746_v8 = vadd.f32 %v2745_v7, %v2624_v3 }
 0x5b9   : > { %v2846_v54 = vpop.f32.mrf.mxu0 }
 0x5ba   : > { %6022 = vmatmul.msk.bf16.gmra.mxu1 %vm443_vm0, %v2945_v43  ;;  %v2870_v35 = vadd.f32 %v2846_v54, %v2746_v8 }
 0x5bc   : > { %6073 = vmatmul.msk.bf16.gmra.mxu2 %vm443_vm0, %v8031_v63  ;;  %v2894_v42 = vadd.f32 %v7951_v62, %v2870_v35  ;;  %v6675_v62 = vld [vmem:[#allocation5 + $0x268] sm:$0xff] }
 0x5bd   : > { %3432 = vmatpush.bf16.msra.mxu3 %v6675_v62 }
 0x5be   : > { %v2916_v9 = vmax.f32 %v2894_v42, 0.0 }
 0x5bf   : > { %v8036_v61 = vpop.f32.mrf.mxu1 }
 0x5c0   : > { %v3181_v31 = vpack.c.bf16 %v2916_v9, %v2915_v45 }
 0x5c1   : > { %3433 = vmatpush.bf16.msra.mxu3 %v6674_v17 }
 0x5c5   : > { %3626 = vmatpush.bf16.msrb.mxu3 %v6681_v21 }
 0x5c7   : > { %v8039_v22 = vpop.f32.mrf.mxu1 }
 0x5ca   : > { %6039 = vmatmul.msk.bf16.vlgmr.msra.gmra.mxu1 %vm443_vm0, %v7957_v57 }
 0x5cc   : > { %6074 = vmatmul.msk.bf16.gmra.mxu2 %vm443_vm0, %v3181_v31 }
 0x5cf   : > { %v8044_v18 = vpop.f32.mrf.mxu1 }
 0x5d7   : > { %v8046_v29 = vpop.f32.mrf.mxu1 }
 0x5da   : > { %6040 = vmatmul.msk.bf16.gmra.mxu1 %vm443_vm0, %v7969_v47 }
 0x5df   : > { %v8050_v16 = vpop.f32.mrf.mxu1 }
 0x5e7   : > { %v8052_v52 = vpop.f32.mrf.mxu1 }
 0x5ea   : > { %6041 = vmatmul.msk.bf16.gmra.mxu1 %vm443_vm0, %v7976_v51 }
 0x5ef   : > { %v8056_v11 = vpop.f32.mrf.mxu1 }
 0x5f7   : > { %v8058_v57 = vpop.f32.mrf.mxu1 }
 0x5fa   : > { %6042 = vmatmul.msk.bf16.gmra.mxu1 %vm443_vm0, %v7983_v14  ;;  %v3227_v14 = vpop.f32.mrf.mxu2 }
 0x5ff   : > { %v8062_v33 = vpop.f32.mrf.mxu1 }
 0x602   : > { %v3229_v60 = vpop.f32.mrf.mxu2 }
 0x607   : > { %v8064_v27 = vpop.f32.mrf.mxu1 }
 0x60a   : > { %6043 = vmatmul.msk.bf16.gmra.mxu1 %vm443_vm0, %v7990_v12  ;;  %v6672_v12 = vld [vmem:[#allocation5 + $0x250] sm:$0xff] }
 0x60b   : > { %3536 = vmatpush.bf16.msra.mxu0 %v6672_v12 }
 0x60f   : > { %v8068_v47 = vpop.f32.mrf.mxu1  ;;  %3537 = vmatpush.bf16.msra.mxu0 %v6671_v19 }
 0x613   : > { %3538 = vmatpush.bf16.msra.mxu0 %v6670_v28 }
 0x617   : > { %v8070_v51 = vpop.f32.mrf.mxu1 }
 0x61a   : > { %6044 = vmatmul.msk.bf16.gmra.mxu1 %vm443_vm0, %v7997_v38  ;;  %v3232_v38 = vpop.f32.mrf.mxu2 }
 0x61f   : > { %v8074_v4 = vpop.f32.mrf.mxu1 }
 0x622   : > { %v3234_v2 = vpop.f32.mrf.mxu2 }
 0x627   : > { %v8076_v0 = vpop.f32.mrf.mxu1 }
 0x62a   : > { %6045 = vmatmul.msk.bf16.gmra.mxu1 %vm443_vm0, %v8004_v25  ;;  %v3237_v6 = vpop.f32.mrf.mxu2 }
 0x62f   : > { %v8080_v41 = vpop.f32.mrf.mxu1 }
 0x632   : > { %v3239_v26 = vpop.f32.mrf.mxu2 }
 0x637   : > { %v8082_v40 = vpop.f32.mrf.mxu1 }
 0x63a   : > { %6046 = vmatmul.msk.bf16.gmra.mxu1 %vm443_vm0, %v8011_v24  ;;  %v3242_v46 = vpop.f32.mrf.mxu2 }
 0x63f   : > { %v8086_v10 = vpop.f32.mrf.mxu1 }
 0x642   : > { %v3244_v54 = vpop.f32.mrf.mxu2 }
 0x647   : > { %v3131_v25 = vpop.f32.mrf.mxu1 }
 0x648   : > { %v3132_v58 = vadd.f32 %v3131_v25, %v8018_v44 }
 0x64a   : > { %6047 = vmatmul.msk.bf16.gmra.mxu1 %vm443_vm0, %v8020_v20  ;;  %v3277_v5 = vadd.f32 %v3227_v14, %v3132_v58  ;;  %v3247_v17 = vpop.f32.mrf.mxu2 }
 0x64c   : > { %v3299_v24 = vadd.f32 %v8091_v30, %v3277_v5 }
 0x64e   : > { %v3319_v56 = vmax.f32 %v3299_v24, 0.0 }
 0x64f   : > { %v3133_v53 = vpop.f32.mrf.mxu1 }
 0x650   : > { %v3134_v32 = vadd.f32 %v3133_v53, %v8025_v15 }
 0x652   : > { %v3278_v50 = vadd.f32 %v3229_v60, %v3134_v32 }
 0x654   : > { %v3300_v39 = vadd.f32 %v8091_v30, %v3278_v50 }
 0x656   : > { %v3320_v23 = vmax.f32 %v3300_v39, 0.0 }
 0x657   : > { %v3136_v37 = vpop.f32.mrf.mxu1 }
 0x658   : > { %v3339_v36 = vpack.c.bf16 %v3320_v23, %v3319_v56  ;;  %v3137_v20 = vadd.f32 %v3136_v37, %v8029_v59  ;;  %v6680_v59 = vld [vmem:[#allocation5 + $0x290] sm:$0xff]  ;;  %v6679_v37 = vld [vmem:[#allocation5 + $0x288] sm:$0xff] }
 0x659   : > { %3627 = vmatpush.bf16.msrb.mxu3 %v6680_v59 }
 0x65a   : > { %6048 = vmatmul.msk.bf16.gmra.mxu1 %vm443_vm0, %v8031_v63  ;;  %v3279_v44 = vadd.f32 %v3232_v38, %v3137_v20  ;;  %6116 = vmatmul.msk.bf16.vlgmr.msra.gmra.mxu0 %vm443_vm0, %v3339_v36 }
 0x65c   : > { %v3301_v15 = vadd.f32 %v8091_v30, %v3279_v44 }
 0x65d   : > { %3628 = vmatpush.bf16.msrb.mxu3 %v6679_v37 }
 0x65e   : > { %v3321_v48 = vmax.f32 %v3301_v15, 0.0 }
 0x65f   : > { %v3138_v55 = vpop.f32.mrf.mxu1 }
 0x660   : > { %v3357_v1 = vpack.c.bf16 %v3321_v48, %v3320_v23  ;;  %v3139_v49 = vadd.f32 %v3138_v55, %v8036_v61 }
 0x662   : > { %v3280_v45 = vadd.f32 %v3234_v2, %v3139_v49  ;;  %6091 = vmatmul.msk.bf16.vlgmr.msra.gmra.mxu3 %vm443_vm0, %v3357_v1 }
 0x664   : > { %v3302_v3 = vadd.f32 %v8091_v30, %v3280_v45 }
 0x666   : > { %v3322_v43 = vmax.f32 %v3302_v3, 0.0 }
 0x667   : > { %v3141_v7 = vpop.f32.mrf.mxu1 }
 0x668   : > { %v3142_v63 = vadd.f32 %v3141_v7, %v8039_v22  ;;  %v8105_v8 = vpack.c.bf16 %v3322_v43, %v3321_v48 }
 0x66a   : > { %v3281_v34 = vadd.f32 %v3237_v6, %v3142_v63  ;;  %6117 = vmatmul.msk.bf16.gmra.mxu0 %vm443_vm0, %v8105_v8 }
 0x66c   : > { %v3303_v35 = vadd.f32 %v8091_v30, %v3281_v34 }
 0x66e   : > { %v3323_v61 = vmax.f32 %v3303_v35, 0.0 }
 0x66f   : > { %v3143_v42 = vpop.f32.mrf.mxu1 }
 0x670   : > { %v3358_v9 = vpack.c.bf16 %v3323_v61, %v3322_v43  ;;  %v3144_v31 = vadd.f32 %v3143_v42, %v8044_v18  ;;  %v3249_v18 = vpop.f32.mrf.mxu2 }
 0x672   : > { %v3282_v62 = vadd.f32 %v3239_v26, %v3144_v31  ;;  %6092 = vmatmul.msk.bf16.gmra.mxu3 %vm443_vm0, %v3358_v9 }
 0x674   : > { %v3304_v22 = vadd.f32 %v8091_v30, %v3282_v62 }
 0x676   : > { %v3324_v13 = vmax.f32 %v3304_v22, 0.0  ;;  %v6678_v22 = vld [vmem:[#allocation5 + $0x280] sm:$0xff] }
 0x677   : > { %v3146_v14 = vpop.f32.mrf.mxu1  ;;  %3629 = vmatpush.bf16.msrb.mxu3 %v6678_v22 }
 0x678   : > { %v3147_v12 = vadd.f32 %v3146_v14, %v8046_v29  ;;  %v8114_v60 = vpack.c.bf16 %v3324_v13, %v3323_v61  ;;  %v3252_v24 = vpop.f32.mrf.mxu2 }
 0x67a   : > { %v3283_v19 = vadd.f32 %v3242_v46, %v3147_v12  ;;  %6118 = vmatmul.msk.bf16.gmra.mxu0 %vm443_vm0, %v8114_v60 }
 0x67c   : > { %v3305_v28 = vadd.f32 %v8091_v30, %v3283_v19 }
 0x67e   : > { %v3325_v38 = vmax.f32 %v3305_v28, 0.0 }
 0x67f   : > { %v3148_v2 = vpop.f32.mrf.mxu1 }
 0x680   : > { %v3359_v21 = vpack.c.bf16 %v3325_v38, %v3324_v13  ;;  %v3149_v25 = vadd.f32 %v3148_v2, %v8050_v16  ;;  %v3254_v20 = vpop.f32.mrf.mxu2 }
 0x682   : > { %v3284_v58 = vadd.f32 %v3244_v54, %v3149_v25  ;;  %6093 = vmatmul.msk.bf16.gmra.mxu3 %vm443_vm0, %v3359_v21 }
 0x684   : > { %v3306_v6 = vadd.f32 %v8091_v30, %v3284_v58 }
 0x686   : > { %v3326_v29 = vmax.f32 %v3306_v6, 0.0 }
 0x687   : > { %v3151_v5 = vpop.f32.mrf.mxu1 }
 0x688   : > { %v3152_v53 = vadd.f32 %v3151_v5, %v8052_v52  ;;  %v8123_v32 = vpack.c.bf16 %v3326_v29, %v3325_v38  ;;  %v3257_v49 = vpop.f32.mrf.mxu2 }
 0x68a   : > { %v3285_v50 = vadd.f32 %v3247_v17, %v3152_v53  ;;  %6119 = vmatmul.msk.bf16.gmra.mxu0 %vm443_vm0, %v8123_v32 }
 0x68c   : > { %v3307_v39 = vadd.f32 %v8091_v30, %v3285_v50 }
 0x68e   : > { %v3327_v56 = vmax.f32 %v3307_v39, 0.0 }
 0x68f   : > { %v3153_v16 = vpop.f32.mrf.mxu1 }
 0x690   : > { %v3360_v23 = vpack.c.bf16 %v3327_v56, %v3326_v29  ;;  %v3154_v26 = vadd.f32 %v3153_v16, %v8056_v11  ;;  %v3259_v63 = vpop.f32.mrf.mxu2 }
 0x692   : > { %v3286_v36 = vadd.f32 %v3249_v18, %v3154_v26  ;;  %6094 = vmatmul.msk.bf16.gmra.mxu3 %vm443_vm0, %v3360_v23 }
 0x694   : > { %v3308_v52 = vadd.f32 %v8091_v30, %v3286_v36 }
 0x696   : > { %v3328_v44 = vmax.f32 %v3308_v52, 0.0  ;;  %v6693_v52 = vld [vmem:[#allocation5 + $0x2f8] sm:$0xff] }
 0x697   : > { %v3156_v15 = vpop.f32.mrf.mxu1  ;;  %4001 = vmatpush.bf16.msrb.mxu2 %v6693_v52 }
 0x698   : > { %v3157_v48 = vadd.f32 %v3156_v15, %v8058_v57  ;;  %v8132_v55 = vpack.c.bf16 %v3328_v44, %v3327_v56  ;;  %v3262_v17 = vpop.f32.mrf.mxu2  ;;  %v6685_v15 = vld [vmem:[#allocation5 + $0x2b8] sm:$0xff] }
 0x699   : > { %3915 = vmatpush.bf16.msrb.mxu1 %v6685_v15 }
 0x69a   : > { %v3287_v1 = vadd.f32 %v3252_v24, %v3157_v48  ;;  %6120 = vmatmul.msk.bf16.gmra.mxu0 %vm443_vm0, %v8132_v55 }
 0x69c   : > { %v3309_v11 = vadd.f32 %v8091_v30, %v3287_v1 }
 0x69e   : > { %v3329_v46 = vmax.f32 %v3309_v11, 0.0 }
 0x69f   : > { %v3158_v45 = vpop.f32.mrf.mxu1 }
 0x6a0   : > { %v3361_v3 = vpack.c.bf16 %v3329_v46, %v3328_v44  ;;  %v3159_v43 = vadd.f32 %v3158_v45, %v8062_v33  ;;  %v3264_v18 = vpop.f32.mrf.mxu2 }
 0x6a2   : > { %v3288_v59 = vadd.f32 %v3254_v20, %v3159_v43  ;;  %6095 = vmatmul.msk.bf16.gmra.mxu3 %vm443_vm0, %v3361_v3  ;;  %v6689_v43 = vld [vmem:[#allocation5 + $0x2d8] sm:$0xff] }
 0x6a3   : > { %3818 = vmatpush.bf16.msrb.mxu0 %v6689_v43 }
 0x6a4   : > { %v3310_v7 = vadd.f32 %v8091_v30, %v3288_v59 }
 0x6a6   : > { %v3330_v57 = vmax.f32 %v3310_v7, 0.0 }
 0x6a7   : > { %v3161_v34 = vpop.f32.mrf.mxu1 }
 0x6a8   : > { %v3162_v54 = vadd.f32 %v3161_v34, %v8064_v27  ;;  %v8141_v35 = vpack.c.bf16 %v3330_v57, %v3329_v46 }
 0x6aa   : > { %v3289_v61 = vadd.f32 %v3257_v49, %v3162_v54  ;;  %6121 = vmatmul.msk.bf16.gmra.mxu0 %vm443_vm0, %v8141_v35 }
 0x6ac   : > { %v3311_v42 = vadd.f32 %v8091_v30, %v3289_v61  ;;  %v6688_v61 = vld [vmem:[#allocation5 + $0x2d0] sm:$0xff] }
 0x6ad   : > { %3819 = vmatpush.bf16.msrb.mxu0 %v6688_v61 }
 0x6ae   : > { %v3331_v9 = vmax.f32 %v3311_v42, 0.0 }
 0x6af   : > { %v3163_v33 = vpop.f32.mrf.mxu1 }
 0x6b0   : > { %v3362_v31 = vpack.c.bf16 %v3331_v9, %v3330_v57  ;;  %v3164_v62 = vadd.f32 %v3163_v33, %v8068_v47  ;;  %v6692_v57 = vld [vmem:[#allocation5 + $0x2f0] sm:$0xff]  ;;  %v6683_v33 = vld [vmem:[#allocation5 + $0x2a8] sm:$0xff] }
 0x6b1   : > { %4002 = vmatpush.bf16.msrb.mxu2 %v6692_v57 }
 0x6b2   : > { %v3290_v13 = vadd.f32 %v3259_v63, %v3164_v62  ;;  %6096 = vmatmul.msk.bf16.gmra.mxu3 %vm443_vm0, %v3362_v31  ;;  %v6684_v63 = vld [vmem:[#allocation5 + $0x2b0] sm:$0xff]  ;;  %v6687_v62 = vld [vmem:[#allocation5 + $0x2c8] sm:$0xff] }
 0x6b3   : > { %3916 = vmatpush.bf16.msrb.mxu1 %v6684_v63  ;;  %3820 = vmatpush.bf16.msrb.mxu0 %v6687_v62  ;;  %v6705_v62 = vld [vmem:[#allocation5 + $0x358] sm:$0xff] }
 0x6b4   : > { %v3312_v27 = vadd.f32 %v8091_v30, %v3290_v13  ;;  %v6690_v13 = vld [vmem:[#allocation5 + $0x2e0] sm:$0xff] }
 0x6b6   : > { %v3332_v14 = vmax.f32 %v3312_v27, 0.0 }
 0x6b7   : > { %v3166_v12 = vpop.f32.mrf.mxu1  ;;  %3917 = vmatpush.bf16.msrb.mxu1 %v6683_v33 }
 0x6b8   : > { %v3167_v19 = vadd.f32 %v3166_v12, %v8070_v51  ;;  %v8150_v28 = vpack.c.bf16 %v3332_v14, %v3331_v9  ;;  %v3267_v51 = vpop.f32.mrf.mxu2  ;;  %v6686_v12 = vld [vmem:[#allocation5 + $0x2c0] sm:$0xff] }
 0x6b9   : > { %3821 = vmatpush.bf16.msrb.mxu0 %v6686_v12 }
 0x6ba   : > { %v3291_v38 = vadd.f32 %v3262_v17, %v3167_v19  ;;  %6122 = vmatmul.msk.bf16.gmra.mxu0 %vm443_vm0, %v8150_v28 }
 0x6bc   : > { %v3313_v47 = vadd.f32 %v8091_v30, %v3291_v38 }
 0x6be   : > { %v3333_v2 = vmax.f32 %v3313_v47, 0.0 }
 0x6bf   : > { %v3168_v21 = vpop.f32.mrf.mxu1 }
 0x6c0   : > { %v3363_v25 = vpack.c.bf16 %v3333_v2, %v3332_v14  ;;  %v3169_v58 = vadd.f32 %v3168_v21, %v8074_v4  ;;  %v3269_v4 = vpop.f32.mrf.mxu2 }
 0x6c2   : > { %v3292_v6 = vadd.f32 %v3264_v18, %v3169_v58  ;;  %6097 = vmatmul.msk.bf16.gmra.mxu3 %vm443_vm0, %v3363_v25 }
 0x6c4   : > { %v3314_v29 = vadd.f32 %v8091_v30, %v3292_v6 }
 0x6c6   : > { %v3334_v5 = vmax.f32 %v3314_v29, 0.0 }
 0x6c7   : > { %v3171_v53 = vpop.f32.mrf.mxu1 }
 0x6c8   : > { %v3172_v24 = vadd.f32 %v3171_v53, %v8076_v0  ;;  %v8159_v50 = vpack.c.bf16 %v3334_v5, %v3333_v2  ;;  %v3272_v11 = vpop.f32.mrf.mxu2 }
 0x6ca   : > { %v3293_v39 = vadd.f32 %v3267_v51, %v3172_v24  ;;  %6123 = vmatmul.msk.bf16.gmra.mxu0 %vm443_vm0, %v8159_v50 }
 0x6cc   : > { %v3315_v56 = vadd.f32 %v8091_v30, %v3293_v39  ;;  %v8221_v39 = vld [vmem:[#allocation7 + $0x6] ss:$0 sm:$0xff] }
 0x6ce   : > { %v3335_v16 = vmax.f32 %v3315_v56, 0.0 }
 0x6cf   : > { %v3173_v23 = vpop.f32.mrf.mxu1 }
 0x6d0   : > { %v3364_v26 = vpack.c.bf16 %v3335_v16, %v3334_v5  ;;  %v3174_v37 = vadd.f32 %v3173_v23, %v8080_v41  ;;  %v3274_v47 = vpop.f32.mrf.mxu2 }
 0x6d2   : > { %v3294_v36 = vadd.f32 %v3269_v4, %v3174_v37  ;;  %6098 = vmatmul.msk.bf16.gmra.mxu3 %vm443_vm0, %v3364_v26 }
 0x6d4   : > { %v3316_v20 = vadd.f32 %v8091_v30, %v3294_v36 }
 0x6d6   : > { %v3336_v0 = vmax.f32 %v3316_v20, 0.0 }
 0x6d7   : > { %v3176_v44 = vpop.f32.mrf.mxu1  ;;  %v3540_v27 = vpop.f32.mrf.mxu0 }
 0x6d8   : > { %v3177_v48 = vadd.f32 %v3176_v44, %v8082_v40  ;;  %v3347_v1 = vpack.c.bf16 %v3336_v0, %v3335_v16 }
 0x6da   : > { %v3295_v49 = vadd.f32 %v3272_v11, %v3177_v48  ;;  %6124 = vmatmul.msk.bf16.gmra.mxu0 %vm443_vm0, %v3347_v1 }
 0x6dc   : > { %v3317_v41 = vadd.f32 %v8091_v30, %v3295_v49 }
 0x6de   : > { %v3337_v46 = vmax.f32 %v3317_v41, 0.0 }
 0x6df   : > { %v3542_v19 = vpop.f32.mrf.mxu0  ;;  %v3178_v38 = vpop.f32.mrf.mxu1 }
 0x6e0   : > { %v3365_v45 = vpack.c.bf16 %v3337_v46, %v3336_v0 }
 0x6e2   : > { %6099 = vmatmul.msk.bf16.gmra.mxu3 %vm443_vm0, %v3365_v45 }
 0x6e5   : > { %v3435_v3 = vpop.f32.mrf.mxu3 }
 0x6e6   : > { %v3541_v24 = vadd.f32 %v3540_v27, %v3435_v3 }
 0x6e7   : > { %v3545_v21 = vpop.f32.mrf.mxu0 }
 0x6ed   : > { %v3437_v59 = vpop.f32.mrf.mxu3 }
 0x6ee   : > { %v3543_v56 = vadd.f32 %v3542_v19, %v3437_v59 }
 0x6ef   : > { %v3547_v51 = vpop.f32.mrf.mxu0 }
 0x6f2   : > { %6141 = vmatmul.msk.bf16.vlgmr.msrb.gmra.mxu3 %vm443_vm0, %v8105_v8 }
 0x6f5   : > { %v8173_v40 = vpop.f32.mrf.mxu3 }
 0x6f6   : > { %v3546_v20 = vadd.f32 %v3545_v21, %v8173_v40 }
 0x6fd   : > { %v8175_v7 = vpop.f32.mrf.mxu3 }
 0x702   : > { %6142 = vmatmul.msk.bf16.gmra.mxu3 %vm443_vm0, %v8114_v60  ;;  %v6691_v60 = vld [vmem:[#allocation5 + $0x2e8] sm:$0xff] }
 0x703   : > { %4003 = vmatpush.bf16.msrb.mxu2 %v6691_v60 }
 0x705   : > { %v8179_v34 = vpop.f32.mrf.mxu3 }
 0x707   : > { %4004 = vmatpush.bf16.msrb.mxu2 %v6690_v13 }
 0x70b   : > { %4347 = vmatpush.bf16.msra.mxu2 %v6705_v62 }
 0x70d   : > { %v8181_v54 = vpop.f32.mrf.mxu3 }
 0x712   : > { %6143 = vmatmul.msk.bf16.gmra.mxu3 %vm443_vm0, %v8123_v32 }
 0x715   : > { %v8185_v8 = vpop.f32.mrf.mxu3 }
 0x71d   : > { %v8187_v42 = vpop.f32.mrf.mxu3 }
 0x722   : > { %6144 = vmatmul.msk.bf16.gmra.mxu3 %vm443_vm0, %v8132_v55 }
 0x725   : > { %v8191_v9 = vpop.f32.mrf.mxu3 }
 0x72d   : > { %v8193_v31 = vpop.f32.mrf.mxu3 }
 0x732   : > { %6145 = vmatmul.msk.bf16.gmra.mxu3 %vm443_vm0, %v8141_v35  ;;  %v6682_v35 = vld [vmem:[#allocation5 + $0x2a0] sm:$0xff] }
 0x733   : > { %3918 = vmatpush.bf16.msrb.mxu1 %v6682_v35 }
 0x735   : > { %v8197_v32 = vpop.f32.mrf.mxu3 }
 0x73d   : > { %v8199_v22 = vpop.f32.mrf.mxu3 }
 0x742   : > { %6146 = vmatmul.msk.bf16.gmra.mxu3 %vm443_vm0, %v8150_v28  ;;  %v3179_v28 = vadd.f32 %v3178_v38, %v8086_v10 }
 0x744   : > { %v3296_v2 = vadd.f32 %v3274_v47, %v3179_v28  ;;  %v6701_v28 = vld [vmem:[#allocation5 + $0x338] sm:$0xff] }
 0x745   : > { %v8203_v55 = vpop.f32.mrf.mxu3  ;;  %v6697_v47 = vld [vmem:[#allocation5 + $0x318] sm:$0xff]  ;;  %4177 = vmatpush.bf16.msra.mxu0 %v6701_v28 }
 0x746   : > { %v3318_v58 = vadd.f32 %v8091_v30, %v3296_v2  ;;  %4266 = vmatpush.bf16.msra.mxu1 %v6697_v47 }
 0x748   : > { %v3338_v6 = vmax.f32 %v3318_v58, 0.0 }
 0x74a   : > { %v3585_v5 = vpack.c.bf16 %v3338_v6, %v3337_v46 }
 0x74d   : > { %v8205_v17 = vpop.f32.mrf.mxu3 }
 0x752   : > { %6147 = vmatmul.msk.bf16.gmra.mxu3 %vm443_vm0, %v8159_v50  ;;  %v3550_v50 = vpop.f32.mrf.mxu0 }
 0x753   : > { %v3551_v43 = vadd.f32 %v3550_v50, %v8179_v34 }
 0x755   : > { %v8209_v14 = vpop.f32.mrf.mxu3 }
 0x75a   : > { %v3552_v36 = vpop.f32.mrf.mxu0 }
 0x75b   : > { %v3553_v60 = vadd.f32 %v3552_v36, %v8181_v54  ;;  %v6704_v36 = vld [vmem:[#allocation5 + $0x350] sm:$0xff] }
 0x75c   : > { %4348 = vmatpush.bf16.msra.mxu2 %v6704_v36 }
 0x75d   : > { %v8211_v18 = vpop.f32.mrf.mxu3 }
 0x762   : > { %6148 = vmatmul.msk.bf16.gmra.mxu3 %vm443_vm0, %v3347_v1  ;;  %v3548_v1 = vadd.f32 %v3547_v51, %v8175_v7  ;;  %v3555_v49 = vpop.f32.mrf.mxu0 }
 0x763   : > { %v3556_v19 = vadd.f32 %v3555_v49, %v8185_v8 }
 0x765   : > { %v8215_v25 = vpop.f32.mrf.mxu3 }
 0x76a   : > { %v3557_v63 = vpop.f32.mrf.mxu0 }
 0x76b   : > { %v3558_v51 = vadd.f32 %v3557_v63, %v8187_v42 }
 0x76d   : > { %v8218_v29 = vpop.f32.mrf.mxu3 }
 0x772   : > { %6149 = vmatmul.msk.bf16.gmra.mxu3 %vm443_vm0, %v3585_v5  ;;  %v3560_v35 = vpop.f32.mrf.mxu0 }
 0x775   : > { %v3631_v53 = vpop.f32.mrf.mxu3 }
 0x776   : > { %v3676_v10 = vadd.f32 %v3631_v53, %v3541_v24 }
 0x778   : > { %v3696_v4 = vadd.f32 %v8221_v39, %v3676_v10  ;;  %v3561_v10 = vadd.f32 %v3560_v35, %v8191_v9 }
 0x77a   : > { %v3714_v26 = vmax.f32 %v3696_v4, 0.0  ;;  %v3562_v6 = vpop.f32.mrf.mxu0 }
 0x77d   : > { %v3633_v16 = vpop.f32.mrf.mxu3 }
 0x77e   : > { %v3677_v23 = vadd.f32 %v3633_v16, %v3543_v56 }
 0x780   : > { %v3697_v30 = vadd.f32 %v8221_v39, %v3677_v23 }
 0x782   : > { %v3715_v37 = vmax.f32 %v3697_v30, 0.0  ;;  %v3565_v16 = vpop.f32.mrf.mxu0 }
 0x784   : > { %v3732_v0 = vpack.c.bf16 %v3715_v37, %v3714_v26  ;;  %v3563_v26 = vadd.f32 %v3562_v6, %v8193_v31 }
 0x785   : > { %v3636_v52 = vpop.f32.mrf.mxu3 }
 0x786   : > { %v3678_v44 = vadd.f32 %v3636_v52, %v3546_v20  ;;  %6190 = vmatmul.msk.bf16.vlgmr.msrb.gmra.mxu1 %vm443_vm0, %v3732_v0 }
 0x788   : > { %v3698_v15 = vadd.f32 %v8221_v39, %v3678_v44 }
 0x78a   : > { %v3716_v48 = vmax.f32 %v3698_v15, 0.0  ;;  %v3567_v9 = vpop.f32.mrf.mxu0  ;;  %v3566_v15 = vadd.f32 %v3565_v16, %v8197_v32 }
 0x78c   : > { %v3749_v11 = vpack.c.bf16 %v3716_v48, %v3715_v37 }
 0x78d   : > { %v3638_v41 = vpop.f32.mrf.mxu3 }
 0x78e   : > { %v3679_v46 = vadd.f32 %v3638_v41, %v3548_v1  ;;  %6166 = vmatmul.msk.bf16.vlgmr.msrb.gmra.mxu0 %vm443_vm0, %v3749_v11  ;;  %v6700_v1 = vld [vmem:[#allocation5 + $0x330] sm:$0xff] }
 0x78f   : > { %v6696_v11 = vld [vmem:[#allocation5 + $0x310] sm:$0xff]  ;;  %4178 = vmatpush.bf16.msra.mxu0 %v6700_v1 }
 0x790   : > { %v3699_v45 = vadd.f32 %v8221_v39, %v3679_v46  ;;  %4267 = vmatpush.bf16.msra.mxu1 %v6696_v11 }
 0x792   : > { %v3717_v3 = vmax.f32 %v3699_v45, 0.0  ;;  %v3570_v46 = vpop.f32.mrf.mxu0 }
 0x794   : > { %v3733_v59 = vpack.c.bf16 %v3717_v3, %v3716_v48 }
 0x795   : > { %v3641_v40 = vpop.f32.mrf.mxu3 }
 0x796   : > { %v3680_v57 = vadd.f32 %v3641_v40, %v3551_v43  ;;  %6191 = vmatmul.msk.bf16.gmra.mxu1 %vm443_vm0, %v3733_v59  ;;  %6214 = vmatmul.msk.bf16.vlgmr.msrb.gmra.mxu2 %vm443_vm0, %v3733_v59 }
 0x798   : > { %v3700_v7 = vadd.f32 %v8221_v39, %v3680_v57 }
 0x79a   : > { %v3718_v61 = vmax.f32 %v3700_v7, 0.0  ;;  %v3572_v63 = vpop.f32.mrf.mxu0  ;;  %v3571_v7 = vadd.f32 %v3570_v46, %v8203_v55 }
 0x79c   : > { %v3750_v33 = vpack.c.bf16 %v3718_v61, %v3717_v3  ;;  %v3568_v3 = vadd.f32 %v3567_v9, %v8199_v22  ;;  %v6694_v9 = vld [vmem:[#allocation5 + $0x300] sm:$0xff] }
 0x79d   : > { %v3643_v13 = vpop.f32.mrf.mxu3 }
 0x79e   : > { %v3681_v27 = vadd.f32 %v3643_v13, %v3553_v60  ;;  %6167 = vmatmul.msk.bf16.gmra.mxu0 %vm443_vm0, %v3750_v33  ;;  %v3573_v13 = vadd.f32 %v3572_v63, %v8205_v17 }
 0x7a0   : > { %v3701_v34 = vadd.f32 %v8221_v39, %v3681_v27 }
 0x7a2   : > { %v3719_v12 = vmax.f32 %v3701_v34, 0.0  ;;  %v6703_v34 = vld [vmem:[#allocation5 + $0x348] sm:$0xff]  ;;  %v3575_v35 = vpop.f32.mrf.mxu0 }
 0x7a3   : > { %4349 = vmatpush.bf16.msra.mxu2 %v6703_v34  ;;  %v3576_v28 = vadd.f32 %v3575_v35, %v8209_v14 }
 0x7a4   : > { %v3734_v38 = vpack.c.bf16 %v3719_v12, %v3718_v61 }
 0x7a5   : > { %v3646_v2 = vpop.f32.mrf.mxu3 }
 0x7a6   : > { %v3682_v21 = vadd.f32 %v3646_v2, %v3556_v19  ;;  %6192 = vmatmul.msk.bf16.gmra.mxu1 %vm443_vm0, %v3734_v38  ;;  %6215 = vmatmul.msk.bf16.gmra.mxu2 %vm443_vm0, %v3734_v38  ;;  %v6699_v2 = vld [vmem:[#allocation5 + $0x328] sm:$0xff] }
 0x7a7   : > { %4179 = vmatpush.bf16.msra.mxu0 %v6699_v2 }
 0x7a8   : > { %v3702_v54 = vadd.f32 %v8221_v39, %v3682_v21  ;;  %v6695_v21 = vld [vmem:[#allocation5 + $0x308] sm:$0xff] }
 0x7a9   : > { %4268 = vmatpush.bf16.msra.mxu1 %v6695_v21 }
 0x7aa   : > { %v3720_v58 = vmax.f32 %v3702_v54, 0.0  ;;  %v3577_v17 = vpop.f32.mrf.mxu0 }
 0x7ac   : > { %v3751_v5 = vpack.c.bf16 %v3720_v58, %v3719_v12 }
 0x7ad   : > { %v3648_v53 = vpop.f32.mrf.mxu3  ;;  %4269 = vmatpush.bf16.msra.mxu1 %v6694_v9 }
 0x7ae   : > { %v3683_v8 = vadd.f32 %v3648_v53, %v3558_v51  ;;  %6168 = vmatmul.msk.bf16.gmra.mxu0 %vm443_vm0, %v3751_v5  ;;  %v3578_v5 = vadd.f32 %v3577_v17, %v8211_v18 }
 0x7b0   : > { %v3703_v24 = vadd.f32 %v8221_v39, %v3683_v8 }
 0x7b2   : > { %v3721_v50 = vmax.f32 %v3703_v24, 0.0 }
 0x7b4   : > { %v3735_v56 = vpack.c.bf16 %v3721_v50, %v3720_v58 }
 0x7b5   : > { %v3651_v4 = vpop.f32.mrf.mxu3 }
 0x7b6   : > { %v3684_v23 = vadd.f32 %v3651_v4, %v3561_v10  ;;  %6193 = vmatmul.msk.bf16.gmra.mxu1 %vm443_vm0, %v3735_v56  ;;  %6216 = vmatmul.msk.bf16.gmra.mxu2 %vm443_vm0, %v3735_v56 }
 0x7b8   : > { %v3704_v42 = vadd.f32 %v8221_v39, %v3684_v23 }
 0x7ba   : > { %v3722_v30 = vmax.f32 %v3704_v42, 0.0 }
 0x7bc   : > { %v3752_v37 = vpack.c.bf16 %v3722_v30, %v3721_v50  ;;  %v3580_v50 = vpop.f32.mrf.mxu0 }
 0x7bd   : > { %v3653_v20 = vpop.f32.mrf.mxu3  ;;  %v3581_v56 = vadd.f32 %v3580_v50, %v8215_v25  ;;  %v6698_v25 = vld [vmem:[#allocation5 + $0x320] sm:$0xff] }
 0x7be   : > { %v3685_v0 = vadd.f32 %v3653_v20, %v3563_v26  ;;  %6169 = vmatmul.msk.bf16.gmra.mxu0 %vm443_vm0, %v3752_v37 }
 0x7bf   : > { %4180 = vmatpush.bf16.msra.mxu0 %v6698_v25 }
 0x7c0   : > { %v3705_v52 = vadd.f32 %v8221_v39, %v3685_v0  ;;  %v6702_v0 = vld [vmem:[#allocation5 + $0x340] sm:$0xff] }
 0x7c1   : > { %4350 = vmatpush.bf16.msra.mxu2 %v6702_v0 }
 0x7c2   : > { %v3723_v44 = vmax.f32 %v3705_v52, 0.0 }
 0x7c4   : > { %v3736_v48 = vpack.c.bf16 %v3723_v44, %v3722_v30  ;;  %v3582_v30 = vpop.f32.mrf.mxu0 }
 0x7c5   : > { %v3656_v49 = vpop.f32.mrf.mxu3  ;;  %v3583_v26 = vadd.f32 %v3582_v30, %v8218_v29 }
 0x7c6   : > { %v3686_v41 = vadd.f32 %v3656_v49, %v3566_v15  ;;  %6194 = vmatmul.msk.bf16.gmra.mxu1 %vm443_vm0, %v3736_v48  ;;  %6217 = vmatmul.msk.bf16.gmra.mxu2 %vm443_vm0, %v3736_v48 }
 0x7c8   : > { %v3706_v31 = vadd.f32 %v8221_v39, %v3686_v41 }
 0x7ca   : > { %v3724_v45 = vmax.f32 %v3706_v31, 0.0 }
 0x7cc   : > { %v3753_v43 = vpack.c.bf16 %v3724_v45, %v3723_v44 }
 0x7cd   : > { %v3658_v59 = vpop.f32.mrf.mxu3 }
 0x7ce   : > { %v3687_v32 = vadd.f32 %v3658_v59, %v3568_v3  ;;  %6170 = vmatmul.msk.bf16.gmra.mxu0 %vm443_vm0, %v3753_v43  ;;  %v8281_v43 = vld [vmem:[#allocation7 + $0x7] ss:$0 sm:$0xff] }
 0x7d0   : > { %v3707_v40 = vadd.f32 %v8221_v39, %v3687_v32 }
 0x7d2   : > { %v3725_v57 = vmax.f32 %v3707_v40, 0.0 }
 0x7d4   : > { %v3737_v61 = vpack.c.bf16 %v3725_v57, %v3724_v45 }
 0x7d5   : > { %v3661_v60 = vpop.f32.mrf.mxu3 }
 0x7d6   : > { %v3688_v33 = vadd.f32 %v3661_v60, %v3571_v7  ;;  %6195 = vmatmul.msk.bf16.gmra.mxu1 %vm443_vm0, %v3737_v61  ;;  %6218 = vmatmul.msk.bf16.gmra.mxu2 %vm443_vm0, %v3737_v61 }
 0x7d8   : > { %v3708_v22 = vadd.f32 %v8221_v39, %v3688_v33 }
 0x7da   : > { %v3726_v62 = vmax.f32 %v3708_v22, 0.0 }
 0x7dc   : > { %v3754_v27 = vpack.c.bf16 %v3726_v62, %v3725_v57 }
 0x7dd   : > { %v3663_v12 = vpop.f32.mrf.mxu3 }
 0x7de   : > { %v3689_v19 = vadd.f32 %v3663_v12, %v3573_v13  ;;  %6171 = vmatmul.msk.bf16.gmra.mxu0 %vm443_vm0, %v3754_v27 }
 0x7e0   : > { %v3709_v55 = vadd.f32 %v8221_v39, %v3689_v19 }
 0x7e2   : > { %v3727_v38 = vmax.f32 %v3709_v55, 0.0 }
 0x7e4   : > { %v3738_v47 = vpack.c.bf16 %v3727_v38, %v3726_v62  ;;  %v6713_v62 = vld [vmem:[#allocation5 + $0x398] sm:$0xff] }
 0x7e5   : > { %v3666_v54 = vpop.f32.mrf.mxu3  ;;  %4507 = vmatpush.bf16.msra.mxu3 %v6713_v62 }
 0x7e6   : > { %v3690_v58 = vadd.f32 %v3666_v54, %v3576_v28  ;;  %6196 = vmatmul.msk.bf16.gmra.mxu1 %vm443_vm0, %v3738_v47  ;;  %6219 = vmatmul.msk.bf16.gmra.mxu2 %vm443_vm0, %v3738_v47 }
 0x7e8   : > { %v3710_v6 = vadd.f32 %v8221_v39, %v3690_v58 }
 0x7ea   : > { %v3728_v51 = vmax.f32 %v3710_v6, 0.0 }
 0x7ec   : > { %v3755_v53 = vpack.c.bf16 %v3728_v51, %v3727_v38 }
 0x7ed   : > { %v3668_v8 = vpop.f32.mrf.mxu3 }
 0x7ee   : > { %v3691_v14 = vadd.f32 %v3668_v8, %v3578_v5  ;;  %6172 = vmatmul.msk.bf16.gmra.mxu0 %vm443_vm0, %v3755_v53 }
 0x7f0   : > { %v3711_v24 = vadd.f32 %v8221_v39, %v3691_v14 }
 0x7f2   : > { %v3729_v10 = vmax.f32 %v3711_v24, 0.0 }
 0x7f4   : > { %v3739_v16 = vpack.c.bf16 %v3729_v10, %v3728_v51 }
 0x7f5   : > { %v3671_v4 = vpop.f32.mrf.mxu3 }
 0x7f6   : > { %v3692_v23 = vadd.f32 %v3671_v4, %v3581_v56  ;;  %6197 = vmatmul.msk.bf16.gmra.mxu1 %vm443_vm0, %v3739_v16  ;;  %6220 = vmatmul.msk.bf16.gmra.mxu2 %vm443_vm0, %v3739_v16 }
 0x7f8   : > { %v3712_v18 = vadd.f32 %v8221_v39, %v3692_v23 }
 0x7fa   : > { %v3730_v42 = vmax.f32 %v3712_v18, 0.0 }
 0x7fc   : > { %v3756_v37 = vpack.c.bf16 %v3730_v42, %v3729_v10 }
 0x7fd   : > { %v3673_v36 = vpop.f32.mrf.mxu3 }
 0x7fe   : > { %v3693_v20 = vadd.f32 %v3673_v36, %v3583_v26  ;;  %6173 = vmatmul.msk.bf16.gmra.mxu0 %vm443_vm0, %v3756_v37 }
 0x800   : > { %v3713_v52 = vadd.f32 %v8221_v39, %v3693_v20 }
 0x802   : > { %v3731_v44 = vmax.f32 %v3713_v52, 0.0 }
 0x803   : > { %v3920_v15 = vpop.f32.mrf.mxu1 }
 0x804   : > { %v3960_v48 = vpack.c.bf16 %v3731_v44, %v3730_v42  ;;  %v6712_v44 = vld [vmem:[#allocation5 + $0x390] sm:$0xff] }
 0x805   : > { %4508 = vmatpush.bf16.msra.mxu3 %v6712_v44 }
 0x806   : > { %6221 = vmatmul.msk.bf16.gmra.mxu2 %vm443_vm0, %v3960_v48 }
 0x80b   : > { %v3823_v1 = vpop.f32.mrf.mxu0  ;;  %v3922_v29 = vpop.f32.mrf.mxu1 }
 0x80c   : > { %v3921_v45 = vadd.f32 %v3920_v15, %v3823_v1 }
 0x813   : > { %v3825_v11 = vpop.f32.mrf.mxu0  ;;  %v3925_v49 = vpop.f32.mrf.mxu1 }
 0x814   : > { %v3923_v39 = vadd.f32 %v3922_v29, %v3825_v11 }
 0x819   : > { %v4006_v41 = vpop.f32.mrf.mxu2 }
 0x81a   : > { %v4046_v3 = vadd.f32 %v4006_v41, %v3921_v45 }
 0x81b   : > { %v3828_v31 = vpop.f32.mrf.mxu0  ;;  %v3927_v46 = vpop.f32.mrf.mxu1 }
 0x81c   : > { %v4064_v32 = vadd.f32 %v8281_v43, %v4046_v3  ;;  %v3926_v33 = vadd.f32 %v3925_v49, %v3828_v31 }
 0x81e   : > { %v4080_v61 = vmax.f32 %v4064_v32, 0.0 }
 0x821   : > { %v4008_v59 = vpop.f32.mrf.mxu2 }
 0x822   : > { %v4047_v40 = vadd.f32 %v4008_v59, %v3923_v39 }
 0x823   : > { %v3830_v57 = vpop.f32.mrf.mxu0  ;;  %v3930_v63 = vpop.f32.mrf.mxu1 }
 0x824   : > { %v4065_v7 = vadd.f32 %v8281_v43, %v4047_v40  ;;  %v3928_v55 = vadd.f32 %v3927_v46, %v3830_v57 }
 0x826   : > { %v4081_v60 = vmax.f32 %v4065_v7, 0.0 }
 0x828   : > { %v4096_v22 = vpack.c.bf16 %v4081_v60, %v4080_v61 }
 0x829   : > { %v4011_v13 = vpop.f32.mrf.mxu2 }
 0x82a   : > { %v4048_v27 = vadd.f32 %v4011_v13, %v3926_v33  ;;  %6261 = vmatmul.msk.bf16.vlgmr.msra.gmra.mxu1 %vm443_vm0, %v4096_v22 }
 0x82b   : > { %v3833_v34 = vpop.f32.mrf.mxu0  ;;  %v3932_v35 = vpop.f32.mrf.mxu1 }
 0x82c   : > { %v4066_v12 = vadd.f32 %v8281_v43, %v4048_v27  ;;  %v3931_v17 = vadd.f32 %v3930_v63, %v3833_v34 }
 0x82e   : > { %v4082_v19 = vmax.f32 %v4066_v12, 0.0 }
 0x830   : > { %v4112_v38 = vpack.c.bf16 %v4082_v19, %v4081_v60 }
 0x831   : > { %v4013_v28 = vpop.f32.mrf.mxu2 }
 0x832   : > { %v4049_v47 = vadd.f32 %v4013_v28, %v3928_v55  ;;  %6238 = vmatmul.msk.bf16.vlgmr.msra.gmra.mxu0 %vm443_vm0, %v4112_v38  ;;  %v6711_v28 = vld [vmem:[#allocation5 + $0x388] sm:$0xff] }
 0x833   : > { %v3835_v2 = vpop.f32.mrf.mxu0  ;;  %v3935_v54 = vpop.f32.mrf.mxu1  ;;  %4509 = vmatpush.bf16.msra.mxu3 %v6711_v28 }
 0x834   : > { %v4067_v21 = vadd.f32 %v8281_v43, %v4049_v47  ;;  %v3933_v50 = vadd.f32 %v3932_v35, %v3835_v2 }
 0x836   : > { %v4083_v58 = vmax.f32 %v4067_v21, 0.0 }
 0x838   : > { %v4097_v6 = vpack.c.bf16 %v4083_v58, %v4082_v19 }
 0x839   : > { %v4016_v51 = vpop.f32.mrf.mxu2 }
 0x83a   : > { %v4050_v5 = vadd.f32 %v4016_v51, %v3931_v17  ;;  %6262 = vmatmul.msk.bf16.gmra.mxu1 %vm443_vm0, %v4097_v6  ;;  %6284 = vmatmul.msk.bf16.vlgmr.msra.gmra.mxu2 %vm443_vm0, %v4097_v6 }
 0x83b   : > { %v3838_v53 = vpop.f32.mrf.mxu0  ;;  %v3937_v24 = vpop.f32.mrf.mxu1 }
 0x83c   : > { %v4068_v8 = vadd.f32 %v8281_v43, %v4050_v5  ;;  %v3936_v42 = vadd.f32 %v3935_v54, %v3838_v53 }
 0x83e   : > { %v4084_v14 = vmax.f32 %v4068_v8, 0.0 }
 0x840   : > { %v4113_v10 = vpack.c.bf16 %v4084_v14, %v4083_v58 }
 0x841   : > { %v4018_v56 = vpop.f32.mrf.mxu2 }
 0x842   : > { %v4051_v16 = vadd.f32 %v4018_v56, %v3933_v50  ;;  %6239 = vmatmul.msk.bf16.gmra.mxu0 %vm443_vm0, %v4113_v10 }
 0x843   : > { %v3840_v4 = vpop.f32.mrf.mxu0  ;;  %v3940_v26 = vpop.f32.mrf.mxu1 }
 0x844   : > { %v4069_v23 = vadd.f32 %v8281_v43, %v4051_v16  ;;  %v3938_v9 = vadd.f32 %v3937_v24, %v3840_v4 }
 0x846   : > { %v4085_v18 = vmax.f32 %v4069_v23, 0.0 }
 0x848   : > { %v4098_v30 = vpack.c.bf16 %v4085_v18, %v4084_v14 }
 0x849   : > { %v4021_v37 = vpop.f32.mrf.mxu2 }
 0x84a   : > { %v4052_v36 = vadd.f32 %v4021_v37, %v3936_v42  ;;  %6263 = vmatmul.msk.bf16.gmra.mxu1 %vm443_vm0, %v4098_v30  ;;  %6285 = vmatmul.msk.bf16.gmra.mxu2 %vm443_vm0, %v4098_v30 }
 0x84b   : > { %v3843_v20 = vpop.f32.mrf.mxu0  ;;  %v3942_v1 = vpop.f32.mrf.mxu1 }
 0x84c   : > { %v4070_v0 = vadd.f32 %v8281_v43, %v4052_v36  ;;  %v3941_v41 = vadd.f32 %v3940_v26, %v3843_v20 }
 0x84e   : > { %v4086_v25 = vmax.f32 %v4070_v0, 0.0 }
 0x850   : > { %v4114_v52 = vpack.c.bf16 %v4086_v25, %v4085_v18 }
 0x851   : > { %v4023_v15 = vpop.f32.mrf.mxu2 }
 0x852   : > { %v4053_v48 = vadd.f32 %v4023_v15, %v3938_v9  ;;  %6240 = vmatmul.msk.bf16.gmra.mxu0 %vm443_vm0, %v4114_v52  ;;  %v6710_v15 = vld [vmem:[#allocation5 + $0x380] sm:$0xff] }
 0x853   : > { %v3845_v29 = vpop.f32.mrf.mxu0  ;;  %v3945_v59 = vpop.f32.mrf.mxu1  ;;  %4510 = vmatpush.bf16.msra.mxu3 %v6710_v15 }
 0x854   : > { %v4071_v11 = vadd.f32 %v8281_v43, %v4053_v48  ;;  %v3943_v40 = vadd.f32 %v3942_v1, %v3845_v29 }
 0x856   : > { %v4087_v49 = vmax.f32 %v4071_v11, 0.0 }
 0x858   : > { %v4099_v31 = vpack.c.bf16 %v4087_v49, %v4086_v25 }
 0x859   : > { %v4026_v46 = vpop.f32.mrf.mxu2 }
 0x85a   : > { %v4054_v45 = vadd.f32 %v4026_v46, %v3941_v41  ;;  %6264 = vmatmul.msk.bf16.gmra.mxu1 %vm443_vm0, %v4099_v31  ;;  %6286 = vmatmul.msk.bf16.gmra.mxu2 %vm443_vm0, %v4099_v31  ;;  %v6717_v31 = vld [vmem:[#allocation5 + $0x3b8] sm:$0xff] }
 0x85b   : > { %v3848_v3 = vpop.f32.mrf.mxu0  ;;  %v3947_v22 = vpop.f32.mrf.mxu1  ;;  %4664 = vmatpush.bf16.msrb.mxu0 %v6717_v31 }
 0x85c   : > { %v4072_v39 = vadd.f32 %v8281_v43, %v4054_v45  ;;  %v3946_v62 = vadd.f32 %v3945_v59, %v3848_v3  ;;  %v6715_v59 = vld [vmem:[#allocation5 + $0x3a8] sm:$0xff] }
 0x85e   : > { %v4088_v32 = vmax.f32 %v4072_v39, 0.0  ;;  %v6716_v39 = vld [vmem:[#allocation5 + $0x3b0] sm:$0xff] }
 0x85f   : > { %4665 = vmatpush.bf16.msrb.mxu0 %v6716_v39 }
 0x860   : > { %v4115_v57 = vpack.c.bf16 %v4088_v32, %v4087_v49 }
 0x861   : > { %v4028_v63 = vpop.f32.mrf.mxu2 }
 0x862   : > { %v4055_v7 = vadd.f32 %v4028_v63, %v3943_v40  ;;  %6241 = vmatmul.msk.bf16.gmra.mxu0 %vm443_vm0, %v4115_v57  ;;  %v6714_v57 = vld [vmem:[#allocation5 + $0x3a0] sm:$0xff]  ;;  %v6709_v63 = vld [vmem:[#allocation5 + $0x378] sm:$0xff] }
 0x863   : > { %v3850_v60 = vpop.f32.mrf.mxu0  ;;  %v3950_v47 = vpop.f32.mrf.mxu1  ;;  %4666 = vmatpush.bf16.msrb.mxu0 %v6715_v59  ;;  %4588 = vmatpush.bf16.msrb.mxu3 %v6709_v63 }
 0x864   : > { %v4073_v61 = vadd.f32 %v8281_v43, %v4055_v7  ;;  %v3948_v55 = vadd.f32 %v3947_v22, %v3850_v60 }
 0x866   : > { %v4089_v33 = vmax.f32 %v4073_v61, 0.0 }
 0x867   : > { %4667 = vmatpush.bf16.msrb.mxu0 %v6714_v57 }
 0x868   : > { %v4100_v13 = vpack.c.bf16 %v4089_v33, %v4088_v32 }
 0x869   : > { %v4031_v27 = vpop.f32.mrf.mxu2 }
 0x86a   : > { %v4056_v34 = vadd.f32 %v4031_v27, %v3946_v62  ;;  %6265 = vmatmul.msk.bf16.gmra.mxu1 %vm443_vm0, %v4100_v13  ;;  %6287 = vmatmul.msk.bf16.gmra.mxu2 %vm443_vm0, %v4100_v13 }
 0x86b   : > { %v3853_v19 = vpop.f32.mrf.mxu0  ;;  %v3952_v8 = vpop.f32.mrf.mxu1 }
 0x86c   : > { %v4074_v35 = vadd.f32 %v8281_v43, %v4056_v34  ;;  %v3951_v17 = vadd.f32 %v3950_v47, %v3853_v19 }
 0x86e   : > { %v4090_v12 = vmax.f32 %v4074_v35, 0.0 }
 0x870   : > { %v4116_v38 = vpack.c.bf16 %v4090_v12, %v4089_v33  ;;  %v8320_v33 = vld [vmem:[#allocation7 + $0x8] ss:$0 sm:$0xff] }
 0x871   : > { %v4033_v2 = vpop.f32.mrf.mxu2 }
 0x872   : > { %v4057_v21 = vadd.f32 %v4033_v2, %v3948_v55  ;;  %6242 = vmatmul.msk.bf16.gmra.mxu0 %vm443_vm0, %v4116_v38 }
 0x873   : > { %v3855_v51 = vpop.f32.mrf.mxu0  ;;  %v3955_v18 = vpop.f32.mrf.mxu1 }
 0x874   : > { %v4075_v54 = vadd.f32 %v8281_v43, %v4057_v21  ;;  %v3953_v50 = vadd.f32 %v3952_v8, %v3855_v51 }
 0x876   : > { %v4091_v58 = vmax.f32 %v4075_v54, 0.0 }
 0x878   : > { %v4101_v6 = vpack.c.bf16 %v4091_v58, %v4090_v12 }
 0x879   : > { %v4036_v5 = vpop.f32.mrf.mxu2 }
 0x87a   : > { %v4058_v53 = vadd.f32 %v4036_v5, %v3951_v17  ;;  %6266 = vmatmul.msk.bf16.gmra.mxu1 %vm443_vm0, %v4101_v6  ;;  %6288 = vmatmul.msk.bf16.gmra.mxu2 %vm443_vm0, %v4101_v6  ;;  %v6708_v5 = vld [vmem:[#allocation5 + $0x370] sm:$0xff] }
 0x87b   : > { %v3858_v4 = vpop.f32.mrf.mxu0  ;;  %v3957_v9 = vpop.f32.mrf.mxu1  ;;  %4589 = vmatpush.bf16.msrb.mxu3 %v6708_v5 }
 0x87c   : > { %v4076_v14 = vadd.f32 %v8281_v43, %v4058_v53  ;;  %v3956_v30 = vadd.f32 %v3955_v18, %v3858_v4 }
 0x87e   : > { %v4092_v24 = vmax.f32 %v4076_v14, 0.0 }
 0x880   : > { %v4117_v10 = vpack.c.bf16 %v4092_v24, %v4091_v58 }
 0x881   : > { %v4038_v56 = vpop.f32.mrf.mxu2 }
 0x882   : > { %v4059_v16 = vadd.f32 %v4038_v56, %v3953_v50  ;;  %6243 = vmatmul.msk.bf16.gmra.mxu0 %vm443_vm0, %v4117_v10 }
 0x883   : > { %v3860_v0 = vpop.f32.mrf.mxu0 }
 0x884   : > { %v4077_v23 = vadd.f32 %v8281_v43, %v4059_v16  ;;  %v3958_v52 = vadd.f32 %v3957_v9, %v3860_v0 }
 0x886   : > { %v4093_v42 = vmax.f32 %v4077_v23, 0.0 }
 0x888   : > { %v4102_v26 = vpack.c.bf16 %v4093_v42, %v4092_v24 }
 0x889   : > { %v4041_v37 = vpop.f32.mrf.mxu2 }
 0x88a   : > { %v4060_v36 = vadd.f32 %v4041_v37, %v3956_v30  ;;  %6267 = vmatmul.msk.bf16.gmra.mxu1 %vm443_vm0, %v4102_v26  ;;  %6289 = vmatmul.msk.bf16.gmra.mxu2 %vm443_vm0, %v4102_v26 }
 0x88c   : > { %v4078_v20 = vadd.f32 %v8281_v43, %v4060_v36 }
 0x88e   : > { %v4094_v25 = vmax.f32 %v4078_v20, 0.0 }
 0x890   : > { %v4118_v44 = vpack.c.bf16 %v4094_v25, %v4093_v42 }
 0x891   : > { %v4043_v48 = vpop.f32.mrf.mxu2 }
 0x892   : > { %v4061_v1 = vadd.f32 %v4043_v48, %v3958_v52  ;;  %6244 = vmatmul.msk.bf16.gmra.mxu0 %vm443_vm0, %v4118_v44  ;;  %v6707_v48 = vld [vmem:[#allocation5 + $0x368] sm:$0xff] }
 0x893   : > { %4590 = vmatpush.bf16.msrb.mxu3 %v6707_v48 }
 0x894   : > { %v4079_v29 = vadd.f32 %v8281_v43, %v4061_v1 }
 0x896   : > { %v4095_v11 = vmax.f32 %v4079_v29, 0.0 }
 0x898   : > { %v4306_v49 = vpack.c.bf16 %v4095_v11, %v4094_v25 }
 0x89a   : > { %6290 = vmatmul.msk.bf16.gmra.mxu2 %vm443_vm0, %v4306_v49 }
 0x8a7   : > { %v4271_v41 = vpop.f32.mrf.mxu1 }
 0x8af   : > { %v4182_v46 = vpop.f32.mrf.mxu0  ;;  %v4273_v45 = vpop.f32.mrf.mxu1 }
 0x8b0   : > { %v4272_v3 = vadd.f32 %v4271_v41, %v4182_v46 }
 0x8b7   : > { %v4184_v32 = vpop.f32.mrf.mxu0  ;;  %v4276_v40 = vpop.f32.mrf.mxu1 }
 0x8b8   : > { %v4274_v22 = vadd.f32 %v4273_v45, %v4184_v32 }
 0x8bd   : > { %v4352_v43 = vpop.f32.mrf.mxu2 }
 0x8be   : > { %v4387_v7 = vadd.f32 %v4352_v43, %v4272_v3 }
 0x8bf   : > { %v4187_v61 = vpop.f32.mrf.mxu0  ;;  %v4278_v60 = vpop.f32.mrf.mxu1 }
 0x8c0   : > { %v4403_v13 = vadd.f32 %v8320_v33, %v4387_v7  ;;  %v4277_v38 = vadd.f32 %v4276_v40, %v4187_v61 }
 0x8c2   : > { %v4417_v19 = vmax.f32 %v4403_v13, 0.0 }
 0x8c5   : > { %v4354_v62 = vpop.f32.mrf.mxu2 }
 0x8c6   : > { %v4388_v27 = vadd.f32 %v4354_v62, %v4274_v22 }
 0x8c7   : > { %v4189_v34 = vpop.f32.mrf.mxu0  ;;  %v4281_v12 = vpop.f32.mrf.mxu1 }
 0x8c8   : > { %v4404_v35 = vadd.f32 %v8320_v33, %v4388_v27  ;;  %v4279_v6 = vadd.f32 %v4278_v60, %v4189_v34  ;;  %v6706_v34 = vld [vmem:[#allocation5 + $0x360] sm:$0xff] }
 0x8c9   : > { %4591 = vmatpush.bf16.msrb.mxu3 %v6706_v34 }
 0x8ca   : > { %v4418_v55 = vmax.f32 %v4404_v35, 0.0 }
 0x8cc   : > { %v8324_v28 = vpack.c.bf16 %v4418_v55, %v4417_v19 }
 0x8cd   : > { %v4357_v47 = vpop.f32.mrf.mxu2 }
 0x8ce   : > { %v4389_v2 = vadd.f32 %v4357_v47, %v4277_v38 }
 0x8cf   : > { %v4192_v21 = vpop.f32.mrf.mxu0  ;;  %v4283_v17 = vpop.f32.mrf.mxu1 }
 0x8d0   : > { %v4405_v54 = vadd.f32 %v8320_v33, %v4389_v2  ;;  %v4282_v10 = vadd.f32 %v4281_v12, %v4192_v21 }
 0x8d2   : > { %v4419_v58 = vmax.f32 %v4405_v54, 0.0 }
 0x8d4   : > { %v4446_v51 = vpack.c.bf16 %v4419_v58, %v4418_v55 }
 0x8d5   : > { %v4359_v53 = vpop.f32.mrf.mxu2 }
 0x8d6   : > { %v4390_v8 = vadd.f32 %v4359_v53, %v4279_v6  ;;  %6307 = vmatmul.msk.bf16.vlgmr.msra.gmra.mxu3 %vm443_vm0, %v4446_v51 }
 0x8d7   : > { %v4194_v14 = vpop.f32.mrf.mxu0  ;;  %v4286_v16 = vpop.f32.mrf.mxu1 }
 0x8d8   : > { %v4406_v24 = vadd.f32 %v8320_v33, %v4390_v8  ;;  %v4284_v26 = vadd.f32 %v4283_v17, %v4194_v14 }
 0x8da   : > { %v4420_v50 = vmax.f32 %v4406_v24, 0.0 }
 0x8dc   : > { %v8329_v56 = vpack.c.bf16 %v4420_v50, %v4419_v58 }
 0x8dd   : > { %v4362_v4 = vpop.f32.mrf.mxu2 }
 0x8de   : > { %v4391_v23 = vadd.f32 %v4362_v4, %v4282_v10  ;;  %6351 = vmatmul.msk.bf16.vlgmr.msrb.gmra.mxu0 %vm443_vm0, %v8329_v56 }
 0x8df   : > { %v4197_v18 = vpop.f32.mrf.mxu0  ;;  %v4288_v0 = vpop.f32.mrf.mxu1 }
 0x8e0   : > { %v4407_v42 = vadd.f32 %v8320_v33, %v4391_v23  ;;  %v4287_v44 = vadd.f32 %v4286_v16, %v4197_v18 }
 0x8e2   : > { %v4421_v30 = vmax.f32 %v4407_v42, 0.0 }
 0x8e4   : > { %v4447_v37 = vpack.c.bf16 %v4421_v30, %v4420_v50 }
 0x8e5   : > { %v4364_v36 = vpop.f32.mrf.mxu2 }
 0x8e6   : > { %v4392_v20 = vadd.f32 %v4364_v36, %v4284_v26  ;;  %6308 = vmatmul.msk.bf16.gmra.mxu3 %vm443_vm0, %v4447_v37 }
 0x8e7   : > { %v4199_v25 = vpop.f32.mrf.mxu0  ;;  %v4291_v41 = vpop.f32.mrf.mxu1 }
 0x8e8   : > { %v4408_v9 = vadd.f32 %v8320_v33, %v4392_v20  ;;  %v4289_v46 = vadd.f32 %v4288_v0, %v4199_v25 }
 0x8ea   : > { %v4422_v52 = vmax.f32 %v4408_v9, 0.0 }
 0x8ec   : > { %v8336_v15 = vpack.c.bf16 %v4422_v52, %v4421_v30 }
 0x8ed   : > { %v4367_v1 = vpop.f32.mrf.mxu2 }
 0x8ee   : > { %v4393_v29 = vadd.f32 %v4367_v1, %v4287_v44  ;;  %6352 = vmatmul.msk.bf16.gmra.mxu0 %vm443_vm0, %v8336_v15  ;;  %v6725_v1 = vld [vmem:[#allocation8 + $0x38] sm:$0xff] }
 0x8ef   : > { %v4202_v11 = vpop.f32.mrf.mxu0  ;;  %v4293_v57 = vpop.f32.mrf.mxu1  ;;  %4916 = vmatpush.bf16.msrb.mxu2 %v6725_v1  ;;  %v6744_v1 = vld [vmem:[#allocation8 + $0xd0] sm:$0xff] }
 0x8f0   : > { %v4409_v49 = vadd.f32 %v8320_v33, %v4393_v29  ;;  %v4292_v63 = vadd.f32 %v4291_v41, %v4202_v11  ;;  %v6721_v29 = vld [vmem:[#allocation8 + $0x18] sm:$0xff]  ;;  %v6724_v11 = vld [vmem:[#allocation8 + $0x30] sm:$0xff] }
 0x8f1   : > { %4876 = vmatpush.bf16.msrb.mxu1 %v6721_v29 }
 0x8f2   : > { %v4423_v31 = vmax.f32 %v4409_v49, 0.0  ;;  %v6720_v49 = vld [vmem:[#allocation8 + $0x10] sm:$0xff] }
 0x8f3   : > { %4917 = vmatpush.bf16.msrb.mxu2 %v6724_v11 }
 0x8f4   : > { %v4448_v45 = vpack.c.bf16 %v4423_v31, %v4422_v52 }
 0x8f5   : > { %v4369_v3 = vpop.f32.mrf.mxu2  ;;  %4877 = vmatpush.bf16.msrb.mxu1 %v6720_v49 }
 0x8f6   : > { %v4394_v39 = vadd.f32 %v4369_v3, %v4289_v46  ;;  %6309 = vmatmul.msk.bf16.gmra.mxu3 %vm443_vm0, %v4448_v45  ;;  %v6723_v46 = vld [vmem:[#allocation8 + $0x28] sm:$0xff] }
 0x8f7   : > { %v4204_v32 = vpop.f32.mrf.mxu0  ;;  %v4296_v35 = vpop.f32.mrf.mxu1  ;;  %v6719_v45 = vld [vmem:[#allocation8 + $0x8] sm:$0xff]  ;;  %4918 = vmatpush.bf16.msrb.mxu2 %v6723_v46 }
 0x8f8   : > { %v4410_v59 = vadd.f32 %v8320_v33, %v4394_v39  ;;  %v4294_v13 = vadd.f32 %v4293_v57, %v4204_v32  ;;  %v6722_v39 = vld [vmem:[#allocation8 + $0x20] sm:$0xff] }
 0x8f9   : > { %4878 = vmatpush.bf16.msrb.mxu1 %v6719_v45  ;;  %v6718_v32 = vld [vmem:[#allocation8] sm:$0xff] }
 0x8fa   : > { %v4424_v40 = vmax.f32 %v4410_v59, 0.0 }
 0x8fb   : > { %4919 = vmatpush.bf16.msrb.mxu2 %v6722_v39  ;;  %v6748_v39 = vld [vmem:[#allocation8 + $0xf0] sm:$0xff] }
 0x8fc   : > { %v8343_v43 = vpack.c.bf16 %v4424_v40, %v4423_v31 }
 0x8fd   : > { %v4372_v7 = vpop.f32.mrf.mxu2  ;;  %4879 = vmatpush.bf16.msrb.mxu1 %v6718_v32  ;;  %v6742_v32 = vld [vmem:[#allocation8 + $0xc0] sm:$0xff] }
 0x8fe   : > { %v4395_v61 = vadd.f32 %v4372_v7, %v4292_v63  ;;  %6353 = vmatmul.msk.bf16.gmra.mxu0 %vm443_vm0, %v8343_v43  ;;  %v6729_v63 = vld [vmem:[#allocation8 + $0x58] sm:$0xff]  ;;  %v6728_v7 = vld [vmem:[#allocation8 + $0x50] sm:$0xff] }
 0x8ff   : > { %v4207_v62 = vpop.f32.mrf.mxu0  ;;  %v4298_v17 = vpop.f32.mrf.mxu1 }
 0x900   : > { %v4411_v60 = vadd.f32 %v8320_v33, %v4395_v61  ;;  %v4297_v47 = vadd.f32 %v4296_v35, %v4207_v62  ;;  %v6731_v35 = vld [vmem:[#allocation8 + $0x68] sm:$0xff] }
 0x901   : > { %4956 = vmatpush.bf16.msra.mxu1 %v6729_v63 }
 0x902   : > { %v4425_v22 = vmax.f32 %v4411_v60, 0.0  ;;  %v6733_v60 = vld [vmem:[#allocation8 + $0x78] sm:$0xff] }
 0x903   : > { %4996 = vmatpush.bf16.msra.mxu2 %v6733_v60 }
 0x904   : > { %v4449_v27 = vpack.c.bf16 %v4425_v22, %v4424_v40 }
 0x905   : > { %v4374_v12 = vpop.f32.mrf.mxu2  ;;  %4957 = vmatpush.bf16.msra.mxu1 %v6728_v7 }
 0x906   : > { %v4396_v19 = vadd.f32 %v4374_v12, %v4294_v13  ;;  %6310 = vmatmul.msk.bf16.gmra.mxu3 %vm443_vm0, %v4449_v27  ;;  %v6732_v13 = vld [vmem:[#allocation8 + $0x70] sm:$0xff]  ;;  %v6726_v27 = vld [vmem:[#allocation8 + $0x40] sm:$0xff] }
 0x907   : > { %v4209_v21 = vpop.f32.mrf.mxu0  ;;  %v4301_v10 = vpop.f32.mrf.mxu1  ;;  %4997 = vmatpush.bf16.msra.mxu2 %v6732_v13  ;;  %v6730_v12 = vld [vmem:[#allocation8 + $0x60] sm:$0xff] }
 0x908   : > { %v4412_v55 = vadd.f32 %v8320_v33, %v4396_v19  ;;  %v4299_v5 = vadd.f32 %v4298_v17, %v4209_v21  ;;  %v6737_v17 = vld [vmem:[#allocation8 + $0x98] sm:$0xff] }
 0x90a   : > { %v4426_v38 = vmax.f32 %v4412_v55, 0.0 }
 0x90b   : > { %4998 = vmatpush.bf16.msra.mxu2 %v6731_v35  ;;  %v6746_v35 = vld [vmem:[#allocation8 + $0xe0] sm:$0xff] }
 0x90c   : > { %v4435_v2 = vpack.c.bf16 %v4426_v38, %v4425_v22  ;;  %v6727_v22 = vld [vmem:[#allocation8 + $0x48] sm:$0xff] }
 0x90d   : > { %v4377_v54 = vpop.f32.mrf.mxu2  ;;  %4958 = vmatpush.bf16.msra.mxu1 %v6727_v22  ;;  %v6747_v22 = vld [vmem:[#allocation8 + $0xe8] sm:$0xff] }
 0x90e   : > { %v4397_v58 = vadd.f32 %v4377_v54, %v4297_v47  ;;  %6354 = vmatmul.msk.bf16.gmra.mxu0 %vm443_vm0, %v4435_v2  ;;  %v8387_v47 = vld [vmem:[#allocation7 + $0x9] ss:$0 sm:$0xff] }
 0x90f   : > { %v4212_v24 = vpop.f32.mrf.mxu0  ;;  %v4303_v36 = vpop.f32.mrf.mxu1  ;;  %4999 = vmatpush.bf16.msra.mxu2 %v6730_v12  ;;  %v6752_v12 = vld [vmem:[#allocation8 + $0x110] sm:$0xff] }
 0x910   : > { %v4413_v6 = vadd.f32 %v8320_v33, %v4397_v58  ;;  %v4302_v4 = vadd.f32 %v4301_v10, %v4212_v24  ;;  %v6741_v10 = vld [vmem:[#allocation8 + $0xb8] sm:$0xff] }
 0x911   : > { %4959 = vmatpush.bf16.msra.mxu1 %v6726_v27 }
 0x912   : > { %v4427_v51 = vmax.f32 %v4413_v6, 0.0 }
 0x914   : > { %v4450_v53 = vpack.c.bf16 %v4427_v51, %v4426_v38 }
 0x915   : > { %v4379_v8 = vpop.f32.mrf.mxu2 }
 0x916   : > { %v4398_v14 = vadd.f32 %v4379_v8, %v4299_v5  ;;  %6311 = vmatmul.msk.bf16.gmra.mxu3 %vm443_vm0, %v4450_v53  ;;  %v6736_v8 = vld [vmem:[#allocation8 + $0x90] sm:$0xff] }
 0x917   : > { %v4214_v26 = vpop.f32.mrf.mxu0 }
 0x918   : > { %v4414_v50 = vadd.f32 %v8320_v33, %v4398_v14  ;;  %v4304_v20 = vadd.f32 %v4303_v36, %v4214_v26  ;;  %v6734_v26 = vld [vmem:[#allocation8 + $0x80] sm:$0xff] }
 0x91a   : > { %v4428_v16 = vmax.f32 %v4414_v50, 0.0 }
 0x91c   : > { %v4436_v23 = vpack.c.bf16 %v4428_v16, %v4427_v51 }
 0x91d   : > { %v4382_v18 = vpop.f32.mrf.mxu2 }
 0x91e   : > { %v4399_v42 = vadd.f32 %v4382_v18, %v4302_v4  ;;  %6355 = vmatmul.msk.bf16.gmra.mxu0 %vm443_vm0, %v4436_v23 }
 0x920   : > { %v4415_v30 = vadd.f32 %v8320_v33, %v4399_v42 }
 0x922   : > { %v4429_v37 = vmax.f32 %v4415_v30, 0.0  ;;  %v6740_v30 = vld [vmem:[#allocation8 + $0xb0] sm:$0xff] }
 0x924   : > { %v4451_v0 = vpack.c.bf16 %v4429_v37, %v4428_v16  ;;  %v6735_v16 = vld [vmem:[#allocation8 + $0x88] sm:$0xff] }
 0x925   : > { %v4384_v25 = vpop.f32.mrf.mxu2 }
 0x926   : > { %v4400_v9 = vadd.f32 %v4384_v25, %v4304_v20  ;;  %6312 = vmatmul.msk.bf16.gmra.mxu3 %vm443_vm0, %v4451_v0  ;;  %v6739_v0 = vld [vmem:[#allocation8 + $0xa8] sm:$0xff]  ;;  %v6745_v25 = vld [vmem:[#allocation8 + $0xd8] sm:$0xff] }
 0x928   : > { %v4416_v52 = vadd.f32 %v8320_v33, %v4400_v9 }
 0x92a   : > { %v4430_v44 = vmax.f32 %v4416_v52, 0.0 }
 0x92c   : > { %v4623_v48 = vpack.c.bf16 %v4430_v44, %v4429_v37 }
 0x92e   : > { %6356 = vmatmul.msk.bf16.gmra.mxu0 %vm443_vm0, %v4623_v48  ;;  %v6738_v48 = vld [vmem:[#allocation8 + $0xa0] sm:$0xff] }
 0x936   : > { %6329 = vmatmul.msk.bf16.vlgmr.msrb.gmra.mxu3 %vm443_vm0, %v8324_v28 }
 0x946   : > { %6330 = vmatmul.msk.bf16.gmra.mxu3 %vm443_vm0, %v8329_v56 }
 0x956   : > { %6331 = vmatmul.msk.bf16.gmra.mxu3 %vm443_vm0, %v8336_v15 }
 0x959   : > { %v4512_v33 = vpop.f32.mrf.mxu3 }
 0x961   : > { %v4514_v41 = vpop.f32.mrf.mxu3 }
 0x966   : > { %6332 = vmatmul.msk.bf16.gmra.mxu3 %vm443_vm0, %v8343_v43  ;;  %v4669_v43 = vpop.f32.mrf.mxu0 }
 0x969   : > { %v4517_v28 = vpop.f32.mrf.mxu3 }
 0x96e   : > { %v4671_v62 = vpop.f32.mrf.mxu0 }
 0x971   : > { %v8367_v31 = vpop.f32.mrf.mxu3 }
 0x976   : > { %6333 = vmatmul.msk.bf16.gmra.mxu3 %vm443_vm0, %v4435_v2  ;;  %v4674_v19 = vpop.f32.mrf.mxu0 }
 0x979   : > { %v8370_v56 = vpop.f32.mrf.mxu3 }
 0x97e   : > { %v4676_v5 = vpop.f32.mrf.mxu0 }
 0x981   : > { %v8372_v15 = vpop.f32.mrf.mxu3 }
 0x986   : > { %6334 = vmatmul.msk.bf16.gmra.mxu3 %vm443_vm0, %v4436_v23  ;;  %v4679_v42 = vpop.f32.mrf.mxu0 }
 0x989   : > { %v8375_v3 = vpop.f32.mrf.mxu3 }
 0x98e   : > { %v4681_v11 = vpop.f32.mrf.mxu0 }
 0x991   : > { %v8377_v59 = vpop.f32.mrf.mxu3 }
 0x996   : > { %v4684_v7 = vpop.f32.mrf.mxu0 }
 0x999   : > { %v8379_v40 = vpop.f32.mrf.mxu3 }
 0x9a1   : > { %v8381_v57 = vpop.f32.mrf.mxu3 }
 0x9a9   : > { %v8383_v61 = vpop.f32.mrf.mxu3 }
 0x9b1   : > { %v8385_v34 = vpop.f32.mrf.mxu3 }
 0x9b9   : > { %v4593_v55 = vpop.f32.mrf.mxu3 }
 0x9ba   : > { %v4594_v38 = vadd.f32 %v4593_v55, %v4512_v33 }
 0x9bc   : > { %v4699_v2 = vadd.f32 %v4669_v43, %v4594_v38 }
 0x9be   : > { %v4713_v21 = vadd.f32 %v8387_v47, %v4699_v2  ;;  %v6757_v2 = vld [vmem:[#allocation8 + $0x138] sm:$0xff] }
 0x9c0   : > { %v4725_v54 = vmax.f32 %v4713_v21, 0.0  ;;  %v6751_v21 = vld [vmem:[#allocation8 + $0x108] sm:$0xff] }
 0x9c1   : > { %v4595_v58 = vpop.f32.mrf.mxu3 }
 0x9c2   : > { %v4737_v6 = vpack.c.bf16 %v4725_v54, %v4725_v54  ;;  %v4596_v51 = vadd.f32 %v4595_v58, %v4514_v41  ;;  %v6749_v41 = vld [vmem:[#allocation8 + $0xf8] sm:$0xff] }
 0x9c4   : > { %v4700_v53 = vadd.f32 %v4671_v62, %v4596_v51  ;;  %6373 = vmatmul.msk.bf16.vlgmr.msrb.gmra.mxu1 %vm443_vm0, %v4737_v6  ;;  %v6753_v62 = vld [vmem:[#allocation8 + $0x118] sm:$0xff]  ;;  %v6756_v6 = vld [vmem:[#allocation8 + $0x130] sm:$0xff]  ;;  %v6750_v51 = vld [vmem:[#allocation8 + $0x100] sm:$0xff] }
 0x9c5   : > { %5036 = vmatpush.bf16.msrb.mxu1 %v6737_v17  ;;  %v4686_v17 = vpop.f32.mrf.mxu0 }
 0x9c6   : > { %v4714_v14 = vadd.f32 %v8387_v47, %v4700_v53 }
 0x9c8   : > { %v4726_v24 = vmax.f32 %v4714_v14, 0.0  ;;  %v6755_v14 = vld [vmem:[#allocation8 + $0x128] sm:$0xff] }
 0x9c9   : > { %v4598_v50 = vpop.f32.mrf.mxu3  ;;  %5037 = vmatpush.bf16.msrb.mxu1 %v6736_v8 }
 0x9ca   : > { %v4738_v4 = vpack.c.bf16 %v4726_v24, %v4726_v24  ;;  %v4599_v23 = vadd.f32 %v4598_v50, %v4517_v28  ;;  %v6743_v28 = vld [vmem:[#allocation8 + $0xc8] sm:$0xff]  ;;  %v6761_v24 = vld [vmem:[#allocation8 + $0x158] sm:$0xff] }
 0x9cc   : > { %v4701_v18 = vadd.f32 %v4674_v19, %v4599_v23  ;;  %6390 = vmatmul.msk.bf16.vlgmr.msrb.gmra.mxu2 %vm443_vm0, %v4738_v4  ;;  %v6754_v4 = vld [vmem:[#allocation8 + $0x120] sm:$0xff]  ;;  %v6760_v23 = vld [vmem:[#allocation8 + $0x150] sm:$0xff] }
 0x9cd   : > { %5076 = vmatpush.bf16.msrb.mxu2 %v6741_v10  ;;  %5038 = vmatpush.bf16.msrb.mxu1 %v6735_v16  ;;  %v4689_v16 = vpop.f32.mrf.mxu0 }
 0x9ce   : > { %v4715_v37 = vadd.f32 %v8387_v47, %v4701_v18 }
 0x9d0   : > { %v4727_v36 = vmax.f32 %v4715_v37, 0.0  ;;  %v6759_v37 = vld [vmem:[#allocation8 + $0x148] sm:$0xff] }
 0x9d1   : > { %v4600_v20 = vpop.f32.mrf.mxu3  ;;  %5077 = vmatpush.bf16.msrb.mxu2 %v6740_v30  ;;  %5039 = vmatpush.bf16.msrb.mxu1 %v6734_v26  ;;  %v6765_v26 = vld [vmem:[#allocation8 + $0x178] sm:$0xff] }
 0x9d2   : > { %v4739_v9 = vpack.c.bf16 %v4727_v36, %v4727_v36  ;;  %v4601_v52 = vadd.f32 %v4600_v20, %v8367_v31 }
 0x9d4   : > { %v4702_v44 = vadd.f32 %v4676_v5, %v4601_v52  ;;  %6407 = vmatmul.msk.bf16.vlgmr.msra.gmra.mxu1 %vm443_vm0, %v4739_v9 }
 0x9d5   : > { %5078 = vmatpush.bf16.msrb.mxu2 %v6739_v0  ;;  %5116 = vmatpush.bf16.msra.mxu1 %v6745_v25  ;;  %v6764_v0 = vld [vmem:[#allocation8 + $0x170] sm:$0xff]  ;;  %v6758_v25 = vld [vmem:[#allocation8 + $0x140] sm:$0xff]  ;;  %v4691_v52 = vpop.f32.mrf.mxu0 }
 0x9d6   : > { %v4716_v29 = vadd.f32 %v8387_v47, %v4702_v44 }
 0x9d8   : > { %v4728_v33 = vmax.f32 %v4716_v29, 0.0 }
 0x9d9   : > { %v4603_v49 = vpop.f32.mrf.mxu3  ;;  %5079 = vmatpush.bf16.msrb.mxu2 %v6738_v48  ;;  %5117 = vmatpush.bf16.msra.mxu1 %v6744_v1  ;;  %v6763_v1 = vld [vmem:[#allocation8 + $0x168] sm:$0xff] }
 0x9da   : > { %v4740_v46 = vpack.c.bf16 %v4728_v33, %v4728_v33  ;;  %v4604_v45 = vadd.f32 %v4603_v49, %v8370_v56 }
 0x9dc   : > { %v4703_v31 = vadd.f32 %v4679_v42, %v4604_v45  ;;  %6424 = vmatmul.msk.bf16.vlgmr.msra.gmra.mxu2 %vm443_vm0, %v4740_v46 }
 0x9dd   : > { %5156 = vmatpush.bf16.msra.mxu2 %v6749_v41  ;;  %5118 = vmatpush.bf16.msra.mxu1 %v6743_v28  ;;  %v4694_v28 = vpop.f32.mrf.mxu0 }
 0x9de   : > { %v4717_v63 = vadd.f32 %v8387_v47, %v4703_v31 }
 0x9e0   : > { %v4729_v43 = vmax.f32 %v4717_v63, 0.0 }
 0x9e1   : > { %v4605_v60 = vpop.f32.mrf.mxu3  ;;  %5157 = vmatpush.bf16.msra.mxu2 %v6748_v39  ;;  %5119 = vmatpush.bf16.msra.mxu1 %v6742_v32 }
 0x9e2   : > { %v4741_v13 = vpack.c.bf16 %v4729_v43, %v4729_v43  ;;  %v4606_v27 = vadd.f32 %v4605_v60, %v8372_v15 }
 0x9e4   : > { %v4704_v56 = vadd.f32 %v4681_v11, %v4606_v27  ;;  %6441 = vmatmul.msk.bf16.vlgmr.msrb.gmra.mxu1 %vm443_vm0, %v4741_v13 }
 0x9e5   : > { %5158 = vmatpush.bf16.msra.mxu2 %v6747_v22  ;;  %5196 = vmatpush.bf16.msrb.mxu1 %v6753_v62  ;;  %v4696_v60 = vpop.f32.mrf.mxu0 }
 0x9e6   : > { %v4718_v19 = vadd.f32 %v8387_v47, %v4704_v56  ;;  %v6772_v56 = vld [vmem:[#allocation10 + $0x30] sm:$0xff] }
 0x9e8   : > { %v4730_v55 = vmax.f32 %v4718_v19, 0.0 }
 0x9e9   : > { %v4608_v38 = vpop.f32.mrf.mxu3  ;;  %5159 = vmatpush.bf16.msra.mxu2 %v6746_v35  ;;  %5197 = vmatpush.bf16.msrb.mxu1 %v6752_v12  ;;  %v6771_v35 = vld [vmem:[#allocation10 + $0x28] sm:$0xff] }
 0x9ea   : > { %v4742_v54 = vpack.c.bf16 %v4730_v55, %v4730_v55  ;;  %v4609_v58 = vadd.f32 %v4608_v38, %v8375_v3  ;;  %v6770_v55 = vld [vmem:[#allocation10 + $0x20] sm:$0xff] }
 0x9ec   : > { %v4705_v15 = vadd.f32 %v4684_v7, %v4609_v58  ;;  %6458 = vmatmul.msk.bf16.vlgmr.msrb.gmra.mxu2 %vm443_vm0, %v4742_v54 }
 0x9ed   : > { %5236 = vmatpush.bf16.msrb.mxu2 %v6757_v2  ;;  %5198 = vmatpush.bf16.msrb.mxu1 %v6751_v21  ;;  %v6769_v21 = vld [vmem:[#allocation10 + $0x18] sm:$0xff] }
 0x9ee   : > { %v4719_v5 = vadd.f32 %v8387_v47, %v4705_v15 }
 0x9f0   : > { %v4731_v53 = vmax.f32 %v4719_v5, 0.0  ;;  %v6767_v5 = vld [vmem:[#allocation10 + $0x8] sm:$0xff] }
 0x9f1   : > { %v4610_v8 = vpop.f32.mrf.mxu3  ;;  %5237 = vmatpush.bf16.msrb.mxu2 %v6756_v6  ;;  %5199 = vmatpush.bf16.msrb.mxu1 %v6750_v51 }
 0x9f2   : > { %v4743_v50 = vpack.c.bf16 %v4731_v53, %v4731_v53  ;;  %v4611_v10 = vadd.f32 %v4610_v8, %v8377_v59 }
 0x9f4   : > { %v4706_v3 = vadd.f32 %v4686_v17, %v4611_v10  ;;  %6475 = vmatmul.msk.bf16.vlgmr.msra.gmra.mxu1 %vm443_vm0, %v4743_v50  ;;  %v6768_v17 = vld [vmem:[#allocation10 + $0x10] sm:$0xff] }
 0x9f5   : > { %5238 = vmatpush.bf16.msrb.mxu2 %v6755_v14  ;;  %5276 = vmatpush.bf16.msra.mxu1 %v6761_v24  ;;  %v6766_v24 = vld [vmem:[#allocation10] sm:$0xff] }
 0x9f6   : > { %v4720_v18 = vadd.f32 %v8387_v47, %v4706_v3 }
 0x9f8   : > { %v4732_v42 = vmax.f32 %v4720_v18, 0.0 }
 0x9f9   : > { %v4613_v30 = vpop.f32.mrf.mxu3  ;;  %5239 = vmatpush.bf16.msrb.mxu2 %v6754_v4  ;;  %5277 = vmatpush.bf16.msra.mxu1 %v6760_v23 }
 0x9fa   : > { %v4744_v36 = vpack.c.bf16 %v4732_v42, %v4732_v42  ;;  %v4614_v20 = vadd.f32 %v4613_v30, %v8379_v40  ;;  %v6762_v40 = vld [vmem:[#allocation8 + $0x160] sm:$0xff] }
 0x9fc   : > { %v4707_v59 = vadd.f32 %v4689_v16, %v4614_v20  ;;  %6492 = vmatmul.msk.bf16.vlgmr.msra.gmra.mxu2 %vm443_vm0, %v4744_v36 }
 0x9fd   : > { %5316 = vmatpush.bf16.msra.mxu2 %v6765_v26  ;;  %5278 = vmatpush.bf16.msra.mxu1 %v6759_v37 }
 0x9fe   : > { %v4721_v9 = vadd.f32 %v8387_v47, %v4707_v59 }
 0xa00   : > { %v4733_v44 = vmax.f32 %v4721_v9, 0.0 }
 0xa01   : > { %v4615_v48 = vpop.f32.mrf.mxu3  ;;  %5317 = vmatpush.bf16.msra.mxu2 %v6764_v0  ;;  %5279 = vmatpush.bf16.msra.mxu1 %v6758_v25 }
 0xa02   : > { %v4745_v29 = vpack.c.bf16 %v4733_v44, %v4733_v44  ;;  %v4616_v11 = vadd.f32 %v4615_v48, %v8381_v57  ;;  %v6875_v44 = vld [vmem:[%s8466_s4] ss:$0 sm:$0xff] }
 0xa04   : > { %v4708_v33 = vadd.f32 %v4691_v52, %v4616_v11  ;;  %6509 = vmatmul.msk.bf16.vlgmr.msrb.gmra.mxu1 %vm443_vm0, %v4745_v29 }
 0xa05   : > { %5318 = vmatpush.bf16.msra.mxu2 %v6763_v1 }
 0xa06   : > { %v4722_v49 = vadd.f32 %v8387_v47, %v4708_v33 }
 0xa08   : > { %v4734_v41 = vmax.f32 %v4722_v49, 0.0  ;;  %v6876_v49 = vld [vmem:[%s8466_s4 + $0x1] ss:$0 sm:$0xff] }
 0xa09   : > { %v4618_v46 = vpop.f32.mrf.mxu3  ;;  %5319 = vmatpush.bf16.msra.mxu2 %v6762_v40 }
 0xa0a   : > { %v4746_v45 = vpack.c.bf16 %v4734_v41, %v4734_v41  ;;  %v4619_v31 = vadd.f32 %v4618_v46, %v8383_v61  ;;  %v6773_v61 = vld [vmem:[#allocation10 + $0x38] sm:$0xff] }
 0xa0b   : > { %5407 = vmatpush.bf16.msra.mxu3 %v6773_v61 }
 0xa0c   : > { %v4709_v39 = vadd.f32 %v4694_v28, %v4619_v31  ;;  %6526 = vmatmul.msk.bf16.vlgmr.msrb.gmra.mxu2 %vm443_vm0, %v4746_v45 }
 0xa0e   : > { %v4723_v32 = vadd.f32 %v8387_v47, %v4709_v39 }
 0xa0f   : > { %5408 = vmatpush.bf16.msra.mxu3 %v6772_v56 }
 0xa10   : > { %v4735_v57 = vmax.f32 %v4723_v32, 0.0 }
 0xa11   : > { %v4620_v63 = vpop.f32.mrf.mxu3 }
 0xa12   : > { %v4747_v43 = vpack.c.bf16 %v4735_v57, %v4735_v57  ;;  %v4621_v7 = vadd.f32 %v4620_v63, %v8385_v34 }
 0xa13   : > { %5409 = vmatpush.bf16.msra.mxu3 %v6771_v35 }
 0xa14   : > { %v4710_v22 = vadd.f32 %v4696_v60, %v4621_v7  ;;  %6543 = vmatmul.msk.bf16.vlgmr.msra.gmra.mxu1 %vm443_vm0, %v4747_v43 }
 0xa16   : > { %v4724_v62 = vadd.f32 %v8387_v47, %v4710_v22 }
 0xa17   : > { %5410 = vmatpush.bf16.msra.mxu3 %v6770_v55 }
 0xa18   : > { %v4736_v13 = vmax.f32 %v4724_v62, 0.0 }
 0xa1a   : > { %v4748_v27 = vpack.c.bf16 %v4736_v13, %v4736_v13 }
 0xa1b   : > { %5411 = vmatpush.bf16.msra.mxu3 %v6769_v21 }
 0xa1c   : > { %6560 = vmatmul.msk.bf16.vlgmr.msra.gmra.mxu2 %vm443_vm0, %v4748_v27 }
 0xa1f   : > { %5412 = vmatpush.bf16.msra.mxu3 %v6768_v17 }
 0xa23   : > { %5413 = vmatpush.bf16.msra.mxu3 %v6767_v5 }
 0xa27   : > { %5414 = vmatpush.bf16.msra.mxu3 %v6766_v24 }
 0xa41   : > { %v4881_v12 = vpop.f32.mrf.mxu1 }
 0xa49   : > { %v4883_v19 = vpop.f32.mrf.mxu1 }
 0xa4f   : > { %v4921_v34 = vpop.f32.mrf.mxu2 }
 0xa50   : > { %v5325_v3 = vadd.f32 %v4921_v34, %v4881_v12 }
 0xa51   : > { %v4961_v38 = vpop.f32.mrf.mxu1 }
 0xa52   : > { %v5326_v16 = vadd.f32 %v5325_v3, %v4961_v38 }
 0xa57   : > { %v4923_v2 = vpop.f32.mrf.mxu2 }
 0xa59   : > { %v4963_v54 = vpop.f32.mrf.mxu1 }
 0xa5f   : > { %v5001_v47 = vpop.f32.mrf.mxu2 }
 0xa60   : > { %v5327_v23 = vadd.f32 %v5326_v16, %v5001_v47 }
 0xa61   : > { %v5041_v58 = vpop.f32.mrf.mxu1 }
 0xa62   : > { %v5328_v42 = vadd.f32 %v5327_v23, %v5041_v58 }
 0xa67   : > { %v5003_v15 = vpop.f32.mrf.mxu2 }
 0xa69   : > { %v5043_v6 = vpop.f32.mrf.mxu1 }
 0xa6f   : > { %v5081_v51 = vpop.f32.mrf.mxu2 }
 0xa70   : > { %v5329_v30 = vadd.f32 %v5328_v42, %v5081_v51 }
 0xa71   : > { %v5121_v53 = vpop.f32.mrf.mxu1 }
 0xa72   : > { %v5330_v36 = vadd.f32 %v5329_v30, %v5121_v53 }
 0xa77   : > { %v5083_v8 = vpop.f32.mrf.mxu2 }
 0xa79   : > { %v5123_v14 = vpop.f32.mrf.mxu1 }
 0xa7f   : > { %v5161_v50 = vpop.f32.mrf.mxu2 }
 0xa80   : > { %v5331_v20 = vadd.f32 %v5330_v36, %v5161_v50 }
 0xa81   : > { %v5201_v10 = vpop.f32.mrf.mxu1 }
 0xa82   : > { %v5332_v0 = vadd.f32 %v5331_v20, %v5201_v10 }
 0xa87   : > { %v5163_v4 = vpop.f32.mrf.mxu2 }
 0xa89   : > { %v5203_v18 = vpop.f32.mrf.mxu1 }
 0xa8f   : > { %v5241_v26 = vpop.f32.mrf.mxu2 }
 0xa90   : > { %v5333_v9 = vadd.f32 %v5332_v0, %v5241_v26 }
 0xa91   : > { %v5281_v37 = vpop.f32.mrf.mxu1 }
 0xa92   : > { %v5334_v52 = vadd.f32 %v5333_v9, %v5281_v37 }
 0xa97   : > { %v5243_v59 = vpop.f32.mrf.mxu2 }
 0xa99   : > { %v5283_v25 = vpop.f32.mrf.mxu1 }
 0xa9f   : > { %v5321_v48 = vpop.f32.mrf.mxu2 }
 0xaa0   : > { %v5335_v1 = vadd.f32 %v5334_v52, %v5321_v48 }
 0xaa2   : > { %v5338_v29 = vadd.f32 %v6875_v44, %v5335_v1 }
 0xaa4   : > { %v5339_v11 = vmax.f32 %v5338_v29, 0.0 }
 0xaa6   : > { %v5340_v33 = vpack.c.bf16 %v5339_v11, %v5339_v11 }
 0xaa7   : > { %v5323_v40 = vpop.f32.mrf.mxu2 }
 0xaa8   : > { %5415 = vmatmul.bf16.vlgmr.msra.gmra.mxu3 %v5340_v33 }
 0xb2b   : > { %v5416_v41 = vpop.f32.mrf.mxu3 }
 0xb2c   : > { %v5417_v28 = vadd.f32 %v6876_v49, %v5416_v41 }
 0xb2e   : > { %5420 = vst [vmem:[%s337_s30] sm:$0xff] %v5417_v28 }
 0xb2f   : > { %7054 = shalt.err (!%p7051_p10)
}
 0xb30   : > { %6792 = dma.vmem_to_hbm [thread:$0]  (%p7233_p3), %s5435_s10, 128, %s5437_s12, %s5422_s13  }
 0xb33   : > { %v5418_v46 = vpop.f32.mrf.mxu3 }
 0xb34 PF: > { %s5448_s15 = sand.u32 1, %s7089_s21   ;;  %p8479_p12 = scmp.ge.s32.totalorder %s7101_s24, 2 }
 0xb35   : > { %s5449_s19 = scalar_lea.sflag [#allocation4], %s5448_s15 }
 0xb36   : > { %p6812_p13 = pnand %p8479_p12, %p7181_p6 }
 0xb38   : > { %p6813_p0 = pneg %p6812_p13 }
 0xb3a   : > { %7084 = dma.done.wait (%p6813_p0), %s5449_s19, 128  }
 0xb3b   : > { %7086 = vsyncadd (%p6813_p0), %s5449_s19, 4294967168  ;;  %p21_p5 = scmp.ge.s32.totalorder %s7223_s18, 4   ;;  %s8480_s21 = smov %s7093_s22 }
 0xb3c   : > { %s8481_s22 = smov %s7097_s23  ;;  %s8482_s23 = smov %s7239_s26 }
 0xb3d   : > { %s8483_s24 = smov %s7223_s18  ;;  %23 = sbr.rel (!%p21_p5) target bundleno = 7 (0x7), region = 134 }
 0xb42   :  { %5455 = vsyncpa [#allocation3], 1 }
 0xb43   :  { %5457 = vsyncpa [#allocation3 + $0x1], 1 }
 0xb44   :  { %5458 = vsyncpa [#allocation6], 1 }
 0xb45   :  { %5459 = vsyncpa [#allocation9], 1 }
 0xb46   :  { %5460 = vsyncpa [#allocation4], 1 }
 0xb47   :  { %5462 = vsyncpa [#allocation4 + $0x1], 1 }

</bundles_post_ra>
